<compile_context>
chip_gen: v7x
topology: tpu7x:2x2x1
jax: 0.10.0
libtpu: 0.0.40
codegen_flags: <defaults>
</compile_context>

<pallas_src>
import functools

import jax
import jax.numpy as jnp
from jax.experimental import pallas as pl
from jax.experimental.pallas import tpu as pltpu


# ---------------------------------------------------------------------------
# Kernels
# ---------------------------------------------------------------------------

def _activate(h, activation):
    """Elementwise activation in f32 on the VPU/EUP."""
    if activation == "relu":
        return jnp.maximum(h, 0.0)
    if activation == "leaky":
        return jnp.where(h > 0, h, 0.2 * h)
    if activation == "gelu":
        return jax.nn.gelu(h, approximate=False)
    if activation == "selu":
        return jax.nn.selu(h)
    raise ValueError("Unsupported activation function")


def ffn_resident_kernel(x_ref, w1_ref, w2_ref, o_ref, *, activation):
    """Weight-resident path. Grid = (batch_tiles,). Whole FFN fused per tile."""
    h = jnp.dot(x_ref[...], w1_ref[...], preferred_element_type=jnp.float32)
    h = _activate(h, activation)
    # Dropout: eval-mode identity.
    o_ref[...] = jnp.dot(h.astype(x_ref.dtype), w2_ref[...],
                         preferred_element_type=jnp.float32).astype(o_ref.dtype)


def ffn_ftiled_kernel(x_ref, w1_ref, w2_ref, o_ref, acc_ref, *, activation):
    """Fallback path for large F. Grid = (batch_tiles, f_tiles); F is a reduction."""
    f = pl.program_id(1)

    # First linear (column chunk of W1^T): (tb, tf)
    h = jnp.dot(x_ref[...], w1_ref[...], preferred_element_type=jnp.float32)
    h = _activate(h, activation)          # elementwise -> chunking over F is exact
    # Dropout: eval-mode identity.
    part = jnp.dot(h.astype(x_ref.dtype), w2_ref[...],
                   preferred_element_type=jnp.float32)

    @pl.when(f == 0)
    def _():
        acc_ref[...] = part               # assign on first step (no zero+add)

    @pl.when(f != 0)
    def _():
        acc_ref[...] += part

    @pl.when(f == pl.num_programs(1) - 1)
    def _():
        o_ref[...] = acc_ref[...].astype(o_ref.dtype)


# ---------------------------------------------------------------------------
# Wrapper
# ---------------------------------------------------------------------------

def _pick_tile(n, cap, align):
    """Largest divisor of n that is <= cap and a multiple of `align`.

    Falls back to the full extent n (always legal: block == full array dim);
    the caller asserts the resulting footprint against the VMEM budget.
    """
    if n <= cap:
        return n
    for t in range(min(cap, n), 0, -1):
        if n % t == 0 and t % align == 0:
            return t
    return n


def _vmem_budget_bytes():
    """Generation-aware scoped-VMEM budget: physical capacity minus headroom."""
    cap = 64 * 1024 * 1024  # conservative (v7x physical) if the query fails
    try:
        info = pltpu.get_tpu_info()
        cap = int(getattr(info, "vmem_capacity_bytes", cap))
    except Exception:
        pass
    # Leave 16 MiB for compiler internal scratch / DMA windows / semaphores.
    return max(cap - 16 * 1024 * 1024, 32 * 1024 * 1024)


def feed_forward(x, w1t, w2t, *, activation="relu", tb=None, tf=None):
    """x: [B, D], w1t: [D, F] (= W1.T), w2t: [F, D] (= W2.T)  ->  [B, D]."""
    B, D = x.shape
    Dw, F = w1t.shape
    assert Dw == D and w2t.shape == (F, D)
    # Lane-dense output: D must be a multiple of 128 (avoids masked partial stores).
    # TODO(synk): pad D/F in the wrapper for general (non-multiple-of-128) dims.
    assert D % 128 == 0, "D must be a multiple of 128 (pad in caller)"

    itemsize = jnp.dtype(x.dtype).itemsize
    sub_align = max(8, 32 // itemsize)      # f32: 8, bf16: 16, int8/fp8: 32
    budget = _vmem_budget_bytes()

    # Batch tile: as large as possible for MXU occupancy, but guarantee >= 2
    # batch tiles when B allows it so the "parallel" axis can shard across
    # v7x's two TensorCores.
    if tb is None:
        tb_cap = 256
        if B >= 2 * sub_align:
            tb_cap = min(tb_cap, B // 2)
        if B % 128 == 0 and tb_cap >= 128:
            tb = _pick_tile(B, tb_cap, 128)   # 128-multiples map cleanly on v5e MXU
        else:
            tb = _pick_tile(B, tb_cap, sub_align)
    assert B % tb == 0

    # --------------------------------------------------------------
    # Primary path: weights fully VMEM-resident, grid = (B // tb,)
    # --------------------------------------------------------------
    # Conservative footprint: count 2x on every input/output window plus the
    # f32 intermediate h.
    resident_fp = (2 * 2 * D * F * itemsize      # both weights (double-counted)
                   + 4 * tb * D * itemsize       # x + out windows, double-buffered
                   + tb * F * 4 + tb * D * 4)    # f32 intermediates

    if tf is None and resident_fp <= budget:
        kernel = functools.partial(ffn_resident_kernel, activation=activation)
        return pl.pallas_call(
            kernel,
            out_shape=jax.ShapeDtypeStruct((B, D), x.dtype),
            grid_spec=pltpu.PrefetchScalarGridSpec(
                num_scalar_prefetch=0,
                grid=(B // tb,),
                in_specs=[
                    pl.BlockSpec((tb, D), lambda i: (i, 0)),  # x tile
                    pl.BlockSpec((D, F), lambda i: (0, 0)),   # W1^T, resident
                    pl.BlockSpec((F, D), lambda i: (0, 0)),   # W2^T, resident
                ],
                out_specs=pl.BlockSpec((tb, D), lambda i: (i, 0)),
            ),
            compiler_params=pltpu.CompilerParams(
                dimension_semantics=("parallel",),
                vmem_limit_bytes=budget,
            ),
        )(x, w1t, w2t)

    # --------------------------------------------------------------
    # Fallback path: large F -> tile F as a reduction axis
    # --------------------------------------------------------------
    if tf is None:
        tf_cap = 2048
        while tf_cap >= 128:
            tf = _pick_tile(F, min(tf_cap, F), 128)
            fp = (4 * D * tf * itemsize          # double-buffered weight chunks
                  + 4 * tb * D * itemsize        # x + out windows
                  + tb * D * 4 + tb * tf * 4)    # f32 acc + intermediate h
            if F % tf == 0 and fp <= budget:
                break
            tf_cap //= 2
    assert F % tf == 0
    ftiled_fp = 4 * D * tf * itemsize + 4 * tb * D * itemsize + tb * D * 4 + tb * tf * 4
    assert ftiled_fp <= budget, (
        f"F-tiled footprint {ftiled_fp} B exceeds VMEM budget {budget} B; "
        f"pad F to a 128-multiple or pass smaller tb/tf")
    # TODO(synk): add pipeline_mode=pl.Buffered(3) on the weight specs if a
    #             profile shows exposed weight-fetch DMA (mainly v5e).

    kernel = functools.partial(ffn_ftiled_kernel, activation=activation)
    return pl.pallas_call(
        kernel,
        out_shape=jax.ShapeDtypeStruct((B, D), x.dtype),
        grid_spec=pltpu.PrefetchScalarGridSpec(
            num_scalar_prefetch=0,
            grid=(B // tb, F // tf),
            in_specs=[
                pl.BlockSpec((tb, D), lambda i, f: (i, 0)),   # x tile (reused over f)
                pl.BlockSpec((D, tf), lambda i, f: (0, f)),   # W1^T column chunk
                pl.BlockSpec((tf, D), lambda i, f: (f, 0)),   # W2^T row chunk
            ],
            out_specs=pl.BlockSpec((tb, D), lambda i, f: (i, 0)),
            scratch_shapes=[pltpu.VMEM((tb, D), jnp.float32)],  # f32 accumulator
        ),
        compiler_params=pltpu.CompilerParams(
            dimension_semantics=("parallel", "arbitrary"),
            vmem_limit_bytes=budget,
        ),
    )(x, w1t, w2t)


# ---------------------------------------------------------------------------
# Demo / correctness check
# ---------------------------------------------------------------------------

if __name__ == "__main__":
    # Module-default feature sizes (dimension=512, dim_feedforward=1024), small batch.
    B, D, F = 16, 512, 1024
    key = jax.random.PRNGKey(0)
    kx, k1, k2 = jax.random.split(key, 3)

    # Deterministic synthetic parameters (PyTorch Linear layout: W1 [F, D], W2 [D, F]).
    x = jax.random.normal(kx, (B, D), dtype=jnp.float32)
    w1 = jax.random.uniform(k1, (F, D), jnp.float32, -1.0, 1.0) * (1.0 / jnp.sqrt(D))
    w2 = jax.random.uniform(k2, (D, F), jnp.float32, -1.0, 1.0) * (1.0 / jnp.sqrt(F))

    # Pre-transpose weights for the kernel's row-major layout.
    w1t = jnp.asarray(w1.T)  # [D, F]
    w2t = jnp.asarray(w2.T)  # [F, D]

    # f32 path, tight tolerance vs a HIGHEST-precision pure-JAX reference.
    out = jax.block_until_ready(feed_forward(x, w1t, w2t))
    hp = jax.lax.Precision.HIGHEST
    ref = jnp.maximum(jnp.dot(x, w1.T, precision=hp), 0.0)
    ref = jnp.dot(ref, w2.T, precision=hp)
    assert out.shape == (B, D)
    assert jnp.allclose(out, ref, atol=1e-4, rtol=1e-4), "f32 mismatch vs reference"

    # bf16 path (native MXU dtype on v6e/v7x); compare vs a matching bf16/f32-acc
    # reference with loosened tolerances.
    xb = x.astype(jnp.bfloat16)
    w1tb = w1t.astype(jnp.bfloat16)
    w2tb = w2t.astype(jnp.bfloat16)
    out_bf = jax.block_until_ready(feed_forward(xb, w1tb, w2tb))
    hb = jnp.maximum(jnp.dot(xb, w1tb, preferred_element_type=jnp.float32), 0.0)
    ref_bf = jnp.dot(hb.astype(jnp.bfloat16), w2tb, preferred_element_type=jnp.float32)
    assert out_bf.dtype == jnp.bfloat16
    assert jnp.allclose(out_bf.astype(jnp.float32), ref_bf.astype(jnp.float32),
                        atol=5e-2, rtol=5e-2), "bf16 mismatch vs reference"

    print("KERNEL_OK")
</pallas_src>

<mosaic_0001>
module attributes {stable_mosaic.version = 11 : i64} {
  func.func @ffn_resident_kernel(%arg0: i32, %arg1: memref<8x512xf32, #tpu.memory_space<vmem>>, %arg2: memref<512x1024xf32, #tpu.memory_space<vmem>>, %arg3: memref<1024x512xf32, #tpu.memory_space<vmem>>, %arg4: memref<8x512xf32, #tpu.memory_space<vmem>>) attributes {dimension_semantics = [#tpu.dimension_semantics<parallel>], iteration_bounds = array<i64: 2>, scalar_prefetch = 0 : i64, scratch_operands = 0 : i64, tpu.core_type = #tpu.core_type<tc>, window_params = [{transform_indices = @transform_0, window_bounds = array<i64: 8, 512>}, {pipeline_mode = #tpu.pipeline_mode<synchronous>, transform_indices = @transform_1, window_bounds = array<i64: 512, 1024>}, {pipeline_mode = #tpu.pipeline_mode<synchronous>, transform_indices = @transform_2, window_bounds = array<i64: 1024, 512>}, {transform_indices = @transform_3, window_bounds = array<i64: 8, 512>}]} {
    %c0 = arith.constant 0 : index
    %c0_0 = arith.constant 0 : index
    %0 = vector.load %arg1[%c0, %c0_0] : memref<8x512xf32, #tpu.memory_space<vmem>>, vector<8x512xf32>
    %c0_1 = arith.constant 0 : index
    %c0_2 = arith.constant 0 : index
    %1 = vector.load %arg2[%c0_1, %c0_2] : memref<512x1024xf32, #tpu.memory_space<vmem>>, vector<512x1024xf32>
    %cst = arith.constant dense<0.000000e+00> : vector<8x1024xf32>
    %2 = tpu.matmul %0, %1, %cst {dimension_numbers = #tpu.dot_dimension_numbers<[1], [0], [0], [1], [0, 0, 1, 1], [], []>} : vector<8x512xf32>, vector<512x1024xf32>, vector<8x1024xf32> -> vector<8x1024xf32>
    %cst_3 = arith.constant 0.000000e+00 : f32
    %3 = vector.broadcast %cst_3 : f32 to vector<8x1024xf32>
    %4 = arith.maximumf %2, %3 : vector<8x1024xf32>
    %c0_4 = arith.constant 0 : index
    %c0_5 = arith.constant 0 : index
    %5 = vector.load %arg3[%c0_4, %c0_5] : memref<1024x512xf32, #tpu.memory_space<vmem>>, vector<1024x512xf32>
    %cst_6 = arith.constant dense<0.000000e+00> : vector<8x512xf32>
    %6 = tpu.matmul %4, %5, %cst_6 {dimension_numbers = #tpu.dot_dimension_numbers<[1], [0], [0], [1], [0, 0, 1, 1], [], []>} : vector<8x1024xf32>, vector<1024x512xf32>, vector<8x512xf32> -> vector<8x512xf32>
    %c0_7 = arith.constant 0 : index
    %c0_8 = arith.constant 0 : index
    %7 = vector.load %arg4[%c0_7, %c0_8] : memref<8x512xf32, #tpu.memory_space<vmem>>, vector<8x512xf32>
    tpu.vector_store %arg4[%c0_7, %c0_8], %6 {strides = array<i32>} : memref<8x512xf32, #tpu.memory_space<vmem>>, vector<8x512xf32>,
    return
  }
  func.func @transform_0(%arg0: i32) -> (i32, i32) {
    %c0_i32 = arith.constant 0 : i32
    %c0_i32_0 = arith.constant 0 : i32
    return %arg0, %c0_i32 : i32, i32
  }
  func.func @transform_1(%arg0: i32) -> (i32, i32) {
    %c0_i32 = arith.constant 0 : i32
    %c0_i32_0 = arith.constant 0 : i32
    %c0_i32_1 = arith.constant 0 : i32
    return %c0_i32, %c0_i32_0 : i32, i32
  }
  func.func @transform_2(%arg0: i32) -> (i32, i32) {
    %c0_i32 = arith.constant 0 : i32
    %c0_i32_0 = arith.constant 0 : i32
    %c0_i32_1 = arith.constant 0 : i32
    return %c0_i32, %c0_i32_0 : i32, i32
  }
  func.func @transform_3(%arg0: i32) -> (i32, i32) {
    %c0_i32 = arith.constant 0 : i32
    %c0_i32_0 = arith.constant 0 : i32
    return %arg0, %c0_i32 : i32, i32
  }
}

</mosaic_0001>

<bundles_post_ra>
// kernel: tpu_custom_call.1
= control target key start
LH: loop header
LB: loop body
LE: loop exit
PB: predicated region body
PF: predicated region fallthrough
CT: control target
= control target key end

     0   :  { %8 = vsyncpa [#allocation3], 0  ;;  %s4078_s0 = inlined_call_operand.hbm [shape: f32[16,512], index: 0, kind: input, shape index: {}]   ;;  %s4079_s1 = inlined_call_operand.hbm [shape: f32[512,1024], index: 1, kind: input, shape index: {}]   ;;  %s4080_s2 = inlined_call_operand.hbm [shape: f32[1024,512], index: 2, kind: input, shape index: {}]   ;;  %s4081_s3 = inlined_call_operand.hbm [shape: f32[16,512], index: 3, kind: output, shape index: {}]  }
   0x1   :  { %10 = vsyncpa [#allocation3 + $0x1], 0 }
   0x2   :  { %11 = vsyncpa [#allocation6], 0 }
   0x3   :  { %12 = vsyncpa [#allocation4], 0 }
   0x4   :  { %14 = vsyncpa [#allocation4 + $0x1], 0  ;;  %s3819_s12 = smov 0   ;;  %s3821_s13 = smov 0  }
   0x5   :  { %s3823_s14 = smov 0   ;;  %s3825_s15 = smov 0  }
   0x6 LB: > { %s3840_s16 = sadd.s32 4294967295, %s3789_s15   ;;  %s2496_s17 = sadd.s32 4294967294, %s3789_s15   ;;  %s3789_s15 = sphi %s3825_s15, %s4101_s15   ;;  %s3785_s14 = sphi %s3823_s14, %s4100_s14   ;;  %s3781_s13 = sphi %s3821_s13, %s4099_s13   ;;  %s3777_s12 = sphi %s3819_s12, %s4098_s12  }
   0x7   : > { %p40_p0 = scmp.ne.s32.totalorder %s3781_s13, %s3777_s12  ;;  %p4082_p1 = scmp.eq.s32.totalorder %s3840_s16, 0 }
   0x8   : > { %p112_p3 = scmp.eq.s32.totalorder %s2496_s17, 1  ;;  %p2497_p5 = scmp.ge.s32.totalorder %s3789_s15, 1 }
   0x9   : > { %p3849_p4 = por %p4082_p1, %p40_p0  ;;  %p119_p7 = scmp.lt.s32.totalorder %s3789_s15, 3 }
   0xa   : > { %p3854_p6 = por %p112_p3, %p40_p0  ;;  %s3791_s21 = smov [#allocation5]  }
   0xb   : > { %s4085_s18 = scalar_select %p3849_p4, 1, 0 }
   0xc   : > { %s4086_s19 = scalar_select %p3854_p6, 1, 0 }
   0xd   : > { %p3859_p8 = pnand %p2497_p5, %p119_p7  ;;  %s131_s22 = sshll.u32 %s3791_s21, 4  ;;  %s3863_s22 = int_to_ptr.vmem [resolvable:$true] %s131_s22 }
   0xe   : > { %s3792_s24 = smov [#allocation7]   ;;  %s3633_s28 = scalar_lea.hbm %s4079_s1, 65536 }
   0xf   : > { %p3572_p9 = pneg %p3859_p8  ;;  %s144_s25 = sshll.u32 %s3792_s24, 4  ;;  %s3874_s25 = int_to_ptr.vmem [resolvable:$true] %s144_s25 }
  0x10   : > { %p3634_p12 = scmp.ne.s32.totalorder %s4079_s1, %s3633_s28  ;;  %p3640_p5 = scmp.lt.u32.totalorder %s3633_s28, %s4079_s1 }
  0x11   : > { %p3870_p11 = pnand %p3572_p9, %p4082_p1 }
  0x13   : > { %p3635_p13 = pneg %p3870_p11 }
  0x15   : > { %p3636_p0 = pnand %p3635_p13, %p3634_p12 }
  0x17   : > { %p3637_p3 = pneg %p3636_p0 }
  0x19   : > { %p3642_p7 = pnand %p3640_p5, %p3637_p3 }
  0x1b   : > { %3645 = shalt.err (!%p3642_p7)
}
  0x1c   : > { %s3646_s6 = scalar_lea.vmem %s3863_s22, 65536  ;;  %p3654_p2 = scmp.lt.s32.totalorder %s3863_s22, %s3863_s22 }
  0x1d   : > { %p3647_p9 = scmp.ne.s32.totalorder %s3863_s22, %s3646_s6  ;;  %p3655_p12 = scmp.lt.s32.totalorder %s3646_s6, %s3646_s6 }
  0x1f   : > { %p3649_p10 = pnand %p3647_p9, %p3635_p13  ;;  %p3656_p0 = por %p3655_p12, %p3654_p2 }
  0x21   : > { %p3650_p1 = pneg %p3649_p10 }
  0x23   : > { %p3657_p6 = pnand %p3656_p0, %p3650_p1 }
  0x25   : > { %3660 = shalt.err (!%p3657_p6)
}
  0x26   : > { %s3793_s7 = smov 1024   ;;  %s3794_s8 = smov 64  }
  0x27   : > { %3575 = dma.hbm_to_vmem [thread:$0]  (!%p3870_p11), %s4079_s1, 65536, %s3863_s22, [#allocation6], %s3793_s7, %s3793_s7, %s3794_s8  }
  0x28   : > { %s3661_s21 = scalar_lea.hbm %s4080_s2, 65536 }
  0x29   : > { %p3662_p2 = scmp.ne.s32.totalorder %s4080_s2, %s3661_s21  ;;  %p3668_p10 = scmp.lt.u32.totalorder %s3661_s21, %s4080_s2 }
  0x2b   : > { %p3664_p1 = pnand %p3662_p2, %p3635_p13 }
  0x2d   : > { %p3665_p6 = pneg %p3664_p1 }
  0x2f   : > { %p3670_p3 = pnand %p3668_p10, %p3665_p6 }
  0x31   : > { %3673 = shalt.err (!%p3670_p3)
}
  0x32   : > { %s3674_s22 = scalar_lea.vmem %s3874_s25, 65536  ;;  %p3682_p12 = scmp.lt.s32.totalorder %s3874_s25, %s3874_s25 }
  0x33   : > { %p3675_p5 = scmp.ne.s32.totalorder %s3874_s25, %s3674_s22  ;;  %p3683_p0 = scmp.lt.s32.totalorder %s3674_s22, %s3674_s22 }
  0x35   : > { %p3677_p7 = pnand %p3675_p5, %p3635_p13  ;;  %p3684_p2 = por %p3683_p0, %p3682_p12 }
  0x37   : > { %p3678_p9 = pneg %p3677_p7 }
  0x39   : > { %p3685_p1 = pnand %p3684_p2, %p3678_p9 }
  0x3b   : > { %3688 = shalt.err (!%p3685_p1)
}
  0x3c   : > { %s3795_s29 = smov 512   ;;  %s3796_s30 = smov 32  }
  0x3d   : > { %3578 = dma.hbm_to_vmem [thread:$0]  (!%p3870_p11), %s4080_s2, 65536, %s3874_s25, [#allocation6], %s3795_s29, %s3795_s29, %s3796_s30  }
  0x3e   : > { %s3929_s6 = sadd.s32 1, %s3789_s15   ;;  %s27_s8 = sadd.s32 1, %s3785_s14 }
  0x3f   : > { %s24_s7 = ssub.s32 %s3789_s15, %s3929_s6  ;;  %p34_p6 = scmp.ne.s32.totalorder %s3785_s14, %s3781_s13 }
  0x40   : > { %p25_p13 = scmp.eq.s32.totalorder %s24_s7, 0  ;;  %p35_p10 = scmp.eq.s32.totalorder %s3789_s15, 0 }
  0x41   : > { %p4089_p5 = scmp.eq.s32.totalorder %s3840_s16, 1  ;;  %p3589_p9 = scmp.lt.s32.totalorder %s3789_s15, 2 }
  0x42   : > { %s3938_s9 = scalar_select %p25_p13, %s3785_s14, %s27_s8  }
  0x43   : > { %p36_p3 = por %p35_p10, %p34_p6  ;;  %p3942_p7 = por %p4089_p5, %p34_p6 }
  0x44   : > { %s158_s23 = sand.u32 1, %s3785_s14   ;;  %s2514_s25 = sshll.u32 %s3789_s15, 9 }
  0x45   : > { %s4090_s10 = scalar_select %p3942_p7, 1, 0 }
  0x46   : > { %s2501_s11 = sshll.u32 %s158_s23, 5  ;;  %s3952_s24 = scalar_lea.hbm %s4078_s0, %s2514_s25 }
  0x47   : > { %s162_s26 = scalar_lea.vmem [#allocation2], %s2501_s11  ;;  %p3956_p11 = pnand %p3589_p9, %p36_p3 }
  0x48   : > { %s170_s27 = sshll.u32 %s162_s26, 4  ;;  %s159_s22 = scalar_lea.sflag [#allocation3], %s158_s23  ;;  %s3954_s27 = int_to_ptr.vmem [resolvable:$true] %s170_s27 }
  0x49   : > { %s3689_s29 = scalar_lea.hbm %s3952_s24, 512  ;;  %p3691_p0 = pneg %p3956_p11 }
  0x4a   : > { %p3690_p12 = scmp.ne.s32.totalorder %s3952_s24, %s3689_s29  ;;  %s3694_s5 = scalar_lea.hbm %s4078_s0, 1024 }
  0x4b   : > { %p3695_p13 = scmp.lt.u32.totalorder %s3952_s24, %s4078_s0  ;;  %p3696_p6 = scmp.lt.u32.totalorder %s3694_s5, %s3689_s29 }
  0x4c   : > { %p3692_p2 = pnand %p3691_p0, %p3690_p12  ;;  %p3698_p3 = scmp.lt.u32.totalorder %s3689_s29, %s3952_s24 }
  0x4d   : > { %p3697_p10 = por %p3696_p6, %p3695_p13 }
  0x4e   : > { %p3693_p1 = pneg %p3692_p2 }
  0x4f   : > { %p3699_p5 = por %p3698_p3, %p3697_p10 }
  0x51   : > { %p3700_p9 = pnand %p3699_p5, %p3693_p1 }
  0x53   : > { %3703 = shalt.err (!%p3700_p9)
}
  0x54   : > { %s3704_s23 = scalar_lea.vmem %s3954_s27, 512  ;;  %s3797_s11 = smov [#allocation2]  }
  0x55   : > { %p3705_p12 = scmp.ne.s32.totalorder %s3954_s27, %s3704_s23  ;;  %s3709_s25 = sshll.u32 %s3797_s11, 4  ;;  %s3710_s25 = int_to_ptr.vmem [resolvable:$false] %s3709_s25 }
  0x56   : > { %s3711_s17 = scalar_lea.vmem %s3710_s25, 1024  ;;  %p3712_p4 = scmp.lt.s32.totalorder %s3954_s27, %s3710_s25 }
  0x57   : > { %p3707_p2 = pnand %p3705_p12, %p3691_p0  ;;  %p3713_p13 = scmp.lt.s32.totalorder %s3711_s17, %s3704_s23 }
  0x59   : > { %p3708_p7 = pneg %p3707_p2  ;;  %p3714_p6 = por %p3713_p13, %p3712_p4 }
  0x5b   : > { %p3715_p10 = pnand %p3714_p6, %p3708_p7 }
  0x5d   : > { %3718 = shalt.err (!%p3715_p10)
}
  0x5e   : > { %3582 = dma.hbm_to_vmem [thread:$0]  (!%p3956_p11), %s3952_s24, 512, %s3954_s27, %s159_s22  }
  0x5f   : > { %179 = sbr.rel (%p3859_p8) target bundleno = 873 (0x369), region = 32  ;;  %s3988_s21 = sand.u32 (!%p3859_p8), 1, %s3781_s13  }
  0x60   : > { %s2505_s26 = sshll.u32 (!%p3859_p8), %s3988_s21, 5  ;;  %s182_s29 = scalar_lea.sflag (!%p3859_p8), [#allocation3], %s3988_s21 }
  0x61   : > { %s3994_s30 = scalar_lea.vmem (!%p3859_p8), [#allocation2], %s2505_s26  ;;  %p4092_p4 = scmp.ne.s32.totalorder (!%p3859_p8), %s4085_s18, 0 }
  0x66   : > { %3764 = dma.done.wait (%p4092_p4), %s182_s29, 512  }
  0x67   : > { %3766 = vsyncadd (%p4092_p4), %s182_s29, 4294966784  ;;  %p4093_p7 = scmp.eq.s32.totalorder %s3840_s16, 0 }
  0x69   : > { %3768 = dma.done.wait (%p4093_p7), [#allocation6], 131072   ;;  %p4094_p8 = pmov %p4093_p7 }
  0x6a   : > { %v221_v0 = vld [vmem:[#allocation5 + $0x8] sm:$0xff]  ;;  %v223_v2 = vld [vmem:[#allocation5 + $0x18] sm:$0xff]  ;;  %v220_v5 = vld [vmem:[#allocation5] sm:$0xff]  ;;  %s215_s18 = scalar_lea.vmem [#allocation8], %s2505_s26  ;;  %s2515_s24 = sshll.u32 %s3840_s16, 9 }
  0x6b   : > { %3770 = vsyncadd (%p4094_p8), [#allocation6], 4294836224  ;;  %v229_v1 = vld [vmem:[#allocation5 + $0x48] sm:$0xff]  ;;  %v231_v4 = vld [vmem:[#allocation5 + $0x58] sm:$0xff]  ;;  %s2407_s20 = sshll.u32 %s215_s18, 4  ;;  %s4036_s22 = scalar_lea.hbm %s4081_s3, %s2515_s24  ;;  %s4031_s20 = int_to_ptr.vmem [resolvable:$true] %s2407_s20 }
  0x6c   : > { %v2516_v3 = vpack.c.bf16 %v229_v1, %v221_v0  ;;  %v228_v6 = vld [vmem:[#allocation5 + $0x40] sm:$0xff]  ;;  %v2644_v7 = vpack.c.bf16 %v231_v4, %v223_v2  ;;  %v222_v9 = vld [vmem:[#allocation5 + $0x10] sm:$0xff]  ;;  %v237_v11 = vld [vmem:[#allocation5 + $0x88] sm:$0xff]  ;;  %s2393_s4 = scalar_lea.sflag [#allocation4], %s3988_s21  ;;  %s3719_s16 = scalar_lea.vmem %s4031_s20, 512 }
  0x6d   : > { %v2518_v8 = vpack.c.bf16 %v228_v6, %v220_v5  ;;  %v230_v10 = vld [vmem:[#allocation5 + $0x50] sm:$0xff]  ;;  %v245_v13 = vld [vmem:[#allocation5 + $0xc8] sm:$0xff]  ;;  %v239_v14 = vld [vmem:[#allocation5 + $0x98] sm:$0xff]  ;;  %p3720_p11 = scmp.ne.s32.totalorder %s4031_s20, %s3719_s16  ;;  %p4095_p0 = scmp.ne.s32.totalorder %s4090_s10, 0 }
  0x6e   : > { %2517 = vmatprep.subr.bf16.mxu0 %v2516_v3  ;;  %v2646_v12 = vpack.c.bf16 %v230_v10, %v222_v9  ;;  %v247_v15 = vld [vmem:[#allocation5 + $0xd8] sm:$0xff]  ;;  %2645 = vmatprep.subr.bf16.mxu1 %v2644_v7  ;;  %v2520_v16 = vpack.c.bf16 %v245_v13, %v237_v11  ;;  %v236_v18 = vld [vmem:[#allocation5 + $0x80] sm:$0xff]  ;;  %v238_v20 = vld [vmem:[#allocation5 + $0x90] sm:$0xff]  ;;  %s3798_s5 = smov [#allocation8]  }
  0x6f   : > { %2519 = vmatpush1.bf16.msra.mxu0 %v2518_v8  ;;  %v2648_v17 = vpack.c.bf16 %v247_v15, %v239_v14  ;;  %v244_v19 = vld [vmem:[#allocation5 + $0xc0] sm:$0xff]  ;;  %v246_v22 = vld [vmem:[#allocation5 + $0xd0] sm:$0xff]  ;;  %v253_v23 = vld [vmem:[#allocation5 + $0x108] sm:$0xff]  ;;  %p3721_p1 = pnand %p3720_p11, %p4095_p0  ;;  %s3723_s7 = sshll.u32 %s3798_s5, 4  ;;  %s3724_s7 = int_to_ptr.vmem [resolvable:$false] %s3723_s7 }
  0x70   : > { %2647 = vmatpush1.bf16.msra.mxu1 %v2646_v12  ;;  %v2522_v21 = vpack.c.bf16 %v244_v19, %v236_v18  ;;  %v261_v24 = vld [vmem:[#allocation5 + $0x148] sm:$0xff]  ;;  %2521 = vmatprep.subr.bf16.mxu0 %v2520_v16  ;;  %v2650_v25 = vpack.c.bf16 %v246_v22, %v238_v20  ;;  %v255_v27 = vld [vmem:[#allocation5 + $0x118] sm:$0xff]  ;;  %v252_v29 = vld [vmem:[#allocation5 + $0x100] sm:$0xff]  ;;  %s3725_s8 = scalar_lea.vmem %s3724_s7, 1024  ;;  %p3726_p5 = scmp.lt.s32.totalorder %s4031_s20, %s3724_s7 }
  0x71   : > { %2649 = vmatprep.subr.bf16.mxu1 %v2648_v17  ;;  %v2524_v26 = vpack.c.bf16 %v261_v24, %v253_v23  ;;  %v263_v28 = vld [vmem:[#allocation5 + $0x158] sm:$0xff]  ;;  %v260_v31 = vld [vmem:[#allocation5 + $0x140] sm:$0xff]  ;;  %v254_v32 = vld [vmem:[#allocation5 + $0x110] sm:$0xff]  ;;  %p3722_p3 = pneg %p3721_p1  ;;  %p3727_p9 = scmp.lt.s32.totalorder %s3725_s8, %s3719_s16 }
  0x72   : > { %v2652_v30 = vpack.c.bf16 %v263_v28, %v255_v27  ;;  %v262_v33 = vld [vmem:[#allocation5 + $0x150] sm:$0xff]  ;;  %v2526_v34 = vpack.c.bf16 %v260_v31, %v252_v29  ;;  %v269_v35 = vld [vmem:[#allocation5 + $0x188] sm:$0xff]  ;;  %v271_v37 = vld [vmem:[#allocation5 + $0x198] sm:$0xff] }
  0x73   : > { %2523 = vmatpush1.bf16.msra.mxu0 %v2522_v21  ;;  %v277_v36 = vld [vmem:[#allocation5 + $0x1c8] sm:$0xff]  ;;  %v2654_v38 = vpack.c.bf16 %v262_v33, %v254_v32  ;;  %v279_v40 = vld [vmem:[#allocation5 + $0x1d8] sm:$0xff]  ;;  %v268_v41 = vld [vmem:[#allocation5 + $0x180] sm:$0xff]  ;;  %p3728_p12 = por %p3727_p9, %p3726_p5 }
  0x74   : > { %2651 = vmatpush1.bf16.msra.mxu1 %v2650_v25  ;;  %2525 = vmatprep.subr.bf16.mxu0 %v2524_v26  ;;  %v2528_v39 = vpack.c.bf16 %v277_v36, %v269_v35  ;;  %v276_v42 = vld [vmem:[#allocation5 + $0x1c0] sm:$0xff]  ;;  %v2656_v43 = vpack.c.bf16 %v279_v40, %v271_v37  ;;  %v270_v44 = vld [vmem:[#allocation5 + $0x190] sm:$0xff]  ;;  %v285_v46 = vld [vmem:[#allocation5 + $0x208] sm:$0xff] }
  0x75   : > { %2653 = vmatprep.subr.bf16.mxu1 %v2652_v30  ;;  %v278_v45 = vld [vmem:[#allocation5 + $0x1d0] sm:$0xff]  ;;  %v293_v47 = vld [vmem:[#allocation5 + $0x248] sm:$0xff]  ;;  %v287_v48 = vld [vmem:[#allocation5 + $0x218] sm:$0xff]  ;;  %v2530_v50 = vpack.c.bf16 %v276_v42, %v268_v41  ;;  %p3729_p2 = pnand %p3728_p12, %p3722_p3 }
  0x76   : > { %v295_v49 = vld [vmem:[#allocation5 + $0x258] sm:$0xff]  ;;  %v2658_v51 = vpack.c.bf16 %v278_v45, %v270_v44  ;;  %v2532_v52 = vpack.c.bf16 %v293_v47, %v285_v46  ;;  %v284_v53 = vld [vmem:[#allocation5 + $0x200] sm:$0xff]  ;;  %v286_v55 = vld [vmem:[#allocation5 + $0x210] sm:$0xff] }
  0x77   : > { %2527 = vmatpush1.bf16.msra.mxu0 %v2526_v34  ;;  %v292_v54 = vld [vmem:[#allocation5 + $0x240] sm:$0xff]  ;;  %v2660_v56 = vpack.c.bf16 %v295_v49, %v287_v48  ;;  %v294_v57 = vld [vmem:[#allocation5 + $0x250] sm:$0xff]  ;;  %v301_v58 = vld [vmem:[#allocation5 + $0x288] sm:$0xff] }
  0x78   : > { %2655 = vmatpush1.bf16.msra.mxu1 %v2654_v38  ;;  %2529 = vmatprep.subr.bf16.mxu0 %v2528_v39  ;;  %v309_v59 = vld [vmem:[#allocation5 + $0x2c8] sm:$0xff]  ;;  %v303_v60 = vld [vmem:[#allocation5 + $0x298] sm:$0xff]  ;;  %v2534_v62 = vpack.c.bf16 %v292_v54, %v284_v53  ;;  %v2662_v63 = vpack.c.bf16 %v294_v57, %v286_v55  ;;  %v300_v1 = vld [vmem:[#allocation5 + $0x280] sm:$0xff] }
  0x79   : > { %2657 = vmatprep.subr.bf16.mxu1 %v2656_v43  ;;  %v311_v61 = vld [vmem:[#allocation5 + $0x2d8] sm:$0xff]  ;;  %v2536_v0 = vpack.c.bf16 %v309_v59, %v301_v58  ;;  %v308_v2 = vld [vmem:[#allocation5 + $0x2c0] sm:$0xff]  ;;  %v302_v3 = vld [vmem:[#allocation5 + $0x290] sm:$0xff] }
  0x7a   : > { %v2664_v4 = vpack.c.bf16 %v311_v61, %v303_v60  ;;  %v310_v5 = vld [vmem:[#allocation5 + $0x2d0] sm:$0xff]  ;;  %v317_v6 = vld [vmem:[#allocation5 + $0x308] sm:$0xff]  ;;  %v319_v8 = vld [vmem:[#allocation5 + $0x318] sm:$0xff]  ;;  %v2538_v10 = vpack.c.bf16 %v308_v2, %v300_v1 }
  0x7b   : > { %2531 = vmatpush1.bf16.msra.mxu0 %v2530_v50  ;;  %v325_v7 = vld [vmem:[#allocation5 + $0x348] sm:$0xff]  ;;  %v327_v9 = vld [vmem:[#allocation5 + $0x358] sm:$0xff]  ;;  %v2666_v11 = vpack.c.bf16 %v310_v5, %v302_v3  ;;  %v316_v13 = vld [vmem:[#allocation5 + $0x300] sm:$0xff] }
  0x7c   : > { %2659 = vmatpush1.bf16.msra.mxu1 %v2658_v51  ;;  %2533 = vmatprep.subr.bf16.mxu0 %v2532_v52  ;;  %v2540_v12 = vpack.c.bf16 %v325_v7, %v317_v6  ;;  %v324_v14 = vld [vmem:[#allocation5 + $0x340] sm:$0xff]  ;;  %v318_v15 = vld [vmem:[#allocation5 + $0x310] sm:$0xff]  ;;  %v2668_v16 = vpack.c.bf16 %v327_v9, %v319_v8  ;;  %v333_v18 = vld [vmem:[#allocation5 + $0x388] sm:$0xff] }
  0x7d   : > { %2661 = vmatprep.subr.bf16.mxu1 %v2660_v56  ;;  %v326_v17 = vld [vmem:[#allocation5 + $0x350] sm:$0xff]  ;;  %v341_v19 = vld [vmem:[#allocation5 + $0x3c8] sm:$0xff]  ;;  %v335_v20 = vld [vmem:[#allocation5 + $0x398] sm:$0xff]  ;;  %v2542_v22 = vpack.c.bf16 %v324_v14, %v316_v13 }
  0x7e   : > { %v343_v21 = vld [vmem:[#allocation5 + $0x3d8] sm:$0xff]  ;;  %v2670_v23 = vpack.c.bf16 %v326_v17, %v318_v15  ;;  %v2544_v24 = vpack.c.bf16 %v341_v19, %v333_v18  ;;  %v332_v25 = vld [vmem:[#allocation5 + $0x380] sm:$0xff]  ;;  %v334_v27 = vld [vmem:[#allocation5 + $0x390] sm:$0xff] }
  0x7f   : > { %2535 = vmatpush1.bf16.msra.mxu0 %v2534_v62  ;;  %v340_v26 = vld [vmem:[#allocation5 + $0x3c0] sm:$0xff]  ;;  %v2672_v28 = vpack.c.bf16 %v343_v21, %v335_v20  ;;  %v342_v29 = vld [vmem:[#allocation5 + $0x3d0] sm:$0xff]  ;;  %v349_v30 = vld [vmem:[#allocation5 + $0x408] sm:$0xff] }
  0x80   : > { %2663 = vmatpush1.bf16.msra.mxu1 %v2662_v63  ;;  %2537 = vmatprep.subr.bf16.mxu0 %v2536_v0  ;;  %v357_v31 = vld [vmem:[#allocation5 + $0x448] sm:$0xff]  ;;  %v351_v32 = vld [vmem:[#allocation5 + $0x418] sm:$0xff]  ;;  %v2546_v34 = vpack.c.bf16 %v340_v26, %v332_v25  ;;  %v2674_v35 = vpack.c.bf16 %v342_v29, %v334_v27  ;;  %v348_v37 = vld [vmem:[#allocation5 + $0x400] sm:$0xff] }
  0x81   : > { %2665 = vmatprep.subr.bf16.mxu1 %v2664_v4  ;;  %v359_v33 = vld [vmem:[#allocation5 + $0x458] sm:$0xff]  ;;  %v2548_v36 = vpack.c.bf16 %v357_v31, %v349_v30  ;;  %v356_v38 = vld [vmem:[#allocation5 + $0x440] sm:$0xff]  ;;  %v350_v39 = vld [vmem:[#allocation5 + $0x410] sm:$0xff] }
  0x82   : > { %v2676_v40 = vpack.c.bf16 %v359_v33, %v351_v32  ;;  %v358_v41 = vld [vmem:[#allocation5 + $0x450] sm:$0xff]  ;;  %v365_v42 = vld [vmem:[#allocation5 + $0x488] sm:$0xff]  ;;  %v367_v44 = vld [vmem:[#allocation5 + $0x498] sm:$0xff]  ;;  %v2550_v46 = vpack.c.bf16 %v356_v38, %v348_v37 }
  0x83   : > { %2539 = vmatpush1.bf16.msra.mxu0 %v2538_v10  ;;  %v373_v43 = vld [vmem:[#allocation5 + $0x4c8] sm:$0xff]  ;;  %v375_v45 = vld [vmem:[#allocation5 + $0x4d8] sm:$0xff]  ;;  %v2678_v47 = vpack.c.bf16 %v358_v41, %v350_v39  ;;  %v364_v49 = vld [vmem:[#allocation5 + $0x480] sm:$0xff] }
  0x84   : > { %2667 = vmatpush1.bf16.msra.mxu1 %v2666_v11  ;;  %2541 = vmatprep.subr.bf16.mxu0 %v2540_v12  ;;  %v2552_v48 = vpack.c.bf16 %v373_v43, %v365_v42  ;;  %v372_v50 = vld [vmem:[#allocation5 + $0x4c0] sm:$0xff]  ;;  %v366_v51 = vld [vmem:[#allocation5 + $0x490] sm:$0xff]  ;;  %v2680_v52 = vpack.c.bf16 %v375_v45, %v367_v44  ;;  %v381_v54 = vld [vmem:[#allocation5 + $0x508] sm:$0xff] }
  0x85   : > { %2669 = vmatprep.subr.bf16.mxu1 %v2668_v16  ;;  %v374_v53 = vld [vmem:[#allocation5 + $0x4d0] sm:$0xff]  ;;  %v389_v55 = vld [vmem:[#allocation5 + $0x548] sm:$0xff]  ;;  %v383_v56 = vld [vmem:[#allocation5 + $0x518] sm:$0xff]  ;;  %v2554_v58 = vpack.c.bf16 %v372_v50, %v364_v49 }
  0x86   : > { %v391_v57 = vld [vmem:[#allocation5 + $0x558] sm:$0xff]  ;;  %v2682_v59 = vpack.c.bf16 %v374_v53, %v366_v51  ;;  %v2556_v60 = vpack.c.bf16 %v389_v55, %v381_v54  ;;  %v380_v61 = vld [vmem:[#allocation5 + $0x500] sm:$0xff]  ;;  %v382_v63 = vld [vmem:[#allocation5 + $0x510] sm:$0xff] }
  0x87   : > { %2543 = vmatpush1.bf16.msra.mxu0 %v2542_v22  ;;  %v388_v62 = vld [vmem:[#allocation5 + $0x540] sm:$0xff]  ;;  %v2684_v0 = vpack.c.bf16 %v391_v57, %v383_v56  ;;  %v390_v1 = vld [vmem:[#allocation5 + $0x550] sm:$0xff]  ;;  %v397_v2 = vld [vmem:[#allocation5 + $0x588] sm:$0xff] }
  0x88   : > { %2671 = vmatpush1.bf16.msra.mxu1 %v2670_v23  ;;  %2545 = vmatprep.subr.bf16.mxu0 %v2544_v24  ;;  %v405_v3 = vld [vmem:[#allocation5 + $0x5c8] sm:$0xff]  ;;  %v399_v4 = vld [vmem:[#allocation5 + $0x598] sm:$0xff]  ;;  %v2558_v6 = vpack.c.bf16 %v388_v62, %v380_v61  ;;  %v396_v7 = vld [vmem:[#allocation5 + $0x580] sm:$0xff]  ;;  %v2686_v8 = vpack.c.bf16 %v390_v1, %v382_v63 }
  0x89   : > { %2673 = vmatprep.subr.bf16.mxu1 %v2672_v28  ;;  %v407_v5 = vld [vmem:[#allocation5 + $0x5d8] sm:$0xff]  ;;  %v2560_v9 = vpack.c.bf16 %v405_v3, %v397_v2  ;;  %v404_v10 = vld [vmem:[#allocation5 + $0x5c0] sm:$0xff]  ;;  %v398_v11 = vld [vmem:[#allocation5 + $0x590] sm:$0xff] }
  0x8a   : > { %v406_v12 = vld [vmem:[#allocation5 + $0x5d0] sm:$0xff]  ;;  %v2688_v13 = vpack.c.bf16 %v407_v5, %v399_v4  ;;  %v413_v14 = vld [vmem:[#allocation5 + $0x608] sm:$0xff]  ;;  %v415_v17 = vld [vmem:[#allocation5 + $0x618] sm:$0xff]  ;;  %v2562_v19 = vpack.c.bf16 %v404_v10, %v396_v7 }
  0x8b   : > { %2547 = vmatpush1.bf16.msra.mxu0 %v2546_v34  ;;  %v421_v15 = vld [vmem:[#allocation5 + $0x648] sm:$0xff]  ;;  %v423_v18 = vld [vmem:[#allocation5 + $0x658] sm:$0xff]  ;;  %v2690_v20 = vpack.c.bf16 %v406_v12, %v398_v11  ;;  %v412_v22 = vld [vmem:[#allocation5 + $0x600] sm:$0xff] }
  0x8c   : > { %2675 = vmatpush1.bf16.msra.mxu1 %v2674_v35  ;;  %2549 = vmatprep.subr.bf16.mxu0 %v2548_v36  ;;  %v4005_v16 = vld [vmem:[%s3994_s30 + $0x8] sm:$0xff]  ;;  %v2564_v21 = vpack.c.bf16 %v421_v15, %v413_v14  ;;  %v420_v23 = vld [vmem:[#allocation5 + $0x640] sm:$0xff]  ;;  %v414_v24 = vld [vmem:[#allocation5 + $0x610] sm:$0xff]  ;;  %v2692_v25 = vpack.c.bf16 %v423_v18, %v415_v17 }
  0x8d   : > { %2677 = vmatprep.subr.bf16.mxu1 %v2676_v40  ;;  %796 = vmatprep.mubr.f32.mxu0 %v4005_v16  ;;  %v422_v26 = vld [vmem:[#allocation5 + $0x650] sm:$0xff]  ;;  %v429_v27 = vld [vmem:[#allocation5 + $0x688] sm:$0xff]  ;;  %v431_v29 = vld [vmem:[#allocation5 + $0x698] sm:$0xff]  ;;  %v2566_v31 = vpack.c.bf16 %v420_v23, %v412_v22 }
  0x8e   : > { %938 = vmatprep.mubr.f32.mxu1 %v4005_v16  ;;  %v437_v28 = vld [vmem:[#allocation5 + $0x6c8] sm:$0xff]  ;;  %v439_v30 = vld [vmem:[#allocation5 + $0x6d8] sm:$0xff]  ;;  %v2694_v32 = vpack.c.bf16 %v422_v26, %v414_v24  ;;  %v428_v34 = vld [vmem:[#allocation5 + $0x680] sm:$0xff] }
  0x8f   : > { %2551 = vmatpush1.bf16.msra.mxu0 %v2550_v46  ;;  %v2568_v33 = vpack.c.bf16 %v437_v28, %v429_v27  ;;  %v436_v35 = vld [vmem:[#allocation5 + $0x6c0] sm:$0xff]  ;;  %v430_v36 = vld [vmem:[#allocation5 + $0x690] sm:$0xff]  ;;  %v2696_v37 = vpack.c.bf16 %v439_v30, %v431_v29  ;;  %v445_v39 = vld [vmem:[#allocation5 + $0x708] sm:$0xff] }
  0x90   : > { %2679 = vmatpush1.bf16.msra.mxu1 %v2678_v47  ;;  %2553 = vmatprep.subr.bf16.mxu0 %v2552_v48  ;;  %v438_v38 = vld [vmem:[#allocation5 + $0x6d0] sm:$0xff]  ;;  %v453_v40 = vld [vmem:[#allocation5 + $0x748] sm:$0xff]  ;;  %v447_v41 = vld [vmem:[#allocation5 + $0x718] sm:$0xff]  ;;  %v2570_v43 = vpack.c.bf16 %v436_v35, %v428_v34 }
  0x91   : > { %2681 = vmatprep.subr.bf16.mxu1 %v2680_v52  ;;  %v455_v42 = vld [vmem:[#allocation5 + $0x758] sm:$0xff]  ;;  %v2698_v44 = vpack.c.bf16 %v438_v38, %v430_v36  ;;  %v2572_v45 = vpack.c.bf16 %v453_v40, %v445_v39  ;;  %v444_v46 = vld [vmem:[#allocation5 + $0x700] sm:$0xff]  ;;  %v446_v48 = vld [vmem:[#allocation5 + $0x710] sm:$0xff] }
  0x92   : > { %v452_v47 = vld [vmem:[#allocation5 + $0x740] sm:$0xff]  ;;  %v2700_v49 = vpack.c.bf16 %v455_v42, %v447_v41  ;;  %v454_v50 = vld [vmem:[#allocation5 + $0x750] sm:$0xff]  ;;  %v461_v51 = vld [vmem:[#allocation5 + $0x788] sm:$0xff] }
  0x93   : > { %2555 = vmatpush1.bf16.msra.mxu0 %v2554_v58  ;;  %v469_v52 = vld [vmem:[#allocation5 + $0x7c8] sm:$0xff]  ;;  %v463_v53 = vld [vmem:[#allocation5 + $0x798] sm:$0xff]  ;;  %v2574_v55 = vpack.c.bf16 %v452_v47, %v444_v46  ;;  %v2702_v56 = vpack.c.bf16 %v454_v50, %v446_v48  ;;  %v460_v58 = vld [vmem:[#allocation5 + $0x780] sm:$0xff] }
  0x94   : > { %2683 = vmatpush1.bf16.msra.mxu1 %v2682_v59  ;;  %2557 = vmatprep.subr.bf16.mxu0 %v2556_v60  ;;  %v471_v54 = vld [vmem:[#allocation5 + $0x7d8] sm:$0xff]  ;;  %v2576_v57 = vpack.c.bf16 %v469_v52, %v461_v51  ;;  %v468_v59 = vld [vmem:[#allocation5 + $0x7c0] sm:$0xff]  ;;  %v462_v60 = vld [vmem:[#allocation5 + $0x790] sm:$0xff] }
  0x95   : > { %2685 = vmatprep.subr.bf16.mxu1 %v2684_v0  ;;  %v2704_v61 = vpack.c.bf16 %v471_v54, %v463_v53  ;;  %v470_v62 = vld [vmem:[#allocation5 + $0x7d0] sm:$0xff]  ;;  %v477_v63 = vld [vmem:[#allocation5 + $0x808] sm:$0xff]  ;;  %v479_v1 = vld [vmem:[#allocation5 + $0x818] sm:$0xff]  ;;  %v2578_v3 = vpack.c.bf16 %v468_v59, %v460_v58 }
  0x96   : > { %v485_v0 = vld [vmem:[#allocation5 + $0x848] sm:$0xff]  ;;  %v487_v2 = vld [vmem:[#allocation5 + $0x858] sm:$0xff]  ;;  %v2706_v4 = vpack.c.bf16 %v470_v62, %v462_v60  ;;  %v484_v7 = vld [vmem:[#allocation5 + $0x840] sm:$0xff] }
  0x97   : > { %2559 = vmatpush1.bf16.msra.mxu0 %v2558_v6  ;;  %v2580_v5 = vpack.c.bf16 %v485_v0, %v477_v63  ;;  %v476_v6 = vld [vmem:[#allocation5 + $0x800] sm:$0xff]  ;;  %v486_v10 = vld [vmem:[#allocation5 + $0x850] sm:$0xff]  ;;  %v493_v11 = vld [vmem:[#allocation5 + $0x888] sm:$0xff] }
  0x98   : > { %2687 = vmatpush1.bf16.msra.mxu1 %v2686_v8  ;;  %2561 = vmatprep.subr.bf16.mxu0 %v2560_v9  ;;  %v478_v8 = vld [vmem:[#allocation5 + $0x810] sm:$0xff]  ;;  %v2708_v9 = vpack.c.bf16 %v487_v2, %v479_v1  ;;  %v501_v12 = vld [vmem:[#allocation5 + $0x8c8] sm:$0xff]  ;;  %v503_v14 = vld [vmem:[#allocation5 + $0x8d8] sm:$0xff]  ;;  %v2582_v17 = vpack.c.bf16 %v484_v7, %v476_v6 }
  0x99   : > { %2689 = vmatprep.subr.bf16.mxu1 %v2688_v13  ;;  %v495_v13 = vld [vmem:[#allocation5 + $0x898] sm:$0xff]  ;;  %v216_v15 = vld [vmem:[%s3994_s30] sm:$0xff]  ;;  %v2710_v18 = vpack.c.bf16 %v486_v10, %v478_v8  ;;  %v494_v22 = vld [vmem:[#allocation5 + $0x890] sm:$0xff] }
  0x9a   : > { %v2712_v23 = vpack.c.bf16 %v503_v14, %v495_v13  ;;  %v502_v24 = vld [vmem:[#allocation5 + $0x8d0] sm:$0xff]  ;;  %v517_v26 = vld [vmem:[#allocation5 + $0x948] sm:$0xff]  ;;  %v511_v27 = vld [vmem:[#allocation5 + $0x918] sm:$0xff] }
  0x9b   : > { %2563 = vmatpush1.bf16.msra.mxu0 %v2562_v19  ;;  %v2584_v19 = vpack.c.bf16 %v501_v12, %v493_v11  ;;  %v519_v28 = vld [vmem:[#allocation5 + $0x958] sm:$0xff]  ;;  %v2714_v30 = vpack.c.bf16 %v502_v24, %v494_v22  ;;  %v510_v34 = vld [vmem:[#allocation5 + $0x910] sm:$0xff]  ;;  %v533_v38 = vld [vmem:[#allocation5 + $0x9c8] sm:$0xff] }
  0x9c   : > { %2691 = vmatpush1.bf16.msra.mxu1 %v2690_v20  ;;  %2565 = vmatprep.subr.bf16.mxu0 %v2564_v21  ;;  %v492_v20 = vld [vmem:[#allocation5 + $0x880] sm:$0xff]  ;;  %v2716_v35 = vpack.c.bf16 %v519_v28, %v511_v27  ;;  %v518_v36 = vld [vmem:[#allocation5 + $0x950] sm:$0xff]  ;;  %v527_v39 = vld [vmem:[#allocation5 + $0x998] sm:$0xff] }
  0x9d   : > { %2693 = vmatprep.subr.bf16.mxu1 %v2692_v25  ;;  %v500_v21 = vld [vmem:[#allocation5 + $0x8c0] sm:$0xff]  ;;  %v509_v25 = vld [vmem:[#allocation5 + $0x908] sm:$0xff]  ;;  %v535_v40 = vld [vmem:[#allocation5 + $0x9d8] sm:$0xff]  ;;  %v2718_v42 = vpack.c.bf16 %v518_v36, %v510_v34 }
  0x9e   : > { %v2586_v29 = vpack.c.bf16 %v500_v21, %v492_v20  ;;  %v526_v46 = vld [vmem:[#allocation5 + $0x990] sm:$0xff]  ;;  %v2720_v47 = vpack.c.bf16 %v535_v40, %v527_v39  ;;  %v549_v50 = vld [vmem:[#allocation5 + $0xa48] sm:$0xff]  ;;  %v543_v51 = vld [vmem:[#allocation5 + $0xa18] sm:$0xff] }
  0x9f   : > { %2567 = vmatpush1.bf16.msra.mxu0 %v2566_v31  ;;  %v2588_v31 = vpack.c.bf16 %v517_v26, %v509_v25  ;;  %v534_v48 = vld [vmem:[#allocation5 + $0x9d0] sm:$0xff]  ;;  %v551_v52 = vld [vmem:[#allocation5 + $0xa58] sm:$0xff]  ;;  %v565_v62 = vld [vmem:[#allocation5 + $0xac8] sm:$0xff] }
  0xa0   : > { %2695 = vmatpush1.bf16.msra.mxu1 %v2694_v32  ;;  %2569 = vmatprep.subr.bf16.mxu0 %v2568_v33  ;;  %v508_v32 = vld [vmem:[#allocation5 + $0x900] sm:$0xff]  ;;  %v2722_v54 = vpack.c.bf16 %v534_v48, %v526_v46  ;;  %v542_v58 = vld [vmem:[#allocation5 + $0xa10] sm:$0xff]  ;;  %v2724_v59 = vpack.c.bf16 %v551_v52, %v543_v51  ;;  %v559_v63 = vld [vmem:[#allocation5 + $0xa98] sm:$0xff] }
  0xa1   : > { %2697 = vmatprep.subr.bf16.mxu1 %v2696_v37  ;;  %v516_v33 = vld [vmem:[#allocation5 + $0x940] sm:$0xff]  ;;  %v525_v37 = vld [vmem:[#allocation5 + $0x988] sm:$0xff]  ;;  %v550_v60 = vld [vmem:[#allocation5 + $0xa50] sm:$0xff] }
  0xa2   : > { %v2590_v41 = vpack.c.bf16 %v516_v33, %v508_v32  ;;  %v567_v0 = vld [vmem:[#allocation5 + $0xad8] sm:$0xff]  ;;  %v2726_v2 = vpack.c.bf16 %v550_v60, %v542_v58  ;;  %v558_v6 = vld [vmem:[#allocation5 + $0xa90] sm:$0xff]  ;;  %v581_v10 = vld [vmem:[#allocation5 + $0xb48] sm:$0xff] }
  0xa3   : > { %2571 = vmatpush1.bf16.msra.mxu0 %v2570_v43  ;;  %v2592_v43 = vpack.c.bf16 %v533_v38, %v525_v37  ;;  %v2728_v7 = vpack.c.bf16 %v567_v0, %v559_v63  ;;  %v566_v8 = vld [vmem:[#allocation5 + $0xad0] sm:$0xff]  ;;  %v575_v11 = vld [vmem:[#allocation5 + $0xb18] sm:$0xff]  ;;  %v572_v14 = vld [vmem:[#allocation5 + $0xb00] sm:$0xff] }
  0xa4   : > { %2699 = vmatpush1.bf16.msra.mxu1 %v2698_v44  ;;  %2573 = vmatprep.subr.bf16.mxu0 %v2572_v45  ;;  %v524_v44 = vld [vmem:[#allocation5 + $0x980] sm:$0xff]  ;;  %v583_v12 = vld [vmem:[#allocation5 + $0xb58] sm:$0xff]  ;;  %v582_v20 = vld [vmem:[#allocation5 + $0xb50] sm:$0xff] }
  0xa5   : > { %2701 = vmatprep.subr.bf16.mxu1 %v2700_v49  ;;  %v532_v45 = vld [vmem:[#allocation5 + $0x9c0] sm:$0xff]  ;;  %v541_v49 = vld [vmem:[#allocation5 + $0xa08] sm:$0xff]  ;;  %v2732_v21 = vpack.c.bf16 %v583_v12, %v575_v11  ;;  %v4011_v24 = vld [vmem:[%s3994_s30 + $0x18] sm:$0xff] }
  0xa6   : > { %v2594_v53 = vpack.c.bf16 %v532_v45, %v524_v44  ;;  %v589_v22 = vld [vmem:[#allocation5 + $0xb88] sm:$0xff]  ;;  %v591_v25 = vld [vmem:[#allocation5 + $0xb98] sm:$0xff]  ;;  %v590_v32 = vld [vmem:[#allocation5 + $0xb90] sm:$0xff] }
  0xa7   : > { %2575 = vmatpush1.bf16.msra.mxu0 %v2574_v55  ;;  %v2596_v55 = vpack.c.bf16 %v549_v50, %v541_v49  ;;  %v599_v26 = vld [vmem:[#allocation5 + $0xbd8] sm:$0xff]  ;;  %v598_v34 = vld [vmem:[#allocation5 + $0xbd0] sm:$0xff]  ;;  %v613_v36 = vld [vmem:[#allocation5 + $0xc48] sm:$0xff] }
  0xa8   : > { %2703 = vmatpush1.bf16.msra.mxu1 %v2702_v56  ;;  %2577 = vmatprep.subr.bf16.mxu0 %v2576_v57  ;;  %v540_v56 = vld [vmem:[#allocation5 + $0xa00] sm:$0xff]  ;;  %v2736_v33 = vpack.c.bf16 %v599_v26, %v591_v25  ;;  %v607_v37 = vld [vmem:[#allocation5 + $0xc18] sm:$0xff]  ;;  %v2738_v40 = vpack.c.bf16 %v598_v34, %v590_v32  ;;  %v606_v44 = vld [vmem:[#allocation5 + $0xc10] sm:$0xff] }
  0xa9   : > { %2705 = vmatprep.subr.bf16.mxu1 %v2704_v61  ;;  %v548_v57 = vld [vmem:[#allocation5 + $0xa40] sm:$0xff]  ;;  %v557_v61 = vld [vmem:[#allocation5 + $0xa88] sm:$0xff]  ;;  %v615_v38 = vld [vmem:[#allocation5 + $0xc58] sm:$0xff] }
  0xaa   : > { %v2598_v1 = vpack.c.bf16 %v548_v57, %v540_v56  ;;  %v2740_v45 = vpack.c.bf16 %v615_v38, %v607_v37  ;;  %v614_v46 = vld [vmem:[#allocation5 + $0xc50] sm:$0xff]  ;;  %v629_v48 = vld [vmem:[#allocation5 + $0xcc8] sm:$0xff]  ;;  %v623_v49 = vld [vmem:[#allocation5 + $0xc98] sm:$0xff] }
  0xab   : > { %2579 = vmatpush1.bf16.msra.mxu0 %v2578_v3  ;;  %v2600_v3 = vpack.c.bf16 %v565_v62, %v557_v61  ;;  %v631_v50 = vld [vmem:[#allocation5 + $0xcd8] sm:$0xff]  ;;  %v2742_v52 = vpack.c.bf16 %v614_v46, %v606_v44  ;;  %v622_v56 = vld [vmem:[#allocation5 + $0xc90] sm:$0xff]  ;;  %v645_v60 = vld [vmem:[#allocation5 + $0xd48] sm:$0xff] }
  0xac   : > { %2707 = vmatpush1.bf16.msra.mxu1 %v2706_v4  ;;  %2581 = vmatprep.subr.bf16.mxu0 %v2580_v5  ;;  %v556_v4 = vld [vmem:[#allocation5 + $0xa80] sm:$0xff]  ;;  %v2744_v57 = vpack.c.bf16 %v631_v50, %v623_v49  ;;  %v630_v58 = vld [vmem:[#allocation5 + $0xcd0] sm:$0xff]  ;;  %v639_v61 = vld [vmem:[#allocation5 + $0xd18] sm:$0xff] }
  0xad   : > { %2709 = vmatprep.subr.bf16.mxu1 %v2708_v9  ;;  %v564_v5 = vld [vmem:[#allocation5 + $0xac0] sm:$0xff]  ;;  %v573_v9 = vld [vmem:[#allocation5 + $0xb08] sm:$0xff]  ;;  %v647_v62 = vld [vmem:[#allocation5 + $0xd58] sm:$0xff]  ;;  %v2746_v0 = vpack.c.bf16 %v630_v58, %v622_v56 }
  0xae   : > { %797 = vmatmul.mubr.f32.vlgmr.msra.gmra.mrb[0].mxu0 %v216_v15  ;;  %v2602_v13 = vpack.c.bf16 %v564_v5, %v556_v4  ;;  %v638_v4 = vld [vmem:[#allocation5 + $0xd10] sm:$0xff]  ;;  %v2748_v5 = vpack.c.bf16 %v647_v62, %v639_v61  ;;  %v693_v34 = vld [vmem:[#allocation5 + $0xec8] sm:$0xff] }
  0xaf   : > { %2583 = vmatpush1.bf16.msra.mxu0 %v2582_v17  ;;  %939 = vmatmul.mubr.f32.vlgmr.msra.gmra.mrb[0].mxu1 %v216_v15  ;;  %v2730_v15 = vpack.c.bf16 %v566_v8, %v558_v6  ;;  %v2604_v17 = vpack.c.bf16 %v581_v10, %v573_v9  ;;  %v646_v6 = vld [vmem:[#allocation5 + $0xd50] sm:$0xff]  ;;  %v661_v8 = vld [vmem:[#allocation5 + $0xdc8] sm:$0xff]  ;;  %v655_v9 = vld [vmem:[#allocation5 + $0xd98] sm:$0xff] }
  0xb0   : > { %2711 = vmatpush1.bf16.msra.mxu1 %v2710_v18  ;;  %2585 = vmatprep.subr.bf16.mxu0 %v2584_v19  ;;  %v580_v18 = vld [vmem:[#allocation5 + $0xb40] sm:$0xff]  ;;  %v574_v19 = vld [vmem:[#allocation5 + $0xb10] sm:$0xff]  ;;  %v663_v10 = vld [vmem:[#allocation5 + $0xdd8] sm:$0xff]  ;;  %v2750_v12 = vpack.c.bf16 %v646_v6, %v638_v4 }
  0xb1   : > { %2713 = vmatprep.subr.bf16.mxu1 %v2712_v23  ;;  %v597_v23 = vld [vmem:[#allocation5 + $0xbc8] sm:$0xff]  ;;  %867 = vmatprep.mubr.f32.mxu0 %v4011_v24  ;;  %v2606_v27 = vpack.c.bf16 %v580_v18, %v572_v14  ;;  %v2734_v28 = vpack.c.bf16 %v582_v20, %v574_v19  ;;  %v652_v14 = vld [vmem:[#allocation5 + $0xd80] sm:$0xff]  ;;  %v2752_v18 = vpack.c.bf16 %v663_v10, %v655_v9  ;;  %v662_v19 = vld [vmem:[#allocation5 + $0xdd0] sm:$0xff] }
  0xb2   : > { %1009 = vmatprep.mubr.f32.mxu1 %v4011_v24  ;;  %v669_v20 = vld [vmem:[#allocation5 + $0xe08] sm:$0xff]  ;;  %v678_v32 = vld [vmem:[#allocation5 + $0xe50] sm:$0xff] }
  0xb3   : > { %2587 = vmatpush1.bf16.msra.mxu0 %v2586_v29  ;;  %v2608_v29 = vpack.c.bf16 %v597_v23, %v589_v22  ;;  %v671_v22 = vld [vmem:[#allocation5 + $0xe18] sm:$0xff]  ;;  %v694_v44 = vld [vmem:[#allocation5 + $0xed0] sm:$0xff]  ;;  %v709_v46 = vld [vmem:[#allocation5 + $0xf48] sm:$0xff] }
  0xb4   : > { %2715 = vmatpush1.bf16.msra.mxu1 %v2714_v30  ;;  %2589 = vmatprep.subr.bf16.mxu0 %v2588_v31  ;;  %v588_v30 = vld [vmem:[#allocation5 + $0xb80] sm:$0xff]  ;;  %v679_v23 = vld [vmem:[#allocation5 + $0xe58] sm:$0xff]  ;;  %v710_v56 = vld [vmem:[#allocation5 + $0xf50] sm:$0xff] }
  0xb5   : > { %2717 = vmatprep.subr.bf16.mxu1 %v2716_v35  ;;  %v596_v31 = vld [vmem:[#allocation5 + $0xbc0] sm:$0xff]  ;;  %v605_v35 = vld [vmem:[#allocation5 + $0xc08] sm:$0xff]  ;;  %v726_v4 = vld [vmem:[#allocation5 + $0xfd0] sm:$0xff] }
  0xb6   : > { %v2610_v39 = vpack.c.bf16 %v596_v31, %v588_v30  ;;  %v670_v30 = vld [vmem:[#allocation5 + $0xe10] sm:$0xff]  ;;  %v2756_v31 = vpack.c.bf16 %v679_v23, %v671_v22  ;;  %v725_v58 = vld [vmem:[#allocation5 + $0xfc8] sm:$0xff] }
  0xb7   : > { %2591 = vmatpush1.bf16.msra.mxu0 %v2590_v41  ;;  %v2612_v41 = vpack.c.bf16 %v613_v36, %v605_v35  ;;  %v687_v35 = vld [vmem:[#allocation5 + $0xe98] sm:$0xff]  ;;  %v2758_v38 = vpack.c.bf16 %v678_v32, %v670_v30  ;;  %v233_v6 = vld [vmem:[#allocation5 + $0x68] sm:$0xff]  ;;  %v218_v22 = vld [vmem:[%s3994_s30 + $0x10] sm:$0xff] }
  0xb8   : > { %2719 = vmatpush1.bf16.msra.mxu1 %v2718_v42  ;;  %2593 = vmatprep.subr.bf16.mxu0 %v2592_v43  ;;  %v604_v42 = vld [vmem:[#allocation5 + $0xc00] sm:$0xff]  ;;  %v695_v36 = vld [vmem:[#allocation5 + $0xed8] sm:$0xff]  ;;  %v257_v32 = vld [vmem:[#allocation5 + $0x128] sm:$0xff] }
  0xb9   : > { %2721 = vmatprep.subr.bf16.mxu1 %v2720_v47  ;;  %v612_v43 = vld [vmem:[#allocation5 + $0xc40] sm:$0xff]  ;;  %v621_v47 = vld [vmem:[#allocation5 + $0xc88] sm:$0xff] }
  0xba   : > { %v2614_v51 = vpack.c.bf16 %v612_v43, %v604_v42  ;;  %v686_v42 = vld [vmem:[#allocation5 + $0xe90] sm:$0xff]  ;;  %v2760_v43 = vpack.c.bf16 %v695_v36, %v687_v35  ;;  %v267_v35 = vld [vmem:[#allocation5 + $0x178] sm:$0xff] }
  0xbb   : > { %2595 = vmatpush1.bf16.msra.mxu0 %v2594_v53  ;;  %v2616_v53 = vpack.c.bf16 %v629_v48, %v621_v47  ;;  %v703_v47 = vld [vmem:[#allocation5 + $0xf18] sm:$0xff]  ;;  %v2762_v50 = vpack.c.bf16 %v694_v44, %v686_v42  ;;  %v273_v44 = vld [vmem:[#allocation5 + $0x1a8] sm:$0xff] }
  0xbc   : > { %2723 = vmatpush1.bf16.msra.mxu1 %v2722_v54  ;;  %2597 = vmatprep.subr.bf16.mxu0 %v2596_v55  ;;  %v620_v54 = vld [vmem:[#allocation5 + $0xc80] sm:$0xff]  ;;  %v711_v48 = vld [vmem:[#allocation5 + $0xf58] sm:$0xff] }
  0xbd   : > { %2725 = vmatprep.subr.bf16.mxu1 %v2724_v59  ;;  %v628_v55 = vld [vmem:[#allocation5 + $0xcc0] sm:$0xff]  ;;  %v637_v59 = vld [vmem:[#allocation5 + $0xd08] sm:$0xff] }
  0xbe   : > { %v2618_v63 = vpack.c.bf16 %v628_v55, %v620_v54  ;;  %v702_v54 = vld [vmem:[#allocation5 + $0xf10] sm:$0xff]  ;;  %v2764_v55 = vpack.c.bf16 %v711_v48, %v703_v47  ;;  %v283_v47 = vld [vmem:[#allocation5 + $0x1f8] sm:$0xff] }
  0xbf   : > { %2599 = vmatpush1.bf16.msra.mxu0 %v2598_v1  ;;  %v2620_v1 = vpack.c.bf16 %v645_v60, %v637_v59  ;;  %v719_v59 = vld [vmem:[#allocation5 + $0xf98] sm:$0xff]  ;;  %v2766_v62 = vpack.c.bf16 %v710_v56, %v702_v54  ;;  %v289_v56 = vld [vmem:[#allocation5 + $0x228] sm:$0xff] }
  0xc0   : > { %2727 = vmatpush1.bf16.msra.mxu1 %v2726_v2  ;;  %2601 = vmatprep.subr.bf16.mxu0 %v2600_v3  ;;  %v636_v2 = vld [vmem:[#allocation5 + $0xd00] sm:$0xff]  ;;  %v727_v60 = vld [vmem:[#allocation5 + $0xfd8] sm:$0xff] }
  0xc1   : > { %2729 = vmatprep.subr.bf16.mxu1 %v2728_v7  ;;  %v644_v3 = vld [vmem:[#allocation5 + $0xd40] sm:$0xff]  ;;  %v653_v7 = vld [vmem:[#allocation5 + $0xd88] sm:$0xff] }
  0xc2   : > { %v2622_v11 = vpack.c.bf16 %v644_v3, %v636_v2  ;;  %v718_v2 = vld [vmem:[#allocation5 + $0xf90] sm:$0xff]  ;;  %v2768_v3 = vpack.c.bf16 %v727_v60, %v719_v59  ;;  %v299_v59 = vld [vmem:[#allocation5 + $0x278] sm:$0xff] }
  0xc3   : > { %2603 = vmatpush1.bf16.msra.mxu0 %v2602_v13  ;;  %v2624_v13 = vpack.c.bf16 %v661_v8, %v653_v7  ;;  %v227_v7 = vld [vmem:[#allocation5 + $0x38] sm:$0xff]  ;;  %v2770_v10 = vpack.c.bf16 %v726_v4, %v718_v2  ;;  %v298_v2 = vld [vmem:[#allocation5 + $0x270] sm:$0xff]  ;;  %v313_v4 = vld [vmem:[#allocation5 + $0x2e8] sm:$0xff] }
  0xc4   : > { %2731 = vmatpush1.bf16.msra.mxu1 %v2730_v15  ;;  %2605 = vmatprep.subr.bf16.mxu0 %v2604_v17  ;;  %v660_v15 = vld [vmem:[#allocation5 + $0xdc0] sm:$0xff]  ;;  %v654_v17 = vld [vmem:[#allocation5 + $0xd90] sm:$0xff]  ;;  %v235_v8 = vld [vmem:[#allocation5 + $0x78] sm:$0xff] }
  0xc5   : > { %2733 = vmatprep.subr.bf16.mxu1 %v2732_v21  ;;  %v677_v21 = vld [vmem:[#allocation5 + $0xe48] sm:$0xff]  ;;  %v2626_v25 = vpack.c.bf16 %v660_v15, %v652_v14  ;;  %v2754_v26 = vpack.c.bf16 %v662_v19, %v654_v17  ;;  %v226_v14 = vld [vmem:[#allocation5 + $0x30] sm:$0xff]  ;;  %v2900_v15 = vpack.c.bf16 %v235_v8, %v227_v7 }
  0xc6   : > { %v234_v17 = vld [vmem:[#allocation5 + $0x70] sm:$0xff]  ;;  %v249_v19 = vld [vmem:[#allocation5 + $0xe8] sm:$0xff] }
  0xc7   : > { %2607 = vmatpush1.bf16.msra.mxu0 %v2606_v27  ;;  %v2628_v27 = vpack.c.bf16 %v677_v21, %v669_v20  ;;  %v243_v20 = vld [vmem:[#allocation5 + $0xb8] sm:$0xff] }
  0xc8   : > { %2735 = vmatpush1.bf16.msra.mxu1 %v2734_v28  ;;  %2609 = vmatprep.subr.bf16.mxu0 %v2608_v29  ;;  %v668_v28 = vld [vmem:[#allocation5 + $0xe00] sm:$0xff]  ;;  %v251_v21 = vld [vmem:[#allocation5 + $0xf8] sm:$0xff] }
  0xc9   : > { %2737 = vmatprep.subr.bf16.mxu1 %v2736_v33  ;;  %v676_v29 = vld [vmem:[#allocation5 + $0xe40] sm:$0xff]  ;;  %v685_v33 = vld [vmem:[#allocation5 + $0xe88] sm:$0xff]  ;;  %v2904_v30 = vpack.c.bf16 %v251_v21, %v243_v20 }
  0xca   : > { %v2630_v37 = vpack.c.bf16 %v676_v29, %v668_v28  ;;  %v248_v28 = vld [vmem:[#allocation5 + $0xe0] sm:$0xff]  ;;  %v242_v29 = vld [vmem:[#allocation5 + $0xb0] sm:$0xff] }
  0xcb   : > { %2611 = vmatpush1.bf16.msra.mxu0 %v2610_v39  ;;  %v2632_v39 = vpack.c.bf16 %v693_v34, %v685_v33  ;;  %v265_v33 = vld [vmem:[#allocation5 + $0x168] sm:$0xff]  ;;  %v259_v34 = vld [vmem:[#allocation5 + $0x138] sm:$0xff] }
  0xcc   : > { %2739 = vmatpush1.bf16.msra.mxu1 %v2738_v40  ;;  %2613 = vmatprep.subr.bf16.mxu0 %v2612_v41  ;;  %v684_v40 = vld [vmem:[#allocation5 + $0xe80] sm:$0xff]  ;;  %v2908_v42 = vpack.c.bf16 %v267_v35, %v259_v34 }
  0xcd   : > { %2741 = vmatprep.subr.bf16.mxu1 %v2740_v45  ;;  %v692_v41 = vld [vmem:[#allocation5 + $0xec0] sm:$0xff]  ;;  %v701_v45 = vld [vmem:[#allocation5 + $0xf08] sm:$0xff] }
  0xce   : > { %v2634_v49 = vpack.c.bf16 %v692_v41, %v684_v40  ;;  %v264_v40 = vld [vmem:[#allocation5 + $0x160] sm:$0xff]  ;;  %v258_v41 = vld [vmem:[#allocation5 + $0x130] sm:$0xff] }
  0xcf   : > { %2615 = vmatpush1.bf16.msra.mxu0 %v2614_v51  ;;  %v2636_v51 = vpack.c.bf16 %v709_v46, %v701_v45  ;;  %v281_v45 = vld [vmem:[#allocation5 + $0x1e8] sm:$0xff]  ;;  %v275_v46 = vld [vmem:[#allocation5 + $0x1b8] sm:$0xff] }
  0xd0   : > { %2743 = vmatpush1.bf16.msra.mxu1 %v2742_v52  ;;  %2617 = vmatprep.subr.bf16.mxu0 %v2616_v53  ;;  %v700_v52 = vld [vmem:[#allocation5 + $0xf00] sm:$0xff]  ;;  %v2912_v54 = vpack.c.bf16 %v283_v47, %v275_v46 }
  0xd1   : > { %2745 = vmatprep.subr.bf16.mxu1 %v2744_v57  ;;  %v708_v53 = vld [vmem:[#allocation5 + $0xf40] sm:$0xff]  ;;  %v717_v57 = vld [vmem:[#allocation5 + $0xf88] sm:$0xff] }
  0xd2   : > { %v2638_v61 = vpack.c.bf16 %v708_v53, %v700_v52  ;;  %v280_v52 = vld [vmem:[#allocation5 + $0x1e0] sm:$0xff]  ;;  %v274_v53 = vld [vmem:[#allocation5 + $0x1b0] sm:$0xff] }
  0xd3   : > { %2619 = vmatpush1.bf16.msra.mxu0 %v2618_v63  ;;  %v2640_v63 = vpack.c.bf16 %v725_v58, %v717_v57  ;;  %v297_v57 = vld [vmem:[#allocation5 + $0x268] sm:$0xff]  ;;  %v291_v58 = vld [vmem:[#allocation5 + $0x238] sm:$0xff] }
  0xd4   : > { %2747 = vmatpush1.bf16.msra.mxu1 %v2746_v0  ;;  %2621 = vmatprep.subr.bf16.mxu0 %v2620_v1  ;;  %v716_v0 = vld [vmem:[#allocation5 + $0xf80] sm:$0xff] }
  0xd5   : > { %2749 = vmatprep.subr.bf16.mxu1 %v2748_v5  ;;  %v724_v1 = vld [vmem:[#allocation5 + $0xfc0] sm:$0xff]  ;;  %v225_v5 = vld [vmem:[#allocation5 + $0x28] sm:$0xff] }
  0xd6   : > { %v2642_v9 = vpack.c.bf16 %v724_v1, %v716_v0  ;;  %v290_v0 = vld [vmem:[#allocation5 + $0x230] sm:$0xff]  ;;  %v2916_v1 = vpack.c.bf16 %v299_v59, %v291_v58 }
  0xd7   : > { %2623 = vmatpush1.bf16.msra.mxu0 %v2622_v11  ;;  %v2772_v11 = vpack.c.bf16 %v233_v6, %v225_v5  ;;  %v307_v5 = vld [vmem:[#allocation5 + $0x2b8] sm:$0xff]  ;;  %v2918_v8 = vpack.c.bf16 %v298_v2, %v290_v0  ;;  %v385_v0 = vld [vmem:[#allocation5 + $0x528] sm:$0xff] }
  0xd8   : > { %2751 = vmatpush1.bf16.msra.mxu1 %v2750_v12  ;;  %2625 = vmatprep.subr.bf16.mxu0 %v2624_v13  ;;  %v224_v12 = vld [vmem:[#allocation5 + $0x20] sm:$0xff]  ;;  %v315_v6 = vld [vmem:[#allocation5 + $0x2f8] sm:$0xff] }
  0xd9   : > { %2753 = vmatprep.subr.bf16.mxu1 %v2752_v18  ;;  %v232_v13 = vld [vmem:[#allocation5 + $0x60] sm:$0xff]  ;;  %v241_v18 = vld [vmem:[#allocation5 + $0xa8] sm:$0xff]  ;;  %v387_v2 = vld [vmem:[#allocation5 + $0x538] sm:$0xff] }
  0xda   : > { %v2774_v23 = vpack.c.bf16 %v232_v13, %v224_v12  ;;  %v306_v12 = vld [vmem:[#allocation5 + $0x2b0] sm:$0xff]  ;;  %v2920_v13 = vpack.c.bf16 %v315_v6, %v307_v5 }
  0xdb   : > { %2627 = vmatpush1.bf16.msra.mxu0 %v2626_v25  ;;  %v2902_v25 = vpack.c.bf16 %v234_v17, %v226_v14  ;;  %v314_v14 = vld [vmem:[#allocation5 + $0x2f0] sm:$0xff]  ;;  %v329_v17 = vld [vmem:[#allocation5 + $0x368] sm:$0xff] }
  0xdc   : > { %2755 = vmatpush1.bf16.msra.mxu1 %v2754_v26  ;;  %2629 = vmatprep.subr.bf16.mxu0 %v2628_v27  ;;  %v2776_v26 = vpack.c.bf16 %v249_v19, %v241_v18  ;;  %v240_v27 = vld [vmem:[#allocation5 + $0xa0] sm:$0xff]  ;;  %v323_v18 = vld [vmem:[#allocation5 + $0x338] sm:$0xff]  ;;  %v2922_v21 = vpack.c.bf16 %v314_v14, %v306_v12  ;;  %v401_v12 = vld [vmem:[#allocation5 + $0x5a8] sm:$0xff] }
  0xdd   : > { %2757 = vmatprep.subr.bf16.mxu1 %v2756_v31  ;;  %v250_v31 = vld [vmem:[#allocation5 + $0xf0] sm:$0xff]  ;;  %v2778_v36 = vpack.c.bf16 %v248_v28, %v240_v27  ;;  %v331_v19 = vld [vmem:[#allocation5 + $0x378] sm:$0xff] }
  0xde   : > { %v2924_v27 = vpack.c.bf16 %v331_v19, %v323_v18  ;;  %v330_v28 = vld [vmem:[#allocation5 + $0x370] sm:$0xff]  ;;  %v403_v14 = vld [vmem:[#allocation5 + $0x5b8] sm:$0xff] }
  0xdf   : > { %2631 = vmatpush1.bf16.msra.mxu0 %v2630_v37  ;;  %v2906_v37 = vpack.c.bf16 %v250_v31, %v242_v29  ;;  %v337_v29 = vld [vmem:[#allocation5 + $0x3a8] sm:$0xff]  ;;  %v339_v31 = vld [vmem:[#allocation5 + $0x3b8] sm:$0xff] }
  0xe0   : > { %2759 = vmatpush1.bf16.msra.mxu1 %v2758_v38  ;;  %2633 = vmatprep.subr.bf16.mxu0 %v2632_v39  ;;  %v2780_v38 = vpack.c.bf16 %v265_v33, %v257_v32  ;;  %v256_v39 = vld [vmem:[#allocation5 + $0x120] sm:$0xff]  ;;  %v347_v32 = vld [vmem:[#allocation5 + $0x3f8] sm:$0xff] }
  0xe1   : > { %2761 = vmatprep.subr.bf16.mxu1 %v2760_v43  ;;  %v266_v43 = vld [vmem:[#allocation5 + $0x170] sm:$0xff]  ;;  %v2782_v48 = vpack.c.bf16 %v264_v40, %v256_v39  ;;  %v2928_v39 = vpack.c.bf16 %v347_v32, %v339_v31 }
  0xe2   : > { %v346_v40 = vld [vmem:[#allocation5 + $0x3f0] sm:$0xff] }
  0xe3   : > { %2635 = vmatpush1.bf16.msra.mxu0 %v2634_v49  ;;  %v2910_v49 = vpack.c.bf16 %v266_v43, %v258_v41  ;;  %v353_v41 = vld [vmem:[#allocation5 + $0x428] sm:$0xff]  ;;  %v355_v43 = vld [vmem:[#allocation5 + $0x438] sm:$0xff] }
  0xe4   : > { %2763 = vmatpush1.bf16.msra.mxu1 %v2762_v50  ;;  %2637 = vmatprep.subr.bf16.mxu0 %v2636_v51  ;;  %v2784_v50 = vpack.c.bf16 %v281_v45, %v273_v44  ;;  %v272_v51 = vld [vmem:[#allocation5 + $0x1a0] sm:$0xff]  ;;  %v363_v44 = vld [vmem:[#allocation5 + $0x478] sm:$0xff] }
  0xe5   : > { %2765 = vmatprep.subr.bf16.mxu1 %v2764_v55  ;;  %v282_v55 = vld [vmem:[#allocation5 + $0x1f0] sm:$0xff]  ;;  %v2786_v60 = vpack.c.bf16 %v280_v52, %v272_v51  ;;  %v2932_v51 = vpack.c.bf16 %v363_v44, %v355_v43 }
  0xe6   : > { %v362_v52 = vld [vmem:[#allocation5 + $0x470] sm:$0xff] }
  0xe7   : > { %2639 = vmatpush1.bf16.msra.mxu0 %v2638_v61  ;;  %v2788_v61 = vpack.c.bf16 %v297_v57, %v289_v56  ;;  %v379_v56 = vld [vmem:[#allocation5 + $0x4f8] sm:$0xff] }
  0xe8   : > { %2767 = vmatpush1.bf16.msra.mxu1 %v2766_v62  ;;  %2641 = vmatprep.subr.bf16.mxu0 %v2640_v63  ;;  %v288_v62 = vld [vmem:[#allocation5 + $0x220] sm:$0xff] }
  0xe9   : > { %2769 = vmatprep.subr.bf16.mxu1 %v2768_v3  ;;  %v296_v63 = vld [vmem:[#allocation5 + $0x260] sm:$0xff]  ;;  %v305_v3 = vld [vmem:[#allocation5 + $0x2a8] sm:$0xff] }
  0xea   : > { %v2790_v7 = vpack.c.bf16 %v296_v63, %v288_v62  ;;  %v378_v63 = vld [vmem:[#allocation5 + $0x4f0] sm:$0xff] }
  0xeb   : > { %2643 = vmatpush1.bf16.msra.mxu0 %v2642_v9  ;;  %v2792_v9 = vpack.c.bf16 %v313_v4, %v305_v3  ;;  %v395_v3 = vld [vmem:[#allocation5 + $0x578] sm:$0xff] }
  0xec   : > { %2771 = vmatpush1.bf16.msra.mxu1 %v2770_v10  ;;  %2773 = vmatprep.subr.bf16.mxu0 %v2772_v11  ;;  %v304_v10 = vld [vmem:[#allocation5 + $0x2a0] sm:$0xff] }
  0xed   : > { %2901 = vmatprep.subr.bf16.mxu1 %v2900_v15  ;;  %v312_v11 = vld [vmem:[#allocation5 + $0x2e0] sm:$0xff]  ;;  %v321_v15 = vld [vmem:[#allocation5 + $0x328] sm:$0xff] }
  0xee   : > { %868 = vmatmul.mubr.f32.vlgmr.msra.gmra.mrb[0].mxu0 %v218_v22  ;;  %v2794_v20 = vpack.c.bf16 %v312_v11, %v304_v10  ;;  %v2940_v10 = vpack.c.bf16 %v395_v3, %v387_v2  ;;  %v394_v11 = vld [vmem:[#allocation5 + $0x570] sm:$0xff] }
  0xef   : > { %1010 = vmatmul.mubr.f32.vlgmr.msra.gmra.mrb[0].mxu1 %v218_v22  ;;  %2775 = vmatpush1.bf16.msra.mxu0 %v2774_v23  ;;  %v2796_v22 = vpack.c.bf16 %v329_v17, %v321_v15  ;;  %v320_v23 = vld [vmem:[#allocation5 + $0x320] sm:$0xff]  ;;  %v411_v15 = vld [vmem:[#allocation5 + $0x5f8] sm:$0xff] }
  0xf0   : > { %2903 = vmatpush1.bf16.msra.mxu1 %v2902_v25  ;;  %2777 = vmatprep.subr.bf16.mxu0 %v2776_v26  ;;  %v328_v25 = vld [vmem:[#allocation5 + $0x360] sm:$0xff]  ;;  %v322_v26 = vld [vmem:[#allocation5 + $0x330] sm:$0xff] }
  0xf1   : > { %2905 = vmatprep.subr.bf16.mxu1 %v2904_v30  ;;  %1080 = vmatprep.mubr.f32.mxu0 %v4005_v16  ;;  %v345_v30 = vld [vmem:[#allocation5 + $0x3e8] sm:$0xff]  ;;  %v2798_v33 = vpack.c.bf16 %v328_v25, %v320_v23  ;;  %v2926_v34 = vpack.c.bf16 %v330_v28, %v322_v26  ;;  %v2944_v23 = vpack.c.bf16 %v411_v15, %v403_v14  ;;  %v410_v25 = vld [vmem:[#allocation5 + $0x5f0] sm:$0xff]  ;;  %v419_v28 = vld [vmem:[#allocation5 + $0x638] sm:$0xff] }
  0xf2   : > { %1222 = vmatprep.mubr.f32.mxu1 %v4005_v16  ;;  %v2914_v16 = vpack.c.bf16 %v282_v55, %v274_v53  ;;  %v2800_v35 = vpack.c.bf16 %v345_v30, %v337_v29  ;;  %v369_v53 = vld [vmem:[#allocation5 + $0x4a8] sm:$0xff]  ;;  %v371_v55 = vld [vmem:[#allocation5 + $0x4b8] sm:$0xff] }
  0xf3   : > { %2779 = vmatpush1.bf16.msra.mxu0 %v2778_v36  ;;  %v336_v36 = vld [vmem:[#allocation5 + $0x3a0] sm:$0xff]  ;;  %v2936_v62 = vpack.c.bf16 %v379_v56, %v371_v55  ;;  %v417_v26 = vld [vmem:[#allocation5 + $0x628] sm:$0xff]  ;;  %v427_v29 = vld [vmem:[#allocation5 + $0x678] sm:$0xff] }
  0xf4   : > { %2907 = vmatpush1.bf16.msra.mxu1 %v2906_v37  ;;  %2781 = vmatprep.subr.bf16.mxu0 %v2780_v38  ;;  %v344_v37 = vld [vmem:[#allocation5 + $0x3e0] sm:$0xff]  ;;  %v338_v38 = vld [vmem:[#allocation5 + $0x3b0] sm:$0xff] }
  0xf5   : > { %2909 = vmatprep.subr.bf16.mxu1 %v2908_v42  ;;  %v361_v42 = vld [vmem:[#allocation5 + $0x468] sm:$0xff]  ;;  %v2802_v45 = vpack.c.bf16 %v344_v37, %v336_v36  ;;  %v2930_v46 = vpack.c.bf16 %v346_v40, %v338_v38  ;;  %v2948_v36 = vpack.c.bf16 %v427_v29, %v419_v28  ;;  %v426_v37 = vld [vmem:[#allocation5 + $0x670] sm:$0xff]  ;;  %v435_v40 = vld [vmem:[#allocation5 + $0x6b8] sm:$0xff] }
  0xf6   : > { %v2804_v47 = vpack.c.bf16 %v361_v42, %v353_v41  ;;  %v433_v38 = vld [vmem:[#allocation5 + $0x6a8] sm:$0xff]  ;;  %v443_v41 = vld [vmem:[#allocation5 + $0x6f8] sm:$0xff] }
  0xf7   : > { %2783 = vmatpush1.bf16.msra.mxu0 %v2782_v48  ;;  %v352_v48 = vld [vmem:[#allocation5 + $0x420] sm:$0xff] }
  0xf8   : > { %2911 = vmatpush1.bf16.msra.mxu1 %v2910_v49  ;;  %2785 = vmatprep.subr.bf16.mxu0 %v2784_v50  ;;  %v360_v49 = vld [vmem:[#allocation5 + $0x460] sm:$0xff]  ;;  %v354_v50 = vld [vmem:[#allocation5 + $0x430] sm:$0xff] }
  0xf9   : > { %2913 = vmatprep.subr.bf16.mxu1 %v2912_v54  ;;  %v377_v54 = vld [vmem:[#allocation5 + $0x4e8] sm:$0xff]  ;;  %v2806_v57 = vpack.c.bf16 %v360_v49, %v352_v48  ;;  %v2934_v58 = vpack.c.bf16 %v362_v52, %v354_v50  ;;  %v2952_v48 = vpack.c.bf16 %v443_v41, %v435_v40  ;;  %v442_v49 = vld [vmem:[#allocation5 + $0x6f0] sm:$0xff]  ;;  %v451_v52 = vld [vmem:[#allocation5 + $0x738] sm:$0xff] }
  0xfa   : > { %v2808_v59 = vpack.c.bf16 %v377_v54, %v369_v53  ;;  %v449_v50 = vld [vmem:[#allocation5 + $0x728] sm:$0xff]  ;;  %v459_v53 = vld [vmem:[#allocation5 + $0x778] sm:$0xff] }
  0xfb   : > { %2787 = vmatpush1.bf16.msra.mxu0 %v2786_v60  ;;  %v368_v60 = vld [vmem:[#allocation5 + $0x4a0] sm:$0xff] }
  0xfc   : > { %2915 = vmatpush1.bf16.msra.mxu1 %v2914_v16  ;;  %2789 = vmatprep.subr.bf16.mxu0 %v2788_v61  ;;  %v376_v16 = vld [vmem:[#allocation5 + $0x4e0] sm:$0xff]  ;;  %v370_v61 = vld [vmem:[#allocation5 + $0x4b0] sm:$0xff] }
  0xfd   : > { %2917 = vmatprep.subr.bf16.mxu1 %v2916_v1  ;;  %v393_v1 = vld [vmem:[#allocation5 + $0x568] sm:$0xff]  ;;  %v2810_v4 = vpack.c.bf16 %v376_v16, %v368_v60  ;;  %v2938_v5 = vpack.c.bf16 %v378_v63, %v370_v61  ;;  %v2956_v60 = vpack.c.bf16 %v459_v53, %v451_v52  ;;  %v458_v16 = vld [vmem:[#allocation5 + $0x770] sm:$0xff]  ;;  %v467_v63 = vld [vmem:[#allocation5 + $0x7b8] sm:$0xff] }
  0xfe   : > { %v2812_v6 = vpack.c.bf16 %v393_v1, %v385_v0  ;;  %v465_v61 = vld [vmem:[#allocation5 + $0x7a8] sm:$0xff]  ;;  %v475_v0 = vld [vmem:[#allocation5 + $0x7f8] sm:$0xff] }
  0xff   : > { %2791 = vmatpush1.bf16.msra.mxu0 %v2790_v7  ;;  %v384_v7 = vld [vmem:[#allocation5 + $0x520] sm:$0xff] }
 0x100   : > { %2919 = vmatpush1.bf16.msra.mxu1 %v2918_v8  ;;  %2793 = vmatprep.subr.bf16.mxu0 %v2792_v9  ;;  %v392_v8 = vld [vmem:[#allocation5 + $0x560] sm:$0xff]  ;;  %v386_v9 = vld [vmem:[#allocation5 + $0x530] sm:$0xff] }
 0x101   : > { %2921 = vmatprep.subr.bf16.mxu1 %v2920_v13  ;;  %v409_v13 = vld [vmem:[#allocation5 + $0x5e8] sm:$0xff]  ;;  %v2814_v17 = vpack.c.bf16 %v392_v8, %v384_v7  ;;  %v2942_v18 = vpack.c.bf16 %v394_v11, %v386_v9  ;;  %v2960_v7 = vpack.c.bf16 %v475_v0, %v467_v63  ;;  %v474_v8 = vld [vmem:[#allocation5 + $0x7f0] sm:$0xff]  ;;  %v483_v11 = vld [vmem:[#allocation5 + $0x838] sm:$0xff] }
 0x102   : > { %v2816_v19 = vpack.c.bf16 %v409_v13, %v401_v12  ;;  %v481_v9 = vld [vmem:[#allocation5 + $0x828] sm:$0xff]  ;;  %v491_v12 = vld [vmem:[#allocation5 + $0x878] sm:$0xff] }
 0x103   : > { %2795 = vmatpush1.bf16.msra.mxu0 %v2794_v20  ;;  %v400_v20 = vld [vmem:[#allocation5 + $0x5a0] sm:$0xff] }
 0x104   : > { %2923 = vmatpush1.bf16.msra.mxu1 %v2922_v21  ;;  %2797 = vmatprep.subr.bf16.mxu0 %v2796_v22  ;;  %v408_v21 = vld [vmem:[#allocation5 + $0x5e0] sm:$0xff]  ;;  %v402_v22 = vld [vmem:[#allocation5 + $0x5b0] sm:$0xff] }
 0x105   : > { %2925 = vmatprep.subr.bf16.mxu1 %v2924_v27  ;;  %v425_v27 = vld [vmem:[#allocation5 + $0x668] sm:$0xff]  ;;  %v2818_v30 = vpack.c.bf16 %v408_v21, %v400_v20  ;;  %v2946_v31 = vpack.c.bf16 %v410_v25, %v402_v22  ;;  %v2964_v20 = vpack.c.bf16 %v491_v12, %v483_v11  ;;  %v490_v21 = vld [vmem:[#allocation5 + $0x870] sm:$0xff]  ;;  %v499_v25 = vld [vmem:[#allocation5 + $0x8b8] sm:$0xff] }
 0x106   : > { %v2820_v32 = vpack.c.bf16 %v425_v27, %v417_v26  ;;  %v497_v22 = vld [vmem:[#allocation5 + $0x8a8] sm:$0xff]  ;;  %v507_v26 = vld [vmem:[#allocation5 + $0x8f8] sm:$0xff] }
 0x107   : > { %2799 = vmatpush1.bf16.msra.mxu0 %v2798_v33  ;;  %v416_v33 = vld [vmem:[#allocation5 + $0x620] sm:$0xff] }
 0x108   : > { %2927 = vmatpush1.bf16.msra.mxu1 %v2926_v34  ;;  %2801 = vmatprep.subr.bf16.mxu0 %v2800_v35  ;;  %v424_v34 = vld [vmem:[#allocation5 + $0x660] sm:$0xff]  ;;  %v418_v35 = vld [vmem:[#allocation5 + $0x630] sm:$0xff] }
 0x109   : > { %2929 = vmatprep.subr.bf16.mxu1 %v2928_v39  ;;  %v441_v39 = vld [vmem:[#allocation5 + $0x6e8] sm:$0xff]  ;;  %v2822_v42 = vpack.c.bf16 %v424_v34, %v416_v33  ;;  %v2950_v43 = vpack.c.bf16 %v426_v37, %v418_v35  ;;  %v2968_v33 = vpack.c.bf16 %v507_v26, %v499_v25  ;;  %v506_v34 = vld [vmem:[#allocation5 + $0x8f0] sm:$0xff]  ;;  %v3631_v37 = vld [vmem:[%s3994_s30] sm:$0xff] }
 0x10a   : > { %v2824_v44 = vpack.c.bf16 %v441_v39, %v433_v38  ;;  %v513_v35 = vld [vmem:[#allocation5 + $0x928] sm:$0xff]  ;;  %v515_v38 = vld [vmem:[#allocation5 + $0x938] sm:$0xff] }
 0x10b   : > { %2803 = vmatpush1.bf16.msra.mxu0 %v2802_v45  ;;  %v432_v45 = vld [vmem:[#allocation5 + $0x6a0] sm:$0xff]  ;;  %v523_v39 = vld [vmem:[#allocation5 + $0x978] sm:$0xff] }
 0x10c   : > { %2931 = vmatpush1.bf16.msra.mxu1 %v2930_v46  ;;  %2805 = vmatprep.subr.bf16.mxu0 %v2804_v47  ;;  %v440_v46 = vld [vmem:[#allocation5 + $0x6e0] sm:$0xff]  ;;  %v434_v47 = vld [vmem:[#allocation5 + $0x6b0] sm:$0xff] }
 0x10d   : > { %2933 = vmatprep.subr.bf16.mxu1 %v2932_v51  ;;  %v457_v51 = vld [vmem:[#allocation5 + $0x768] sm:$0xff]  ;;  %v2826_v54 = vpack.c.bf16 %v440_v46, %v432_v45  ;;  %v2954_v55 = vpack.c.bf16 %v442_v49, %v434_v47  ;;  %v514_v45 = vld [vmem:[#allocation5 + $0x930] sm:$0xff]  ;;  %v2972_v46 = vpack.c.bf16 %v523_v39, %v515_v38  ;;  %v592_v39 = vld [vmem:[#allocation5 + $0xba0] sm:$0xff] }
 0x10e   : > { %v2828_v56 = vpack.c.bf16 %v457_v51, %v449_v50  ;;  %v522_v47 = vld [vmem:[#allocation5 + $0x970] sm:$0xff]  ;;  %v537_v49 = vld [vmem:[#allocation5 + $0x9e8] sm:$0xff]  ;;  %v531_v50 = vld [vmem:[#allocation5 + $0x9b8] sm:$0xff] }
 0x10f   : > { %2807 = vmatpush1.bf16.msra.mxu0 %v2806_v57  ;;  %v448_v57 = vld [vmem:[#allocation5 + $0x720] sm:$0xff]  ;;  %v539_v51 = vld [vmem:[#allocation5 + $0x9f8] sm:$0xff]  ;;  %v2974_v53 = vpack.c.bf16 %v522_v47, %v514_v45  ;;  %v617_v45 = vld [vmem:[#allocation5 + $0xc68] sm:$0xff] }
 0x110   : > { %2935 = vmatpush1.bf16.msra.mxu1 %v2934_v58  ;;  %2809 = vmatprep.subr.bf16.mxu0 %v2808_v59  ;;  %v456_v58 = vld [vmem:[#allocation5 + $0x760] sm:$0xff]  ;;  %v450_v59 = vld [vmem:[#allocation5 + $0x730] sm:$0xff]  ;;  %v619_v47 = vld [vmem:[#allocation5 + $0xc78] sm:$0xff] }
 0x111   : > { %2937 = vmatprep.subr.bf16.mxu1 %v2936_v62  ;;  %v473_v62 = vld [vmem:[#allocation5 + $0x7e8] sm:$0xff]  ;;  %v2830_v1 = vpack.c.bf16 %v456_v58, %v448_v57  ;;  %v2958_v2 = vpack.c.bf16 %v458_v16, %v450_v59  ;;  %v530_v57 = vld [vmem:[#allocation5 + $0x9b0] sm:$0xff]  ;;  %v2976_v58 = vpack.c.bf16 %v539_v51, %v531_v50  ;;  %v608_v51 = vld [vmem:[#allocation5 + $0xc20] sm:$0xff] }
 0x112   : > { %v2832_v3 = vpack.c.bf16 %v473_v62, %v465_v61  ;;  %v538_v59 = vld [vmem:[#allocation5 + $0x9f0] sm:$0xff]  ;;  %v553_v16 = vld [vmem:[#allocation5 + $0xa68] sm:$0xff]  ;;  %v547_v61 = vld [vmem:[#allocation5 + $0xa38] sm:$0xff] }
 0x113   : > { %2811 = vmatpush1.bf16.msra.mxu0 %v2810_v4  ;;  %v464_v4 = vld [vmem:[#allocation5 + $0x7a0] sm:$0xff]  ;;  %v555_v62 = vld [vmem:[#allocation5 + $0xa78] sm:$0xff] }
 0x114   : > { %2939 = vmatpush1.bf16.msra.mxu1 %v2938_v5  ;;  %2813 = vmatprep.subr.bf16.mxu0 %v2812_v6  ;;  %v472_v5 = vld [vmem:[#allocation5 + $0x7e0] sm:$0xff]  ;;  %v466_v6 = vld [vmem:[#allocation5 + $0x7b0] sm:$0xff] }
 0x115   : > { %2941 = vmatprep.subr.bf16.mxu1 %v2940_v10  ;;  %v489_v10 = vld [vmem:[#allocation5 + $0x868] sm:$0xff]  ;;  %v2834_v13 = vpack.c.bf16 %v472_v5, %v464_v4  ;;  %v2962_v14 = vpack.c.bf16 %v474_v8, %v466_v6  ;;  %v2980_v4 = vpack.c.bf16 %v555_v62, %v547_v61  ;;  %v554_v5 = vld [vmem:[#allocation5 + $0xa70] sm:$0xff]  ;;  %v563_v8 = vld [vmem:[#allocation5 + $0xab8] sm:$0xff] }
 0x116   : > { %v2836_v15 = vpack.c.bf16 %v489_v10, %v481_v9  ;;  %v561_v6 = vld [vmem:[#allocation5 + $0xaa8] sm:$0xff]  ;;  %v571_v9 = vld [vmem:[#allocation5 + $0xaf8] sm:$0xff]  ;;  %v624_v62 = vld [vmem:[#allocation5 + $0xca0] sm:$0xff] }
 0x117   : > { %2815 = vmatpush1.bf16.msra.mxu0 %v2814_v17  ;;  %v480_v17 = vld [vmem:[#allocation5 + $0x820] sm:$0xff] }
 0x118   : > { %2943 = vmatpush1.bf16.msra.mxu1 %v2942_v18  ;;  %2817 = vmatprep.subr.bf16.mxu0 %v2816_v19  ;;  %v488_v18 = vld [vmem:[#allocation5 + $0x860] sm:$0xff]  ;;  %v482_v19 = vld [vmem:[#allocation5 + $0x830] sm:$0xff] }
 0x119   : > { %2945 = vmatprep.subr.bf16.mxu1 %v2944_v23  ;;  %v505_v23 = vld [vmem:[#allocation5 + $0x8e8] sm:$0xff]  ;;  %v2838_v27 = vpack.c.bf16 %v488_v18, %v480_v17  ;;  %v2966_v28 = vpack.c.bf16 %v490_v21, %v482_v19  ;;  %v2984_v17 = vpack.c.bf16 %v571_v9, %v563_v8  ;;  %v570_v18 = vld [vmem:[#allocation5 + $0xaf0] sm:$0xff]  ;;  %v579_v21 = vld [vmem:[#allocation5 + $0xb38] sm:$0xff] }
 0x11a   : > { %v2840_v29 = vpack.c.bf16 %v505_v23, %v497_v22  ;;  %v577_v19 = vld [vmem:[#allocation5 + $0xb28] sm:$0xff]  ;;  %v587_v22 = vld [vmem:[#allocation5 + $0xb78] sm:$0xff]  ;;  %v640_v9 = vld [vmem:[#allocation5 + $0xd20] sm:$0xff] }
 0x11b   : > { %2819 = vmatpush1.bf16.msra.mxu0 %v2818_v30  ;;  %v496_v30 = vld [vmem:[#allocation5 + $0x8a0] sm:$0xff] }
 0x11c   : > { %2947 = vmatpush1.bf16.msra.mxu1 %v2946_v31  ;;  %2821 = vmatprep.subr.bf16.mxu0 %v2820_v32  ;;  %v504_v31 = vld [vmem:[#allocation5 + $0x8e0] sm:$0xff]  ;;  %v498_v32 = vld [vmem:[#allocation5 + $0x8b0] sm:$0xff] }
 0x11d   : > { %2949 = vmatprep.subr.bf16.mxu1 %v2948_v36  ;;  %v521_v36 = vld [vmem:[#allocation5 + $0x968] sm:$0xff]  ;;  %v2842_v40 = vpack.c.bf16 %v504_v31, %v496_v30  ;;  %v2970_v41 = vpack.c.bf16 %v506_v34, %v498_v32  ;;  %v2988_v30 = vpack.c.bf16 %v587_v22, %v579_v21  ;;  %v586_v31 = vld [vmem:[#allocation5 + $0xb70] sm:$0xff]  ;;  %v595_v34 = vld [vmem:[#allocation5 + $0xbb8] sm:$0xff] }
 0x11e   : > { %v593_v32 = vld [vmem:[#allocation5 + $0xba8] sm:$0xff]  ;;  %v656_v22 = vld [vmem:[#allocation5 + $0xda0] sm:$0xff] }
 0x11f   : > { %2823 = vmatpush1.bf16.msra.mxu0 %v2822_v42  ;;  %v2844_v42 = vpack.c.bf16 %v521_v36, %v513_v35  ;;  %v603_v35 = vld [vmem:[#allocation5 + $0xbf8] sm:$0xff] }
 0x120   : > { %2951 = vmatpush1.bf16.msra.mxu1 %v2950_v43  ;;  %2825 = vmatprep.subr.bf16.mxu0 %v2824_v44  ;;  %v512_v43 = vld [vmem:[#allocation5 + $0x920] sm:$0xff] }
 0x121   : > { %2953 = vmatprep.subr.bf16.mxu1 %v2952_v48  ;;  %v520_v44 = vld [vmem:[#allocation5 + $0x960] sm:$0xff]  ;;  %v529_v48 = vld [vmem:[#allocation5 + $0x9a8] sm:$0xff] }
 0x122   : > { %v2846_v52 = vpack.c.bf16 %v520_v44, %v512_v43  ;;  %v602_v43 = vld [vmem:[#allocation5 + $0xbf0] sm:$0xff]  ;;  %v609_v44 = vld [vmem:[#allocation5 + $0xc28] sm:$0xff] }
 0x123   : > { %2827 = vmatpush1.bf16.msra.mxu0 %v2826_v54  ;;  %v2848_v54 = vpack.c.bf16 %v537_v49, %v529_v48  ;;  %v2868_v50 = vpack.c.bf16 %v617_v45, %v609_v44 }
 0x124   : > { %2955 = vmatpush1.bf16.msra.mxu1 %v2954_v55  ;;  %2829 = vmatprep.subr.bf16.mxu0 %v2828_v56  ;;  %v528_v55 = vld [vmem:[#allocation5 + $0x9a0] sm:$0xff] }
 0x125   : > { %2957 = vmatprep.subr.bf16.mxu1 %v2956_v60  ;;  %v536_v56 = vld [vmem:[#allocation5 + $0x9e0] sm:$0xff]  ;;  %v545_v60 = vld [vmem:[#allocation5 + $0xa28] sm:$0xff] }
 0x126   : > { %v2850_v63 = vpack.c.bf16 %v536_v56, %v528_v55  ;;  %v2852_v0 = vpack.c.bf16 %v553_v16, %v545_v60  ;;  %v618_v55 = vld [vmem:[#allocation5 + $0xc70] sm:$0xff]  ;;  %v625_v56 = vld [vmem:[#allocation5 + $0xca8] sm:$0xff] }
 0x127   : > { %2831 = vmatpush1.bf16.msra.mxu0 %v2830_v1  ;;  %v544_v1 = vld [vmem:[#allocation5 + $0xa20] sm:$0xff] }
 0x128   : > { %2959 = vmatpush1.bf16.msra.mxu1 %v2958_v2  ;;  %2833 = vmatprep.subr.bf16.mxu0 %v2832_v3  ;;  %v552_v2 = vld [vmem:[#allocation5 + $0xa60] sm:$0xff]  ;;  %v546_v3 = vld [vmem:[#allocation5 + $0xa30] sm:$0xff] }
 0x129   : > { %2961 = vmatprep.subr.bf16.mxu1 %v2960_v7  ;;  %v569_v7 = vld [vmem:[#allocation5 + $0xae8] sm:$0xff]  ;;  %v2854_v10 = vpack.c.bf16 %v552_v2, %v544_v1  ;;  %v2982_v11 = vpack.c.bf16 %v554_v5, %v546_v3  ;;  %v634_v1 = vld [vmem:[#allocation5 + $0xcf0] sm:$0xff]  ;;  %v651_v5 = vld [vmem:[#allocation5 + $0xd78] sm:$0xff] }
 0x12a   : > { %v2856_v12 = vpack.c.bf16 %v569_v7, %v561_v6  ;;  %v641_v2 = vld [vmem:[#allocation5 + $0xd28] sm:$0xff] }
 0x12b   : > { %2835 = vmatpush1.bf16.msra.mxu0 %v2834_v13  ;;  %v560_v13 = vld [vmem:[#allocation5 + $0xaa0] sm:$0xff]  ;;  %v649_v3 = vld [vmem:[#allocation5 + $0xd68] sm:$0xff] }
 0x12c   : > { %2963 = vmatpush1.bf16.msra.mxu1 %v2962_v14  ;;  %2837 = vmatprep.subr.bf16.mxu0 %v2836_v15  ;;  %v568_v14 = vld [vmem:[#allocation5 + $0xae0] sm:$0xff]  ;;  %v562_v15 = vld [vmem:[#allocation5 + $0xab0] sm:$0xff]  ;;  %v2876_v8 = vpack.c.bf16 %v649_v3, %v641_v2 }
 0x12d   : > { %2965 = vmatprep.subr.bf16.mxu1 %v2964_v20  ;;  %v585_v20 = vld [vmem:[#allocation5 + $0xb68] sm:$0xff]  ;;  %v2858_v23 = vpack.c.bf16 %v568_v14, %v560_v13  ;;  %v2986_v25 = vpack.c.bf16 %v570_v18, %v562_v15  ;;  %v650_v13 = vld [vmem:[#allocation5 + $0xd70] sm:$0xff]  ;;  %v667_v18 = vld [vmem:[#allocation5 + $0xdf8] sm:$0xff] }
 0x12e   : > { %1081 = vmatmul.mubr.f32.vlgmr.msra.gmra.mrb[2].mxu0 %v3631_v37  ;;  %v2860_v26 = vpack.c.bf16 %v585_v20, %v577_v19  ;;  %v657_v14 = vld [vmem:[#allocation5 + $0xda8] sm:$0xff] }
 0x12f   : > { %2839 = vmatpush1.bf16.msra.mxu0 %v2838_v27  ;;  %1223 = vmatmul.mubr.f32.vlgmr.msra.gmra.mrb[2].mxu1 %v3631_v37  ;;  %v576_v27 = vld [vmem:[#allocation5 + $0xb20] sm:$0xff]  ;;  %v665_v15 = vld [vmem:[#allocation5 + $0xde8] sm:$0xff] }
 0x130   : > { %2967 = vmatpush1.bf16.msra.mxu1 %v2966_v28  ;;  %2841 = vmatprep.subr.bf16.mxu0 %v2840_v29  ;;  %v584_v28 = vld [vmem:[#allocation5 + $0xb60] sm:$0xff]  ;;  %v578_v29 = vld [vmem:[#allocation5 + $0xb30] sm:$0xff]  ;;  %v2880_v21 = vpack.c.bf16 %v665_v15, %v657_v14 }
 0x131   : > { %2969 = vmatprep.subr.bf16.mxu1 %v2968_v33  ;;  %1151 = vmatprep.mubr.f32.mxu0 %v4011_v24  ;;  %v601_v33 = vld [vmem:[#allocation5 + $0xbe8] sm:$0xff]  ;;  %v2862_v36 = vpack.c.bf16 %v584_v28, %v576_v27  ;;  %v2990_v37 = vpack.c.bf16 %v586_v31, %v578_v29  ;;  %v666_v27 = vld [vmem:[#allocation5 + $0xdf0] sm:$0xff]  ;;  %v683_v31 = vld [vmem:[#allocation5 + $0xe78] sm:$0xff] }
 0x132   : > { %1293 = vmatprep.mubr.f32.mxu1 %v4011_v24  ;;  %v2978_v24 = vpack.c.bf16 %v538_v59, %v530_v57  ;;  %v2864_v38 = vpack.c.bf16 %v601_v33, %v593_v32  ;;  %v633_v57 = vld [vmem:[#allocation5 + $0xce8] sm:$0xff]  ;;  %v635_v59 = vld [vmem:[#allocation5 + $0xcf8] sm:$0xff] }
 0x133   : > { %2843 = vmatpush1.bf16.msra.mxu0 %v2842_v40  ;;  %v600_v40 = vld [vmem:[#allocation5 + $0xbe0] sm:$0xff]  ;;  %v2872_v61 = vpack.c.bf16 %v633_v57, %v625_v56  ;;  %v673_v28 = vld [vmem:[#allocation5 + $0xe28] sm:$0xff] }
 0x134   : > { %2971 = vmatpush1.bf16.msra.mxu1 %v2970_v41  ;;  %2845 = vmatprep.subr.bf16.mxu0 %v2844_v42  ;;  %v594_v41 = vld [vmem:[#allocation5 + $0xbb0] sm:$0xff]  ;;  %v2992_v42 = vpack.c.bf16 %v603_v35, %v595_v34  ;;  %v2866_v48 = vpack.c.bf16 %v600_v40, %v592_v39  ;;  %v681_v29 = vld [vmem:[#allocation5 + $0xe68] sm:$0xff]  ;;  %v672_v35 = vld [vmem:[#allocation5 + $0xe20] sm:$0xff] }
 0x135   : > { %2973 = vmatprep.subr.bf16.mxu1 %v2972_v46  ;;  %v611_v46 = vld [vmem:[#allocation5 + $0xc38] sm:$0xff]  ;;  %v2994_v49 = vpack.c.bf16 %v602_v43, %v594_v41  ;;  %v2884_v34 = vpack.c.bf16 %v681_v29, %v673_v28  ;;  %v682_v39 = vld [vmem:[#allocation5 + $0xe70] sm:$0xff]  ;;  %v689_v40 = vld [vmem:[#allocation5 + $0xea8] sm:$0xff] }
 0x136   : > { %v697_v41 = vld [vmem:[#allocation5 + $0xee8] sm:$0xff]  ;;  %v699_v43 = vld [vmem:[#allocation5 + $0xef8] sm:$0xff] }
 0x137   : > { %2847 = vmatpush1.bf16.msra.mxu0 %v2846_v52  ;;  %v616_v52 = vld [vmem:[#allocation5 + $0xc60] sm:$0xff] }
 0x138   : > { %2975 = vmatpush1.bf16.msra.mxu1 %v2974_v53  ;;  %2849 = vmatprep.subr.bf16.mxu0 %v2848_v54  ;;  %v610_v53 = vld [vmem:[#allocation5 + $0xc30] sm:$0xff]  ;;  %v2996_v54 = vpack.c.bf16 %v619_v47, %v611_v46  ;;  %v2870_v60 = vpack.c.bf16 %v616_v52, %v608_v51  ;;  %v2888_v46 = vpack.c.bf16 %v697_v41, %v689_v40  ;;  %v688_v47 = vld [vmem:[#allocation5 + $0xea0] sm:$0xff]  ;;  %v705_v52 = vld [vmem:[#allocation5 + $0xf28] sm:$0xff] }
 0x139   : > { %2977 = vmatprep.subr.bf16.mxu1 %v2976_v58  ;;  %v627_v58 = vld [vmem:[#allocation5 + $0xcb8] sm:$0xff]  ;;  %v2998_v16 = vpack.c.bf16 %v618_v55, %v610_v53  ;;  %v698_v51 = vld [vmem:[#allocation5 + $0xef0] sm:$0xff]  ;;  %v713_v53 = vld [vmem:[#allocation5 + $0xf68] sm:$0xff] }
 0x13a   : > { %v715_v55 = vld [vmem:[#allocation5 + $0xf78] sm:$0xff] }
 0x13b   : > { %2851 = vmatpush1.bf16.msra.mxu0 %v2850_v63  ;;  %v632_v63 = vld [vmem:[#allocation5 + $0xce0] sm:$0xff]  ;;  %v1331_v40 = vld [vmem:[#allocation7 + $0xb8] sm:$0xff] }
 0x13c   : > { %2979 = vmatpush1.bf16.msra.mxu1 %v2978_v24  ;;  %2853 = vmatprep.subr.bf16.mxu0 %v2852_v0  ;;  %v626_v24 = vld [vmem:[#allocation5 + $0xcb0] sm:$0xff]  ;;  %v3000_v0 = vpack.c.bf16 %v635_v59, %v627_v58  ;;  %v2874_v6 = vpack.c.bf16 %v632_v63, %v624_v62  ;;  %v2892_v58 = vpack.c.bf16 %v713_v53, %v705_v52  ;;  %v704_v59 = vld [vmem:[#allocation5 + $0xf20] sm:$0xff]  ;;  %v721_v63 = vld [vmem:[#allocation5 + $0xfa8] sm:$0xff] }
 0x13d   : > { %2981 = vmatprep.subr.bf16.mxu1 %v2980_v4  ;;  %v643_v4 = vld [vmem:[#allocation5 + $0xd38] sm:$0xff]  ;;  %v3002_v7 = vpack.c.bf16 %v634_v1, %v626_v24  ;;  %v714_v62 = vld [vmem:[#allocation5 + $0xf70] sm:$0xff]  ;;  %v729_v24 = vld [vmem:[#allocation5 + $0xfe8] sm:$0xff] }
 0x13e   : > { %v731_v1 = vld [vmem:[#allocation5 + $0xff8] sm:$0xff] }
 0x13f   : > { %2855 = vmatpush1.bf16.msra.mxu0 %v2854_v10  ;;  %v648_v10 = vld [vmem:[#allocation5 + $0xd60] sm:$0xff]  ;;  %v1339_v52 = vld [vmem:[#allocation7 + $0xf8] sm:$0xff] }
 0x140   : > { %2983 = vmatpush1.bf16.msra.mxu1 %v2982_v11  ;;  %2857 = vmatprep.subr.bf16.mxu0 %v2856_v12  ;;  %v642_v11 = vld [vmem:[#allocation5 + $0xd30] sm:$0xff]  ;;  %v3004_v12 = vpack.c.bf16 %v651_v5, %v643_v4  ;;  %v2878_v19 = vpack.c.bf16 %v648_v10, %v640_v9  ;;  %v2896_v4 = vpack.c.bf16 %v729_v24, %v721_v63  ;;  %v720_v5 = vld [vmem:[#allocation5 + $0xfa0] sm:$0xff]  ;;  %v1309_v10 = vld [vmem:[#allocation7 + $0x8] sm:$0xff] }
 0x141   : > { %2985 = vmatprep.subr.bf16.mxu1 %v2984_v17  ;;  %v659_v17 = vld [vmem:[#allocation5 + $0xdb8] sm:$0xff]  ;;  %v3006_v20 = vpack.c.bf16 %v650_v13, %v642_v11  ;;  %v730_v9 = vld [vmem:[#allocation5 + $0xff0] sm:$0xff]  ;;  %v1313_v11 = vld [vmem:[#allocation7 + $0x28] sm:$0xff] }
 0x142   : > { %v1315_v13 = vld [vmem:[#allocation7 + $0x38] sm:$0xff] }
 0x143   : > { %2859 = vmatpush1.bf16.msra.mxu0 %v2858_v23  ;;  %v664_v23 = vld [vmem:[#allocation5 + $0xde0] sm:$0xff]  ;;  %v1347_v63 = vld [vmem:[#allocation7 + $0x138] sm:$0xff] }
 0x144   : > { %2987 = vmatpush1.bf16.msra.mxu1 %v2986_v25  ;;  %2861 = vmatprep.subr.bf16.mxu0 %v2860_v26  ;;  %v658_v25 = vld [vmem:[#allocation5 + $0xdb0] sm:$0xff]  ;;  %v3008_v26 = vpack.c.bf16 %v667_v18, %v659_v17  ;;  %v2882_v32 = vpack.c.bf16 %v664_v23, %v656_v22  ;;  %v3028_v17 = vpack.c.bf16 %v1313_v11, %v1309_v10  ;;  %v1308_v18 = vld [vmem:[#allocation7] sm:$0xff]  ;;  %v1317_v23 = vld [vmem:[#allocation7 + $0x48] sm:$0xff] }
 0x145   : > { %2989 = vmatprep.subr.bf16.mxu1 %v2988_v30  ;;  %v675_v30 = vld [vmem:[#allocation5 + $0xe38] sm:$0xff]  ;;  %v3010_v33 = vpack.c.bf16 %v666_v27, %v658_v25  ;;  %v1314_v22 = vld [vmem:[#allocation7 + $0x30] sm:$0xff]  ;;  %v1321_v25 = vld [vmem:[#allocation7 + $0x68] sm:$0xff] }
 0x146   : > { %v1323_v27 = vld [vmem:[#allocation7 + $0x78] sm:$0xff] }
 0x147   : > { %2863 = vmatpush1.bf16.msra.mxu0 %v2862_v36  ;;  %v680_v36 = vld [vmem:[#allocation5 + $0xe60] sm:$0xff]  ;;  %v1355_v10 = vld [vmem:[#allocation7 + $0x178] sm:$0xff] }
 0x148   : > { %2991 = vmatpush1.bf16.msra.mxu1 %v2990_v37  ;;  %2865 = vmatprep.subr.bf16.mxu0 %v2864_v38  ;;  %v674_v37 = vld [vmem:[#allocation5 + $0xe30] sm:$0xff]  ;;  %v3012_v38 = vpack.c.bf16 %v683_v31, %v675_v30  ;;  %v2886_v44 = vpack.c.bf16 %v680_v36, %v672_v35  ;;  %v3032_v30 = vpack.c.bf16 %v1321_v25, %v1317_v23  ;;  %v1316_v31 = vld [vmem:[#allocation7 + $0x40] sm:$0xff]  ;;  %v1325_v36 = vld [vmem:[#allocation7 + $0x88] sm:$0xff] }
 0x149   : > { %2993 = vmatprep.subr.bf16.mxu1 %v2992_v42  ;;  %v691_v42 = vld [vmem:[#allocation5 + $0xeb8] sm:$0xff]  ;;  %v3014_v45 = vpack.c.bf16 %v682_v39, %v674_v37  ;;  %v1322_v35 = vld [vmem:[#allocation7 + $0x70] sm:$0xff]  ;;  %v1329_v37 = vld [vmem:[#allocation7 + $0xa8] sm:$0xff] }
 0x14a   : > { %v1327_v39 = vld [vmem:[#allocation7 + $0x98] sm:$0xff] }
 0x14b   : > { %2867 = vmatpush1.bf16.msra.mxu0 %v2866_v48  ;;  %v696_v48 = vld [vmem:[#allocation5 + $0xee0] sm:$0xff]  ;;  %v1363_v23 = vld [vmem:[#allocation7 + $0x1b8] sm:$0xff] }
 0x14c   : > { %2995 = vmatpush1.bf16.msra.mxu1 %v2994_v49  ;;  %2869 = vmatprep.subr.bf16.mxu0 %v2868_v50  ;;  %v690_v49 = vld [vmem:[#allocation5 + $0xeb0] sm:$0xff]  ;;  %v3016_v50 = vpack.c.bf16 %v699_v43, %v691_v42  ;;  %v2890_v56 = vpack.c.bf16 %v696_v48, %v688_v47  ;;  %v3036_v43 = vpack.c.bf16 %v1329_v37, %v1325_v36  ;;  %v1371_v36 = vld [vmem:[#allocation7 + $0x1f8] sm:$0xff] }
 0x14d   : > { %2997 = vmatprep.subr.bf16.mxu1 %v2996_v54  ;;  %v707_v54 = vld [vmem:[#allocation5 + $0xf38] sm:$0xff]  ;;  %v3018_v57 = vpack.c.bf16 %v698_v51, %v690_v49  ;;  %v3292_v47 = vpack.c.bf16 %v1331_v40, %v1327_v39  ;;  %v1330_v48 = vld [vmem:[#allocation7 + $0xb0] sm:$0xff]  ;;  %v1333_v49 = vld [vmem:[#allocation7 + $0xc8] sm:$0xff] }
 0x14e   : > { %v1335_v51 = vld [vmem:[#allocation7 + $0xd8] sm:$0xff]  ;;  %v1364_v40 = vld [vmem:[#allocation7 + $0x1c0] sm:$0xff] }
 0x14f   : > { %2871 = vmatpush1.bf16.msra.mxu0 %v2870_v60  ;;  %v712_v60 = vld [vmem:[#allocation5 + $0xf60] sm:$0xff] }
 0x150   : > { %2999 = vmatpush1.bf16.msra.mxu1 %v2998_v16  ;;  %2873 = vmatprep.subr.bf16.mxu0 %v2872_v61  ;;  %v706_v16 = vld [vmem:[#allocation5 + $0xf30] sm:$0xff]  ;;  %v3020_v61 = vpack.c.bf16 %v715_v55, %v707_v54  ;;  %v2894_v2 = vpack.c.bf16 %v712_v60, %v704_v59  ;;  %v3296_v59 = vpack.c.bf16 %v1339_v52, %v1335_v51  ;;  %v1372_v52 = vld [vmem:[#allocation7 + $0x200] sm:$0xff] }
 0x151   : > { %3001 = vmatprep.subr.bf16.mxu1 %v3000_v0  ;;  %v723_v0 = vld [vmem:[#allocation5 + $0xfb8] sm:$0xff]  ;;  %v3022_v3 = vpack.c.bf16 %v714_v62, %v706_v16  ;;  %v1338_v60 = vld [vmem:[#allocation7 + $0xf0] sm:$0xff]  ;;  %v1341_v16 = vld [vmem:[#allocation7 + $0x108] sm:$0xff] }
 0x152   : > { %v1343_v62 = vld [vmem:[#allocation7 + $0x118] sm:$0xff] }
 0x153   : > { %2875 = vmatpush1.bf16.msra.mxu0 %v2874_v6  ;;  %v728_v6 = vld [vmem:[#allocation5 + $0xfe0] sm:$0xff] }
 0x154   : > { %3003 = vmatpush1.bf16.msra.mxu1 %v3002_v7  ;;  %2877 = vmatprep.subr.bf16.mxu0 %v2876_v8  ;;  %v722_v7 = vld [vmem:[#allocation5 + $0xfb0] sm:$0xff]  ;;  %v3024_v8 = vpack.c.bf16 %v731_v1, %v723_v0  ;;  %v2898_v14 = vpack.c.bf16 %v728_v6, %v720_v5  ;;  %v3300_v5 = vpack.c.bf16 %v1347_v63, %v1343_v62  ;;  %v1380_v63 = vld [vmem:[#allocation7 + $0x240] sm:$0xff] }
 0x155   : > { %3005 = vmatprep.subr.bf16.mxu1 %v3004_v12  ;;  %v1311_v12 = vld [vmem:[#allocation7 + $0x18] sm:$0xff]  ;;  %v3026_v15 = vpack.c.bf16 %v730_v9, %v722_v7  ;;  %v1346_v6 = vld [vmem:[#allocation7 + $0x130] sm:$0xff]  ;;  %v1349_v7 = vld [vmem:[#allocation7 + $0x148] sm:$0xff] }
 0x156   : > { %v1351_v9 = vld [vmem:[#allocation7 + $0x158] sm:$0xff] }
 0x157   : > { %2879 = vmatpush1.bf16.msra.mxu0 %v2878_v19  ;;  %v1312_v19 = vld [vmem:[#allocation7 + $0x20] sm:$0xff] }
 0x158   : > { %3007 = vmatpush1.bf16.msra.mxu1 %v3006_v20  ;;  %2881 = vmatprep.subr.bf16.mxu0 %v2880_v21  ;;  %v1310_v20 = vld [vmem:[#allocation7 + $0x10] sm:$0xff]  ;;  %v3284_v21 = vpack.c.bf16 %v1315_v13, %v1311_v12  ;;  %v3030_v28 = vpack.c.bf16 %v1312_v19, %v1308_v18  ;;  %v3304_v18 = vpack.c.bf16 %v1355_v10, %v1351_v9  ;;  %v1388_v10 = vld [vmem:[#allocation7 + $0x280] sm:$0xff] }
 0x159   : > { %3009 = vmatprep.subr.bf16.mxu1 %v3008_v26  ;;  %v1319_v26 = vld [vmem:[#allocation7 + $0x58] sm:$0xff]  ;;  %v3286_v29 = vpack.c.bf16 %v1314_v22, %v1310_v20  ;;  %v1354_v19 = vld [vmem:[#allocation7 + $0x170] sm:$0xff]  ;;  %v1357_v20 = vld [vmem:[#allocation7 + $0x188] sm:$0xff] }
 0x15a   : > { %v1359_v22 = vld [vmem:[#allocation7 + $0x198] sm:$0xff] }
 0x15b   : > { %2883 = vmatpush1.bf16.msra.mxu0 %v2882_v32  ;;  %v1320_v32 = vld [vmem:[#allocation7 + $0x60] sm:$0xff] }
 0x15c   : > { %3011 = vmatpush1.bf16.msra.mxu1 %v3010_v33  ;;  %2885 = vmatprep.subr.bf16.mxu0 %v2884_v34  ;;  %v1318_v33 = vld [vmem:[#allocation7 + $0x50] sm:$0xff]  ;;  %v3288_v34 = vpack.c.bf16 %v1323_v27, %v1319_v26  ;;  %v3034_v41 = vpack.c.bf16 %v1320_v32, %v1316_v31  ;;  %v3308_v31 = vpack.c.bf16 %v1363_v23, %v1359_v22  ;;  %v1396_v23 = vld [vmem:[#allocation7 + $0x2c0] sm:$0xff] }
 0x15d   : > { %3013 = vmatprep.subr.bf16.mxu1 %v3012_v38  ;;  %v3632_v38 = vld [vmem:[%s3994_s30 + $0x10] sm:$0xff]  ;;  %v3290_v42 = vpack.c.bf16 %v1322_v35, %v1318_v33  ;;  %v1365_v33 = vld [vmem:[#allocation7 + $0x1c8] sm:$0xff]  ;;  %v1367_v35 = vld [vmem:[#allocation7 + $0x1d8] sm:$0xff] }
 0x15e   : > { %v1362_v32 = vld [vmem:[#allocation7 + $0x1b0] sm:$0xff] }
 0x15f   : > { %2887 = vmatpush1.bf16.msra.mxu0 %v2886_v44  ;;  %v1324_v44 = vld [vmem:[#allocation7 + $0x80] sm:$0xff] }
 0x160   : > { %3015 = vmatpush1.bf16.msra.mxu1 %v3014_v45  ;;  %2889 = vmatprep.subr.bf16.mxu0 %v2888_v46  ;;  %v1328_v45 = vld [vmem:[#allocation7 + $0xa0] sm:$0xff]  ;;  %v1326_v46 = vld [vmem:[#allocation7 + $0x90] sm:$0xff] }
 0x161   : > { %3017 = vmatprep.subr.bf16.mxu1 %v3016_v50  ;;  %v1337_v50 = vld [vmem:[#allocation7 + $0xe8] sm:$0xff]  ;;  %v3038_v53 = vpack.c.bf16 %v1328_v45, %v1324_v44  ;;  %v3294_v54 = vpack.c.bf16 %v1330_v48, %v1326_v46  ;;  %v1370_v44 = vld [vmem:[#allocation7 + $0x1f0] sm:$0xff]  ;;  %v1379_v48 = vld [vmem:[#allocation7 + $0x238] sm:$0xff] }
 0x162   : > { %v3040_v55 = vpack.c.bf16 %v1337_v50, %v1333_v49  ;;  %v1373_v45 = vld [vmem:[#allocation7 + $0x208] sm:$0xff] }
 0x163   : > { %2891 = vmatpush1.bf16.msra.mxu0 %v2890_v56  ;;  %v1332_v56 = vld [vmem:[#allocation7 + $0xc0] sm:$0xff]  ;;  %v1377_v46 = vld [vmem:[#allocation7 + $0x228] sm:$0xff] }
 0x164   : > { %3019 = vmatpush1.bf16.msra.mxu1 %v3018_v57  ;;  %2893 = vmatprep.subr.bf16.mxu0 %v2892_v58  ;;  %v1336_v57 = vld [vmem:[#allocation7 + $0xe0] sm:$0xff]  ;;  %v1334_v58 = vld [vmem:[#allocation7 + $0xd0] sm:$0xff]  ;;  %v3060_v51 = vpack.c.bf16 %v1377_v46, %v1373_v45 }
 0x165   : > { %3021 = vmatprep.subr.bf16.mxu1 %v3020_v61  ;;  %v1345_v61 = vld [vmem:[#allocation7 + $0x128] sm:$0xff]  ;;  %v3042_v24 = vpack.c.bf16 %v1336_v57, %v1332_v56  ;;  %v3298_v0 = vpack.c.bf16 %v1338_v60, %v1334_v58  ;;  %v1378_v56 = vld [vmem:[#allocation7 + $0x230] sm:$0xff]  ;;  %v1387_v60 = vld [vmem:[#allocation7 + $0x278] sm:$0xff] }
 0x166   : > { %v3044_v1 = vpack.c.bf16 %v1345_v61, %v1341_v16  ;;  %v1381_v57 = vld [vmem:[#allocation7 + $0x248] sm:$0xff] }
 0x167   : > { %2895 = vmatpush1.bf16.msra.mxu0 %v2894_v2  ;;  %v1340_v2 = vld [vmem:[#allocation7 + $0x100] sm:$0xff]  ;;  %v1385_v58 = vld [vmem:[#allocation7 + $0x268] sm:$0xff] }
 0x168   : > { %3023 = vmatpush1.bf16.msra.mxu1 %v3022_v3  ;;  %2897 = vmatprep.subr.bf16.mxu0 %v2896_v4  ;;  %v1344_v3 = vld [vmem:[#allocation7 + $0x120] sm:$0xff]  ;;  %v1342_v4 = vld [vmem:[#allocation7 + $0x110] sm:$0xff]  ;;  %v3064_v62 = vpack.c.bf16 %v1385_v58, %v1381_v57 }
 0x169   : > { %3025 = vmatprep.subr.bf16.mxu1 %v3024_v8  ;;  %v1353_v8 = vld [vmem:[#allocation7 + $0x168] sm:$0xff]  ;;  %v3046_v11 = vpack.c.bf16 %v1344_v3, %v1340_v2  ;;  %v3302_v12 = vpack.c.bf16 %v1346_v6, %v1342_v4  ;;  %v1386_v2 = vld [vmem:[#allocation7 + $0x270] sm:$0xff]  ;;  %v1395_v6 = vld [vmem:[#allocation7 + $0x2b8] sm:$0xff] }
 0x16a   : > { %v3048_v13 = vpack.c.bf16 %v1353_v8, %v1349_v7  ;;  %v1389_v3 = vld [vmem:[#allocation7 + $0x288] sm:$0xff] }
 0x16b   : > { %2899 = vmatpush1.bf16.msra.mxu0 %v2898_v14  ;;  %v1348_v14 = vld [vmem:[#allocation7 + $0x140] sm:$0xff]  ;;  %v1393_v4 = vld [vmem:[#allocation7 + $0x2a8] sm:$0xff] }
 0x16c   : > { %3027 = vmatpush1.bf16.msra.mxu1 %v3026_v15  ;;  %3029 = vmatprep.subr.bf16.mxu0 %v3028_v17  ;;  %v1352_v15 = vld [vmem:[#allocation7 + $0x160] sm:$0xff]  ;;  %v1350_v17 = vld [vmem:[#allocation7 + $0x150] sm:$0xff]  ;;  %v3068_v9 = vpack.c.bf16 %v1393_v4, %v1389_v3 }
 0x16d   : > { %3285 = vmatprep.subr.bf16.mxu1 %v3284_v21  ;;  %v1361_v21 = vld [vmem:[#allocation7 + $0x1a8] sm:$0xff]  ;;  %v3050_v25 = vpack.c.bf16 %v1352_v15, %v1348_v14  ;;  %v3306_v26 = vpack.c.bf16 %v1354_v19, %v1350_v17  ;;  %v1394_v14 = vld [vmem:[#allocation7 + $0x2b0] sm:$0xff]  ;;  %v1403_v19 = vld [vmem:[#allocation7 + $0x2f8] sm:$0xff] }
 0x16e   : > { %1152 = vmatmul.mubr.f32.vlgmr.msra.gmra.mrb[2].mxu0 %v3632_v38  ;;  %v3052_v27 = vpack.c.bf16 %v1361_v21, %v1357_v20  ;;  %v1397_v15 = vld [vmem:[#allocation7 + $0x2c8] sm:$0xff] }
 0x16f   : > { %1294 = vmatmul.mubr.f32.vlgmr.msra.gmra.mrb[2].mxu1 %v3632_v38  ;;  %3031 = vmatpush1.bf16.msra.mxu0 %v3030_v28  ;;  %v1356_v28 = vld [vmem:[#allocation7 + $0x180] sm:$0xff]  ;;  %v1401_v17 = vld [vmem:[#allocation7 + $0x2e8] sm:$0xff] }
 0x170   : > { %3287 = vmatpush1.bf16.msra.mxu1 %v3286_v29  ;;  %3033 = vmatprep.subr.bf16.mxu0 %v3032_v30  ;;  %v1360_v29 = vld [vmem:[#allocation7 + $0x1a0] sm:$0xff]  ;;  %v1358_v30 = vld [vmem:[#allocation7 + $0x190] sm:$0xff]  ;;  %v3072_v22 = vpack.c.bf16 %v1401_v17, %v1397_v15 }
 0x171   : > { %3289 = vmatprep.subr.bf16.mxu1 %v3288_v34  ;;  %v1369_v34 = vld [vmem:[#allocation7 + $0x1e8] sm:$0xff]  ;;  %v3054_v37 = vpack.c.bf16 %v1360_v29, %v1356_v28  ;;  %v3310_v38 = vpack.c.bf16 %v1362_v32, %v1358_v30  ;;  %v1402_v28 = vld [vmem:[#allocation7 + $0x2f0] sm:$0xff]  ;;  %v1411_v32 = vld [vmem:[#allocation7 + $0x338] sm:$0xff] }
 0x172   : > { %v3056_v39 = vpack.c.bf16 %v1369_v34, %v1365_v33  ;;  %v1405_v29 = vld [vmem:[#allocation7 + $0x308] sm:$0xff] }
 0x173   : > { %3035 = vmatpush1.bf16.msra.mxu0 %v3034_v41  ;;  %v1368_v41 = vld [vmem:[#allocation7 + $0x1e0] sm:$0xff]  ;;  %v1409_v30 = vld [vmem:[#allocation7 + $0x328] sm:$0xff] }
 0x174   : > { %3291 = vmatpush1.bf16.msra.mxu1 %v3290_v42  ;;  %3037 = vmatprep.subr.bf16.mxu0 %v3036_v43  ;;  %v1366_v42 = vld [vmem:[#allocation7 + $0x1d0] sm:$0xff]  ;;  %v3312_v43 = vpack.c.bf16 %v1371_v36, %v1367_v35  ;;  %v3058_v49 = vpack.c.bf16 %v1368_v41, %v1364_v40  ;;  %v3076_v35 = vpack.c.bf16 %v1409_v30, %v1405_v29  ;;  %v1404_v36 = vld [vmem:[#allocation7 + $0x300] sm:$0xff]  ;;  %v1413_v41 = vld [vmem:[#allocation7 + $0x348] sm:$0xff] }
 0x175   : > { %3293 = vmatprep.subr.bf16.mxu1 %v3292_v47  ;;  %v1375_v47 = vld [vmem:[#allocation7 + $0x218] sm:$0xff]  ;;  %v3314_v50 = vpack.c.bf16 %v1370_v44, %v1366_v42  ;;  %v1410_v40 = vld [vmem:[#allocation7 + $0x330] sm:$0xff]  ;;  %v1417_v42 = vld [vmem:[#allocation7 + $0x368] sm:$0xff] }
 0x176   : > { %v1419_v44 = vld [vmem:[#allocation7 + $0x378] sm:$0xff]  ;;  %v1449_v29 = vld [vmem:[#allocation7 + $0x468] sm:$0xff] }
 0x177   : > { %3039 = vmatpush1.bf16.msra.mxu0 %v3038_v53  ;;  %v1376_v53 = vld [vmem:[#allocation7 + $0x220] sm:$0xff]  ;;  %v1447_v30 = vld [vmem:[#allocation7 + $0x458] sm:$0xff] }
 0x178   : > { %3295 = vmatpush1.bf16.msra.mxu1 %v3294_v54  ;;  %3041 = vmatprep.subr.bf16.mxu0 %v3040_v55  ;;  %v1374_v54 = vld [vmem:[#allocation7 + $0x210] sm:$0xff]  ;;  %v3316_v55 = vpack.c.bf16 %v1379_v48, %v1375_v47  ;;  %v3062_v16 = vpack.c.bf16 %v1376_v53, %v1372_v52  ;;  %v3080_v47 = vpack.c.bf16 %v1417_v42, %v1413_v41  ;;  %v1412_v48 = vld [vmem:[#allocation7 + $0x340] sm:$0xff]  ;;  %v1421_v53 = vld [vmem:[#allocation7 + $0x388] sm:$0xff] }
 0x179   : > { %3297 = vmatprep.subr.bf16.mxu1 %v3296_v59  ;;  %v1383_v59 = vld [vmem:[#allocation7 + $0x258] sm:$0xff]  ;;  %v3318_v61 = vpack.c.bf16 %v1378_v56, %v1374_v54  ;;  %v1418_v52 = vld [vmem:[#allocation7 + $0x370] sm:$0xff]  ;;  %v1425_v54 = vld [vmem:[#allocation7 + $0x3a8] sm:$0xff] }
 0x17a   : > { %v1427_v56 = vld [vmem:[#allocation7 + $0x3b8] sm:$0xff]  ;;  %v1453_v41 = vld [vmem:[#allocation7 + $0x488] sm:$0xff] }
 0x17b   : > { %3043 = vmatpush1.bf16.msra.mxu0 %v3042_v24  ;;  %v1384_v24 = vld [vmem:[#allocation7 + $0x260] sm:$0xff] }
 0x17c   : > { %3299 = vmatpush1.bf16.msra.mxu1 %v3298_v0  ;;  %3045 = vmatprep.subr.bf16.mxu0 %v3044_v1  ;;  %v1382_v0 = vld [vmem:[#allocation7 + $0x250] sm:$0xff]  ;;  %v3320_v1 = vpack.c.bf16 %v1387_v60, %v1383_v59  ;;  %v3066_v7 = vpack.c.bf16 %v1384_v24, %v1380_v63  ;;  %v3084_v59 = vpack.c.bf16 %v1425_v54, %v1421_v53  ;;  %v1420_v60 = vld [vmem:[#allocation7 + $0x380] sm:$0xff]  ;;  %v1429_v24 = vld [vmem:[#allocation7 + $0x3c8] sm:$0xff] }
 0x17d   : > { %3301 = vmatprep.subr.bf16.mxu1 %v3300_v5  ;;  %v1391_v5 = vld [vmem:[#allocation7 + $0x298] sm:$0xff]  ;;  %v3322_v8 = vpack.c.bf16 %v1386_v2, %v1382_v0  ;;  %v1426_v63 = vld [vmem:[#allocation7 + $0x3b0] sm:$0xff]  ;;  %v1433_v0 = vld [vmem:[#allocation7 + $0x3e8] sm:$0xff] }
 0x17e   : > { %v1435_v2 = vld [vmem:[#allocation7 + $0x3f8] sm:$0xff]  ;;  %v1454_v54 = vld [vmem:[#allocation7 + $0x490] sm:$0xff] }
 0x17f   : > { %3047 = vmatpush1.bf16.msra.mxu0 %v3046_v11  ;;  %v1392_v11 = vld [vmem:[#allocation7 + $0x2a0] sm:$0xff] }
 0x180   : > { %3303 = vmatpush1.bf16.msra.mxu1 %v3302_v12  ;;  %3049 = vmatprep.subr.bf16.mxu0 %v3048_v13  ;;  %v1390_v12 = vld [vmem:[#allocation7 + $0x290] sm:$0xff]  ;;  %v3324_v13 = vpack.c.bf16 %v1395_v6, %v1391_v5  ;;  %v3070_v20 = vpack.c.bf16 %v1392_v11, %v1388_v10  ;;  %v3088_v5 = vpack.c.bf16 %v1433_v0, %v1429_v24  ;;  %v1428_v6 = vld [vmem:[#allocation7 + $0x3c0] sm:$0xff]  ;;  %v1437_v11 = vld [vmem:[#allocation7 + $0x408] sm:$0xff] }
 0x181   : > { %3305 = vmatprep.subr.bf16.mxu1 %v3304_v18  ;;  %v1399_v18 = vld [vmem:[#allocation7 + $0x2d8] sm:$0xff]  ;;  %v3326_v21 = vpack.c.bf16 %v1394_v14, %v1390_v12  ;;  %v1434_v10 = vld [vmem:[#allocation7 + $0x3f0] sm:$0xff]  ;;  %v1441_v12 = vld [vmem:[#allocation7 + $0x428] sm:$0xff] }
 0x182   : > { %v1443_v14 = vld [vmem:[#allocation7 + $0x438] sm:$0xff]  ;;  %v1462_v0 = vld [vmem:[#allocation7 + $0x4d0] sm:$0xff] }
 0x183   : > { %3051 = vmatpush1.bf16.msra.mxu0 %v3050_v25  ;;  %v1400_v25 = vld [vmem:[#allocation7 + $0x2e0] sm:$0xff] }
 0x184   : > { %3307 = vmatpush1.bf16.msra.mxu1 %v3306_v26  ;;  %3053 = vmatprep.subr.bf16.mxu0 %v3052_v27  ;;  %v1398_v26 = vld [vmem:[#allocation7 + $0x2d0] sm:$0xff]  ;;  %v3328_v27 = vpack.c.bf16 %v1403_v19, %v1399_v18  ;;  %v3074_v33 = vpack.c.bf16 %v1400_v25, %v1396_v23  ;;  %v3092_v18 = vpack.c.bf16 %v1441_v12, %v1437_v11 }
 0x185   : > { %3309 = vmatprep.subr.bf16.mxu1 %v3308_v31  ;;  %v1407_v31 = vld [vmem:[#allocation7 + $0x318] sm:$0xff]  ;;  %v3330_v34 = vpack.c.bf16 %v1402_v28, %v1398_v26  ;;  %v1442_v23 = vld [vmem:[#allocation7 + $0x430] sm:$0xff]  ;;  %v1445_v26 = vld [vmem:[#allocation7 + $0x448] sm:$0xff] }
 0x186   : > { %v3096_v42 = vpack.c.bf16 %v1449_v29, %v1445_v26  ;;  %v1470_v12 = vld [vmem:[#allocation7 + $0x510] sm:$0xff]  ;;  %v1485_v29 = vld [vmem:[#allocation7 + $0x588] sm:$0xff] }
 0x187   : > { %3055 = vmatpush1.bf16.msra.mxu0 %v3054_v37  ;;  %v1408_v37 = vld [vmem:[#allocation7 + $0x320] sm:$0xff]  ;;  %v1478_v26 = vld [vmem:[#allocation7 + $0x550] sm:$0xff] }
 0x188   : > { %3311 = vmatpush1.bf16.msra.mxu1 %v3310_v38  ;;  %3057 = vmatprep.subr.bf16.mxu0 %v3056_v39  ;;  %v1406_v38 = vld [vmem:[#allocation7 + $0x310] sm:$0xff]  ;;  %v3332_v39 = vpack.c.bf16 %v1411_v32, %v1407_v31  ;;  %v3078_v45 = vpack.c.bf16 %v1408_v37, %v1404_v36  ;;  %v1451_v31 = vld [vmem:[#allocation7 + $0x478] sm:$0xff]  ;;  %v1444_v36 = vld [vmem:[#allocation7 + $0x440] sm:$0xff] }
 0x189   : > { %3313 = vmatprep.subr.bf16.mxu1 %v3312_v43  ;;  %v1415_v43 = vld [vmem:[#allocation7 + $0x358] sm:$0xff]  ;;  %v3334_v46 = vpack.c.bf16 %v1410_v40, %v1406_v38  ;;  %v1448_v37 = vld [vmem:[#allocation7 + $0x460] sm:$0xff]  ;;  %v1450_v40 = vld [vmem:[#allocation7 + $0x470] sm:$0xff] }
 0x18b   : > { %3059 = vmatpush1.bf16.msra.mxu0 %v3058_v49  ;;  %v1416_v49 = vld [vmem:[#allocation7 + $0x360] sm:$0xff] }
 0x18c   : > { %3315 = vmatpush1.bf16.msra.mxu1 %v3314_v50  ;;  %3061 = vmatprep.subr.bf16.mxu0 %v3060_v51  ;;  %v1414_v50 = vld [vmem:[#allocation7 + $0x350] sm:$0xff]  ;;  %v3336_v51 = vpack.c.bf16 %v1419_v44, %v1415_v43  ;;  %v3082_v57 = vpack.c.bf16 %v1416_v49, %v1412_v48  ;;  %v3352_v43 = vpack.c.bf16 %v1451_v31, %v1447_v30  ;;  %v1457_v44 = vld [vmem:[#allocation7 + $0x4a8] sm:$0xff]  ;;  %v1487_v31 = vld [vmem:[#allocation7 + $0x598] sm:$0xff] }
 0x18d   : > { %3317 = vmatprep.subr.bf16.mxu1 %v3316_v55  ;;  %v1423_v55 = vld [vmem:[#allocation7 + $0x398] sm:$0xff]  ;;  %v3338_v58 = vpack.c.bf16 %v1418_v52, %v1414_v50  ;;  %v3098_v48 = vpack.c.bf16 %v1448_v37, %v1444_v36  ;;  %v1452_v50 = vld [vmem:[#allocation7 + $0x480] sm:$0xff]  ;;  %v3100_v52 = vpack.c.bf16 %v1457_v44, %v1453_v41  ;;  %v1489_v30 = vld [vmem:[#allocation7 + $0x5a8] sm:$0xff] }
 0x18e   : > { %v1488_v36 = vld [vmem:[#allocation7 + $0x5a0] sm:$0xff]  ;;  %v3116_v37 = vpack.c.bf16 %v1489_v30, %v1485_v29  ;;  %v1493_v41 = vld [vmem:[#allocation7 + $0x5c8] sm:$0xff]  ;;  %v1499_v44 = vld [vmem:[#allocation7 + $0x5f8] sm:$0xff] }
 0x18f   : > { %3063 = vmatpush1.bf16.msra.mxu0 %v3062_v16  ;;  %v1424_v16 = vld [vmem:[#allocation7 + $0x3a0] sm:$0xff]  ;;  %v1531_v29 = vld [vmem:[#allocation7 + $0x6f8] sm:$0xff] }
 0x190   : > { %3319 = vmatpush1.bf16.msra.mxu1 %v3318_v61  ;;  %3065 = vmatprep.subr.bf16.mxu0 %v3064_v62  ;;  %v1422_v61 = vld [vmem:[#allocation7 + $0x390] sm:$0xff]  ;;  %v3340_v62 = vpack.c.bf16 %v1427_v56, %v1423_v55  ;;  %v3086_v3 = vpack.c.bf16 %v1424_v16, %v1420_v60  ;;  %v1461_v56 = vld [vmem:[#allocation7 + $0x4c8] sm:$0xff] }
 0x191   : > { %3321 = vmatprep.subr.bf16.mxu1 %v3320_v1  ;;  %v1431_v1 = vld [vmem:[#allocation7 + $0x3d8] sm:$0xff]  ;;  %v3342_v4 = vpack.c.bf16 %v1426_v63, %v1422_v61  ;;  %v1458_v55 = vld [vmem:[#allocation7 + $0x4b0] sm:$0xff]  ;;  %v1460_v61 = vld [vmem:[#allocation7 + $0x4c0] sm:$0xff] }
 0x192   : > { %v3358_v16 = vpack.c.bf16 %v1458_v55, %v1454_v54  ;;  %v1505_v54 = vld [vmem:[#allocation7 + $0x628] sm:$0xff]  ;;  %v1503_v55 = vld [vmem:[#allocation7 + $0x618] sm:$0xff] }
 0x193   : > { %3067 = vmatpush1.bf16.msra.mxu0 %v3066_v7  ;;  %v1432_v7 = vld [vmem:[#allocation7 + $0x3e0] sm:$0xff] }
 0x194   : > { %3323 = vmatpush1.bf16.msra.mxu1 %v3322_v8  ;;  %3069 = vmatprep.subr.bf16.mxu0 %v3068_v9  ;;  %v1430_v8 = vld [vmem:[#allocation7 + $0x3d0] sm:$0xff]  ;;  %v3344_v9 = vpack.c.bf16 %v1435_v2, %v1431_v1  ;;  %v3090_v15 = vpack.c.bf16 %v1432_v7, %v1428_v6  ;;  %v1469_v2 = vld [vmem:[#allocation7 + $0x508] sm:$0xff] }
 0x195   : > { %3325 = vmatprep.subr.bf16.mxu1 %v3324_v13  ;;  %v1439_v13 = vld [vmem:[#allocation7 + $0x418] sm:$0xff]  ;;  %v3346_v17 = vpack.c.bf16 %v1434_v10, %v1430_v8  ;;  %v1466_v1 = vld [vmem:[#allocation7 + $0x4f0] sm:$0xff]  ;;  %v1468_v8 = vld [vmem:[#allocation7 + $0x500] sm:$0xff] }
 0x196   : > { %v3348_v19 = vpack.c.bf16 %v1443_v14, %v1439_v13  ;;  %v3362_v7 = vpack.c.bf16 %v1466_v1, %v1462_v0  ;;  %v1474_v13 = vld [vmem:[#allocation7 + $0x530] sm:$0xff]  ;;  %v1477_v14 = vld [vmem:[#allocation7 + $0x548] sm:$0xff]  ;;  %v1511_v1 = vld [vmem:[#allocation7 + $0x658] sm:$0xff] }
 0x197   : > { %3071 = vmatpush1.bf16.msra.mxu0 %v3070_v20  ;;  %v1436_v20 = vld [vmem:[#allocation7 + $0x400] sm:$0xff]  ;;  %v1513_v0 = vld [vmem:[#allocation7 + $0x668] sm:$0xff] }
 0x198   : > { %3327 = vmatpush1.bf16.msra.mxu1 %v3326_v21  ;;  %3073 = vmatprep.subr.bf16.mxu0 %v3072_v22  ;;  %v1440_v21 = vld [vmem:[#allocation7 + $0x420] sm:$0xff]  ;;  %v1438_v22 = vld [vmem:[#allocation7 + $0x410] sm:$0xff] }
 0x199   : > { %3329 = vmatprep.subr.bf16.mxu1 %v3328_v27 }
 0x19b   : > { %3075 = vmatpush1.bf16.msra.mxu0 %v3074_v33 }
 0x19c   : > { %3331 = vmatpush1.bf16.msra.mxu1 %v3330_v34  ;;  %3077 = vmatprep.subr.bf16.mxu0 %v3076_v35  ;;  %v3094_v34 = vpack.c.bf16 %v1440_v21, %v1436_v20  ;;  %v3350_v35 = vpack.c.bf16 %v1442_v23, %v1438_v22  ;;  %v3366_v20 = vpack.c.bf16 %v1474_v13, %v1470_v12  ;;  %v1476_v21 = vld [vmem:[#allocation7 + $0x540] sm:$0xff]  ;;  %v1521_v12 = vld [vmem:[#allocation7 + $0x6a8] sm:$0xff]  ;;  %v1519_v13 = vld [vmem:[#allocation7 + $0x698] sm:$0xff] }
 0x19d   : > { %3333 = vmatprep.subr.bf16.mxu1 %v3332_v39  ;;  %v1446_v39 = vld [vmem:[#allocation7 + $0x450] sm:$0xff]  ;;  %v1480_v22 = vld [vmem:[#allocation7 + $0x560] sm:$0xff] }
 0x19e   : > { %v3354_v49 = vpack.c.bf16 %v1450_v40, %v1446_v39  ;;  %v1486_v39 = vld [vmem:[#allocation7 + $0x590] sm:$0xff] }
 0x19f   : > { %3079 = vmatpush1.bf16.msra.mxu0 %v3078_v45  ;;  %v1455_v45 = vld [vmem:[#allocation7 + $0x498] sm:$0xff]  ;;  %v1490_v40 = vld [vmem:[#allocation7 + $0x5b0] sm:$0xff] }
 0x1a0   : > { %3335 = vmatpush1.bf16.msra.mxu1 %v3334_v46  ;;  %3081 = vmatprep.subr.bf16.mxu0 %v3080_v47  ;;  %v1459_v46 = vld [vmem:[#allocation7 + $0x4b8] sm:$0xff] }
 0x1a1   : > { %3337 = vmatprep.subr.bf16.mxu1 %v3336_v51  ;;  %v1456_v51 = vld [vmem:[#allocation7 + $0x4a0] sm:$0xff]  ;;  %v3356_v53 = vpack.c.bf16 %v1459_v46, %v1455_v45  ;;  %v3374_v46 = vpack.c.bf16 %v1490_v40, %v1486_v39  ;;  %v1537_v39 = vld [vmem:[#allocation7 + $0x728] sm:$0xff]  ;;  %v1535_v40 = vld [vmem:[#allocation7 + $0x718] sm:$0xff] }
 0x1a2   : > { %v3102_v60 = vpack.c.bf16 %v1456_v51, %v1452_v50  ;;  %v1494_v51 = vld [vmem:[#allocation7 + $0x5d0] sm:$0xff] }
 0x1a3   : > { %3083 = vmatpush1.bf16.msra.mxu0 %v3082_v57  ;;  %v1465_v57 = vld [vmem:[#allocation7 + $0x4e8] sm:$0xff] }
 0x1a4   : > { %3339 = vmatpush1.bf16.msra.mxu1 %v3338_v58  ;;  %3085 = vmatprep.subr.bf16.mxu0 %v3084_v59  ;;  %v1463_v58 = vld [vmem:[#allocation7 + $0x4d8] sm:$0xff]  ;;  %v3104_v63 = vpack.c.bf16 %v1465_v57, %v1461_v56 }
 0x1a5   : > { %3341 = vmatprep.subr.bf16.mxu1 %v3340_v62  ;;  %v1467_v59 = vld [vmem:[#allocation7 + $0x4f8] sm:$0xff]  ;;  %v1464_v62 = vld [vmem:[#allocation7 + $0x4e0] sm:$0xff] }
 0x1a6   : > { %v3360_v24 = vpack.c.bf16 %v1467_v59, %v1463_v58  ;;  %v3106_v6 = vpack.c.bf16 %v1464_v62, %v1460_v61  ;;  %v1507_v56 = vld [vmem:[#allocation7 + $0x638] sm:$0xff]  ;;  %v1500_v59 = vld [vmem:[#allocation7 + $0x600] sm:$0xff]  ;;  %v1502_v62 = vld [vmem:[#allocation7 + $0x610] sm:$0xff] }
 0x1a7   : > { %3087 = vmatpush1.bf16.msra.mxu0 %v3086_v3  ;;  %v1473_v3 = vld [vmem:[#allocation7 + $0x528] sm:$0xff]  ;;  %v3380_v61 = vpack.c.bf16 %v1507_v56, %v1503_v55  ;;  %v1540_v56 = vld [vmem:[#allocation7 + $0x740] sm:$0xff] }
 0x1a8   : > { %3343 = vmatpush1.bf16.msra.mxu1 %v3342_v4  ;;  %3089 = vmatprep.subr.bf16.mxu0 %v3088_v5  ;;  %v1471_v4 = vld [vmem:[#allocation7 + $0x518] sm:$0xff]  ;;  %v3108_v10 = vpack.c.bf16 %v1473_v3, %v1469_v2 }
 0x1a9   : > { %3345 = vmatprep.subr.bf16.mxu1 %v3344_v9  ;;  %v1475_v5 = vld [vmem:[#allocation7 + $0x538] sm:$0xff]  ;;  %v1472_v9 = vld [vmem:[#allocation7 + $0x520] sm:$0xff] }
 0x1aa   : > { %v3364_v11 = vpack.c.bf16 %v1475_v5, %v1471_v4  ;;  %v1515_v2 = vld [vmem:[#allocation7 + $0x678] sm:$0xff]  ;;  %v1508_v5 = vld [vmem:[#allocation7 + $0x640] sm:$0xff] }
 0x1ab   : > { %3091 = vmatpush1.bf16.msra.mxu0 %v3090_v15  ;;  %v1481_v15 = vld [vmem:[#allocation7 + $0x568] sm:$0xff] }
 0x1ac   : > { %3347 = vmatpush1.bf16.msra.mxu1 %v3346_v17  ;;  %3093 = vmatprep.subr.bf16.mxu0 %v3092_v18  ;;  %v1479_v17 = vld [vmem:[#allocation7 + $0x558] sm:$0xff]  ;;  %v3112_v23 = vpack.c.bf16 %v1481_v15, %v1477_v14 }
 0x1ad   : > { %3349 = vmatprep.subr.bf16.mxu1 %v3348_v19  ;;  %v1483_v18 = vld [vmem:[#allocation7 + $0x578] sm:$0xff]  ;;  %v3110_v19 = vpack.c.bf16 %v1472_v9, %v1468_v8  ;;  %v3384_v8 = vpack.c.bf16 %v1515_v2, %v1511_v1  ;;  %v1510_v9 = vld [vmem:[#allocation7 + $0x650] sm:$0xff]  ;;  %v1548_v2 = vld [vmem:[#allocation7 + $0x780] sm:$0xff] }
 0x1ae   : > { %v1523_v14 = vld [vmem:[#allocation7 + $0x6b8] sm:$0xff] }
 0x1c1   : > { %v869_v25 = vpop.f32.mrb[0].mxu0 }
 0x1c2   : > { %v4022_v27 = vpop.f32.mrb[0].mxu1  ;;  %v871_v28 = vpop.f32.mrb[1].mxu0  ;;  %v1300_v38 = vmax.f32 %v869_v25, 0.0  ;;  %v3368_v25 = vpack.c.bf16 %v1483_v18, %v1479_v17  ;;  %v1516_v18 = vld [vmem:[#allocation7 + $0x680] sm:$0xff] }
 0x1c3   : > { %v1301_v32 = vmax.f32 %v871_v28, 0.0  ;;  %v1013_v33 = vpop.f32.mrb[1].mxu1  ;;  %v1482_v28 = vld [vmem:[#allocation7 + $0x570] sm:$0xff] }
 0x1c4   : > { %v1303_v47 = vmax.f32 %v1013_v33, 0.0  ;;  %v3114_v33 = vpack.c.bf16 %v1480_v22, %v1476_v21  ;;  %v3388_v21 = vpack.c.bf16 %v1523_v14, %v1519_v13  ;;  %v1518_v22 = vld [vmem:[#allocation7 + $0x690] sm:$0xff]  ;;  %v1556_v14 = vld [vmem:[#allocation7 + $0x7c0] sm:$0xff] }
 0x1c5   : > { %1884 = vmatprep.mubr.f32.mxu0 %v1301_v32  ;;  %2168 = vmatprep.mubr.f32.mxu1 %v1301_v32  ;;  %v1491_v32 = vld [vmem:[#allocation7 + $0x5b8] sm:$0xff] }
 0x1c6   : > { %1885 = vmatmul.mubr.f32.vlgmr.msra.gmra.mrb[4].mxu0 %v1300_v38  ;;  %2169 = vmatmul.mubr.f32.vlgmr.msra.gmra.mrb[4].mxu1 %v1300_v38  ;;  %v3372_v38 = vpack.c.bf16 %v1491_v32, %v1487_v31  ;;  %v1524_v32 = vld [vmem:[#allocation7 + $0x6c0] sm:$0xff] }
 0x1c7   : > { %3095 = vmatpush1.bf16.msra.mxu0 %v3094_v34  ;;  %3351 = vmatpush1.bf16.msra.mxu1 %v3350_v35  ;;  %v3370_v34 = vpack.c.bf16 %v1482_v28, %v1478_v26  ;;  %v1484_v35 = vld [vmem:[#allocation7 + $0x580] sm:$0xff]  ;;  %v1529_v26 = vld [vmem:[#allocation7 + $0x6e8] sm:$0xff]  ;;  %v1527_v28 = vld [vmem:[#allocation7 + $0x6d8] sm:$0xff] }
 0x1c8   : > { %1955 = vmatprep.mubr.f32.mxu0 %v1303_v47  ;;  %2239 = vmatprep.mubr.f32.mxu1 %v1303_v47  ;;  %v3118_v45 = vpack.c.bf16 %v1488_v36, %v1484_v35  ;;  %v1492_v47 = vld [vmem:[#allocation7 + $0x5c0] sm:$0xff]  ;;  %v3392_v35 = vpack.c.bf16 %v1531_v29, %v1527_v28  ;;  %v1526_v36 = vld [vmem:[#allocation7 + $0x6d0] sm:$0xff] }
 0x1c9   : > { %3097 = vmatprep.subr.bf16.mxu0 %v3096_v42  ;;  %3353 = vmatprep.subr.bf16.mxu1 %v3352_v43  ;;  %v1497_v42 = vld [vmem:[#allocation7 + $0x5e8] sm:$0xff]  ;;  %v1495_v43 = vld [vmem:[#allocation7 + $0x5d8] sm:$0xff]  ;;  %v1564_v29 = vld [vmem:[#allocation7 + $0x800] sm:$0xff] }
 0x1ca   : > { %v3376_v50 = vpack.c.bf16 %v1499_v44, %v1495_v43  ;;  %v1532_v44 = vld [vmem:[#allocation7 + $0x700] sm:$0xff] }
 0x1cb   : > { %3099 = vmatpush1.bf16.msra.mxu0 %v3098_v48  ;;  %3355 = vmatpush1.bf16.msra.mxu1 %v3354_v49  ;;  %v1496_v48 = vld [vmem:[#allocation7 + $0x5e0] sm:$0xff]  ;;  %v3120_v49 = vpack.c.bf16 %v1497_v42, %v1493_v41  ;;  %v1539_v41 = vld [vmem:[#allocation7 + $0x738] sm:$0xff] }
 0x1cc   : > { %3101 = vmatprep.subr.bf16.mxu0 %v3100_v52  ;;  %3357 = vmatprep.subr.bf16.mxu1 %v3356_v53  ;;  %v1498_v52 = vld [vmem:[#allocation7 + $0x5f0] sm:$0xff]  ;;  %v1501_v53 = vld [vmem:[#allocation7 + $0x608] sm:$0xff]  ;;  %v3122_v57 = vpack.c.bf16 %v1496_v48, %v1492_v47  ;;  %v3396_v47 = vpack.c.bf16 %v1539_v41, %v1535_v40  ;;  %v1572_v41 = vld [vmem:[#allocation7 + $0x840] sm:$0xff] }
 0x1cd   : > { %v3378_v58 = vpack.c.bf16 %v1498_v52, %v1494_v51  ;;  %v1534_v48 = vld [vmem:[#allocation7 + $0x710] sm:$0xff]  ;;  %v1545_v51 = vld [vmem:[#allocation7 + $0x768] sm:$0xff]  ;;  %v1543_v52 = vld [vmem:[#allocation7 + $0x758] sm:$0xff] }
 0x1cf   : > { %3103 = vmatpush1.bf16.msra.mxu0 %v3102_v60  ;;  %3359 = vmatpush1.bf16.msra.mxu1 %v3358_v16  ;;  %v1504_v60 = vld [vmem:[#allocation7 + $0x620] sm:$0xff]  ;;  %v3124_v16 = vpack.c.bf16 %v1505_v54, %v1501_v53  ;;  %v1547_v53 = vld [vmem:[#allocation7 + $0x778] sm:$0xff] }
 0x1d0   : > { %3105 = vmatprep.subr.bf16.mxu0 %v3104_v63  ;;  %3361 = vmatprep.subr.bf16.mxu1 %v3360_v24  ;;  %v1506_v63 = vld [vmem:[#allocation7 + $0x630] sm:$0xff]  ;;  %v1509_v24 = vld [vmem:[#allocation7 + $0x648] sm:$0xff]  ;;  %v3126_v3 = vpack.c.bf16 %v1504_v60, %v1500_v59  ;;  %v3400_v59 = vpack.c.bf16 %v1547_v53, %v1543_v52 }
 0x1d1   : > { %v3382_v4 = vpack.c.bf16 %v1506_v63, %v1502_v62  ;;  %v1542_v60 = vld [vmem:[#allocation7 + $0x750] sm:$0xff]  ;;  %v1553_v62 = vld [vmem:[#allocation7 + $0x7a8] sm:$0xff]  ;;  %v1551_v63 = vld [vmem:[#allocation7 + $0x798] sm:$0xff] }
 0x1d3   : > { %3107 = vmatpush1.bf16.msra.mxu0 %v3106_v6  ;;  %3363 = vmatpush1.bf16.msra.mxu1 %v3362_v7  ;;  %v1512_v6 = vld [vmem:[#allocation7 + $0x660] sm:$0xff]  ;;  %v3128_v7 = vpack.c.bf16 %v1513_v0, %v1509_v24  ;;  %v1555_v24 = vld [vmem:[#allocation7 + $0x7b8] sm:$0xff] }
 0x1d4   : > { %3109 = vmatprep.subr.bf16.mxu0 %v3108_v10  ;;  %3365 = vmatprep.subr.bf16.mxu1 %v3364_v11  ;;  %v1514_v10 = vld [vmem:[#allocation7 + $0x670] sm:$0xff]  ;;  %v1517_v11 = vld [vmem:[#allocation7 + $0x688] sm:$0xff]  ;;  %v3130_v15 = vpack.c.bf16 %v1512_v6, %v1508_v5  ;;  %v3404_v5 = vpack.c.bf16 %v1555_v24, %v1551_v63  ;;  %v1588_v24 = vld [vmem:[#allocation7 + $0x8c0] sm:$0xff] }
 0x1d5   : > { %v3386_v17 = vpack.c.bf16 %v1514_v10, %v1510_v9  ;;  %v1550_v6 = vld [vmem:[#allocation7 + $0x790] sm:$0xff]  ;;  %v1561_v9 = vld [vmem:[#allocation7 + $0x7e8] sm:$0xff]  ;;  %v1559_v10 = vld [vmem:[#allocation7 + $0x7d8] sm:$0xff] }
 0x1d7   : > { %3111 = vmatpush1.bf16.msra.mxu0 %v3110_v19  ;;  %3367 = vmatpush1.bf16.msra.mxu1 %v3366_v20  ;;  %v1520_v19 = vld [vmem:[#allocation7 + $0x6a0] sm:$0xff]  ;;  %v3132_v20 = vpack.c.bf16 %v1521_v12, %v1517_v11  ;;  %v1563_v11 = vld [vmem:[#allocation7 + $0x7f8] sm:$0xff] }
 0x1d8   : > { %3113 = vmatprep.subr.bf16.mxu0 %v3112_v23  ;;  %3369 = vmatprep.subr.bf16.mxu1 %v3368_v25  ;;  %v1522_v23 = vld [vmem:[#allocation7 + $0x6b0] sm:$0xff]  ;;  %v1525_v25 = vld [vmem:[#allocation7 + $0x6c8] sm:$0xff]  ;;  %v3134_v30 = vpack.c.bf16 %v1520_v19, %v1516_v18  ;;  %v3408_v18 = vpack.c.bf16 %v1563_v11, %v1559_v10  ;;  %v1596_v11 = vld [vmem:[#allocation7 + $0x900] sm:$0xff] }
 0x1d9   : > { %v3390_v31 = vpack.c.bf16 %v1522_v23, %v1518_v22  ;;  %v1558_v19 = vld [vmem:[#allocation7 + $0x7d0] sm:$0xff]  ;;  %v1569_v22 = vld [vmem:[#allocation7 + $0x828] sm:$0xff]  ;;  %v1567_v23 = vld [vmem:[#allocation7 + $0x818] sm:$0xff] }
 0x1db   : > { %3115 = vmatpush1.bf16.msra.mxu0 %v3114_v33  ;;  %3371 = vmatpush1.bf16.msra.mxu1 %v3370_v34  ;;  %v1528_v33 = vld [vmem:[#allocation7 + $0x6e0] sm:$0xff]  ;;  %v3136_v34 = vpack.c.bf16 %v1529_v26, %v1525_v25  ;;  %v1571_v25 = vld [vmem:[#allocation7 + $0x838] sm:$0xff] }
 0x1dc   : > { %3117 = vmatprep.subr.bf16.mxu0 %v3116_v37  ;;  %3373 = vmatprep.subr.bf16.mxu1 %v3372_v38  ;;  %v1530_v37 = vld [vmem:[#allocation7 + $0x6f0] sm:$0xff]  ;;  %v1533_v38 = vld [vmem:[#allocation7 + $0x708] sm:$0xff]  ;;  %v3138_v42 = vpack.c.bf16 %v1528_v33, %v1524_v32  ;;  %v3412_v32 = vpack.c.bf16 %v1571_v25, %v1567_v23  ;;  %v1604_v25 = vld [vmem:[#allocation7 + $0x940] sm:$0xff] }
 0x1dd   : > { %v3394_v43 = vpack.c.bf16 %v1530_v37, %v1526_v36  ;;  %v1566_v33 = vld [vmem:[#allocation7 + $0x810] sm:$0xff]  ;;  %v1577_v36 = vld [vmem:[#allocation7 + $0x868] sm:$0xff]  ;;  %v1575_v37 = vld [vmem:[#allocation7 + $0x858] sm:$0xff] }
 0x1df   : > { %3119 = vmatpush1.bf16.msra.mxu0 %v3118_v45  ;;  %3375 = vmatpush1.bf16.msra.mxu1 %v3374_v46  ;;  %v1536_v45 = vld [vmem:[#allocation7 + $0x720] sm:$0xff]  ;;  %v3140_v46 = vpack.c.bf16 %v1537_v39, %v1533_v38  ;;  %v1579_v38 = vld [vmem:[#allocation7 + $0x878] sm:$0xff] }
 0x1e0   : > { %3121 = vmatprep.subr.bf16.mxu0 %v3120_v49  ;;  %3377 = vmatprep.subr.bf16.mxu1 %v3376_v50  ;;  %v1538_v49 = vld [vmem:[#allocation7 + $0x730] sm:$0xff]  ;;  %v1541_v50 = vld [vmem:[#allocation7 + $0x748] sm:$0xff]  ;;  %v3142_v54 = vpack.c.bf16 %v1536_v45, %v1532_v44  ;;  %v3416_v45 = vpack.c.bf16 %v1579_v38, %v1575_v37  ;;  %v1612_v38 = vld [vmem:[#allocation7 + $0x980] sm:$0xff] }
 0x1e1   : > { %v3398_v55 = vpack.c.bf16 %v1538_v49, %v1534_v48  ;;  %v1581_v48 = vld [vmem:[#allocation7 + $0x888] sm:$0xff] }
 0x1e2   : > { %v1585_v49 = vld [vmem:[#allocation7 + $0x8a8] sm:$0xff] }
 0x1e3   : > { %3123 = vmatpush1.bf16.msra.mxu0 %v3122_v57  ;;  %3379 = vmatpush1.bf16.msra.mxu1 %v3378_v58  ;;  %v1544_v57 = vld [vmem:[#allocation7 + $0x760] sm:$0xff]  ;;  %v3144_v58 = vpack.c.bf16 %v1545_v51, %v1541_v50  ;;  %v1583_v50 = vld [vmem:[#allocation7 + $0x898] sm:$0xff] }
 0x1e4   : > { %3125 = vmatprep.subr.bf16.mxu0 %v3124_v16  ;;  %3381 = vmatprep.subr.bf16.mxu1 %v3380_v61  ;;  %v1546_v16 = vld [vmem:[#allocation7 + $0x770] sm:$0xff]  ;;  %v1549_v61 = vld [vmem:[#allocation7 + $0x788] sm:$0xff]  ;;  %v3146_v0 = vpack.c.bf16 %v1544_v57, %v1540_v56  ;;  %v1587_v51 = vld [vmem:[#allocation7 + $0x8b8] sm:$0xff] }
 0x1e5   : > { %v3402_v1 = vpack.c.bf16 %v1546_v16, %v1542_v60  ;;  %v3420_v56 = vpack.c.bf16 %v1587_v51, %v1583_v50  ;;  %v1582_v57 = vld [vmem:[#allocation7 + $0x890] sm:$0xff]  ;;  %v1593_v60 = vld [vmem:[#allocation7 + $0x8e8] sm:$0xff]  ;;  %v1591_v16 = vld [vmem:[#allocation7 + $0x8d8] sm:$0xff] }
 0x1e6   : > { %v1620_v50 = vld [vmem:[#allocation7 + $0x9c0] sm:$0xff] }
 0x1e7   : > { %3127 = vmatpush1.bf16.msra.mxu0 %v3126_v3  ;;  %3383 = vmatpush1.bf16.msra.mxu1 %v3382_v4  ;;  %v1552_v3 = vld [vmem:[#allocation7 + $0x7a0] sm:$0xff]  ;;  %v3148_v4 = vpack.c.bf16 %v1553_v62, %v1549_v61  ;;  %v1595_v61 = vld [vmem:[#allocation7 + $0x8f8] sm:$0xff] }
 0x1e8   : > { %3129 = vmatprep.subr.bf16.mxu0 %v3128_v7  ;;  %3385 = vmatprep.subr.bf16.mxu1 %v3384_v8  ;;  %v1554_v7 = vld [vmem:[#allocation7 + $0x7b0] sm:$0xff]  ;;  %v1557_v8 = vld [vmem:[#allocation7 + $0x7c8] sm:$0xff]  ;;  %v3150_v12 = vpack.c.bf16 %v1552_v3, %v1548_v2  ;;  %v3424_v2 = vpack.c.bf16 %v1595_v61, %v1591_v16  ;;  %v1624_v51 = vld [vmem:[#allocation7 + $0x9e0] sm:$0xff] }
 0x1e9   : > { %v3406_v13 = vpack.c.bf16 %v1554_v7, %v1550_v6  ;;  %v1590_v3 = vld [vmem:[#allocation7 + $0x8d0] sm:$0xff]  ;;  %v1601_v6 = vld [vmem:[#allocation7 + $0x928] sm:$0xff]  ;;  %v1599_v7 = vld [vmem:[#allocation7 + $0x918] sm:$0xff] }
 0x1ea   : > { %v1628_v16 = vld [vmem:[#allocation7 + $0xa00] sm:$0xff] }
 0x1eb   : > { %3131 = vmatpush1.bf16.msra.mxu0 %v3130_v15  ;;  %3387 = vmatpush1.bf16.msra.mxu1 %v3386_v17  ;;  %v1560_v15 = vld [vmem:[#allocation7 + $0x7e0] sm:$0xff]  ;;  %v3152_v17 = vpack.c.bf16 %v1561_v9, %v1557_v8  ;;  %v1603_v8 = vld [vmem:[#allocation7 + $0x938] sm:$0xff] }
 0x1ec   : > { %3133 = vmatprep.subr.bf16.mxu0 %v3132_v20  ;;  %3389 = vmatprep.subr.bf16.mxu1 %v3388_v21  ;;  %v1562_v20 = vld [vmem:[#allocation7 + $0x7f0] sm:$0xff]  ;;  %v1565_v21 = vld [vmem:[#allocation7 + $0x808] sm:$0xff]  ;;  %v3154_v26 = vpack.c.bf16 %v1560_v15, %v1556_v14  ;;  %v3428_v14 = vpack.c.bf16 %v1603_v8, %v1599_v7  ;;  %v1632_v61 = vld [vmem:[#allocation7 + $0xa20] sm:$0xff] }
 0x1ed   : > { %v3410_v28 = vpack.c.bf16 %v1562_v20, %v1558_v19  ;;  %v1598_v15 = vld [vmem:[#allocation7 + $0x910] sm:$0xff]  ;;  %v1609_v19 = vld [vmem:[#allocation7 + $0x968] sm:$0xff]  ;;  %v1607_v20 = vld [vmem:[#allocation7 + $0x958] sm:$0xff] }
 0x1ee   : > { %v1636_v7 = vld [vmem:[#allocation7 + $0xa40] sm:$0xff] }
 0x1ef   : > { %3135 = vmatpush1.bf16.msra.mxu0 %v3134_v30  ;;  %3391 = vmatpush1.bf16.msra.mxu1 %v3390_v31  ;;  %v1568_v30 = vld [vmem:[#allocation7 + $0x820] sm:$0xff]  ;;  %v3156_v31 = vpack.c.bf16 %v1569_v22, %v1565_v21  ;;  %v1611_v21 = vld [vmem:[#allocation7 + $0x978] sm:$0xff] }
 0x1f0   : > { %3137 = vmatprep.subr.bf16.mxu0 %v3136_v34  ;;  %3393 = vmatprep.subr.bf16.mxu1 %v3392_v35  ;;  %v1570_v34 = vld [vmem:[#allocation7 + $0x830] sm:$0xff]  ;;  %v1573_v35 = vld [vmem:[#allocation7 + $0x848] sm:$0xff]  ;;  %v3158_v39 = vpack.c.bf16 %v1568_v30, %v1564_v29  ;;  %v3432_v29 = vpack.c.bf16 %v1611_v21, %v1607_v20  ;;  %v1640_v8 = vld [vmem:[#allocation7 + $0xa60] sm:$0xff] }
 0x1f1   : > { %v3414_v40 = vpack.c.bf16 %v1570_v34, %v1566_v33  ;;  %v3160_v44 = vpack.c.bf16 %v1577_v36, %v1573_v35  ;;  %v1606_v30 = vld [vmem:[#allocation7 + $0x950] sm:$0xff]  ;;  %v1617_v33 = vld [vmem:[#allocation7 + $0x9a8] sm:$0xff]  ;;  %v1615_v34 = vld [vmem:[#allocation7 + $0x998] sm:$0xff] }
 0x1f2   : > { %v1619_v35 = vld [vmem:[#allocation7 + $0x9b8] sm:$0xff]  ;;  %v1644_v20 = vld [vmem:[#allocation7 + $0xa80] sm:$0xff] }
 0x1f3   : > { %3139 = vmatpush1.bf16.msra.mxu0 %v3138_v42  ;;  %3395 = vmatpush1.bf16.msra.mxu1 %v3394_v43  ;;  %v1576_v42 = vld [vmem:[#allocation7 + $0x860] sm:$0xff]  ;;  %v1302_v43 = vmax.f32 %v4022_v27, 0.0  ;;  %v3164_v27 = vpack.c.bf16 %v1585_v49, %v1581_v48 }
 0x1f4   : > { %3141 = vmatprep.subr.bf16.mxu0 %v3140_v46  ;;  %3397 = vmatprep.subr.bf16.mxu1 %v3396_v47  ;;  %v1574_v46 = vld [vmem:[#allocation7 + $0x850] sm:$0xff]  ;;  %v3162_v52 = vpack.c.bf16 %v1576_v42, %v1572_v41  ;;  %v3436_v41 = vpack.c.bf16 %v1619_v35, %v1615_v34  ;;  %v1648_v21 = vld [vmem:[#allocation7 + $0xaa0] sm:$0xff] }
 0x1f5   : > { %v1578_v47 = vld [vmem:[#allocation7 + $0x870] sm:$0xff]  ;;  %v1652_v34 = vld [vmem:[#allocation7 + $0xac0] sm:$0xff] }
 0x1f6   : > { %v3418_v53 = vpack.c.bf16 %v1578_v47, %v1574_v46  ;;  %v1614_v42 = vld [vmem:[#allocation7 + $0x990] sm:$0xff]  ;;  %v1623_v46 = vld [vmem:[#allocation7 + $0x9d8] sm:$0xff]  ;;  %v1656_v35 = vld [vmem:[#allocation7 + $0xae0] sm:$0xff] }
 0x1f7   : > { %3143 = vmatpush1.bf16.msra.mxu0 %v3142_v54  ;;  %3399 = vmatpush1.bf16.msra.mxu1 %v3398_v55  ;;  %v1580_v54 = vld [vmem:[#allocation7 + $0x880] sm:$0xff]  ;;  %v1627_v47 = vld [vmem:[#allocation7 + $0x9f8] sm:$0xff] }
 0x1f8   : > { %3145 = vmatprep.subr.bf16.mxu0 %v3144_v58  ;;  %3401 = vmatprep.subr.bf16.mxu1 %v3400_v59  ;;  %v1584_v55 = vld [vmem:[#allocation7 + $0x8a0] sm:$0xff]  ;;  %v1586_v58 = vld [vmem:[#allocation7 + $0x8b0] sm:$0xff]  ;;  %v1589_v59 = vld [vmem:[#allocation7 + $0x8c8] sm:$0xff] }
 0x1f9   : > { %v3166_v62 = vpack.c.bf16 %v1584_v55, %v1580_v54  ;;  %v3422_v63 = vpack.c.bf16 %v1586_v58, %v1582_v57  ;;  %v1622_v54 = vld [vmem:[#allocation7 + $0x9d0] sm:$0xff]  ;;  %v1631_v57 = vld [vmem:[#allocation7 + $0xa18] sm:$0xff] }
 0x1fa   : > { %v1626_v55 = vld [vmem:[#allocation7 + $0x9f0] sm:$0xff]  ;;  %v1635_v58 = vld [vmem:[#allocation7 + $0xa38] sm:$0xff] }
 0x1fb   : > { %3147 = vmatpush1.bf16.msra.mxu0 %v3146_v0  ;;  %3403 = vmatpush1.bf16.msra.mxu1 %v3402_v1  ;;  %v1592_v0 = vld [vmem:[#allocation7 + $0x8e0] sm:$0xff]  ;;  %v3168_v1 = vpack.c.bf16 %v1593_v60, %v1589_v59  ;;  %v3186_v59 = vpack.c.bf16 %v1624_v51, %v1620_v50  ;;  %v3442_v60 = vpack.c.bf16 %v1626_v55, %v1622_v54  ;;  %v1662_v50 = vld [vmem:[#allocation7 + $0xb10] sm:$0xff]  ;;  %v1671_v54 = vld [vmem:[#allocation7 + $0xb58] sm:$0xff] }
 0x1fc   : > { %3149 = vmatprep.subr.bf16.mxu0 %v3148_v4  ;;  %3405 = vmatprep.subr.bf16.mxu1 %v3404_v5  ;;  %v1594_v4 = vld [vmem:[#allocation7 + $0x8f0] sm:$0xff]  ;;  %v1597_v5 = vld [vmem:[#allocation7 + $0x908] sm:$0xff]  ;;  %v3170_v9 = vpack.c.bf16 %v1592_v0, %v1588_v24  ;;  %v1675_v55 = vld [vmem:[#allocation7 + $0xb78] sm:$0xff] }
 0x1fd   : > { %v3426_v10 = vpack.c.bf16 %v1594_v4, %v1590_v3  ;;  %v1630_v24 = vld [vmem:[#allocation7 + $0xa10] sm:$0xff]  ;;  %v1639_v3 = vld [vmem:[#allocation7 + $0xa58] sm:$0xff] }
 0x1fe   : > { %v1634_v0 = vld [vmem:[#allocation7 + $0xa30] sm:$0xff]  ;;  %v1643_v4 = vld [vmem:[#allocation7 + $0xa78] sm:$0xff] }
 0x1ff   : > { %3151 = vmatpush1.bf16.msra.mxu0 %v3150_v12  ;;  %3407 = vmatpush1.bf16.msra.mxu1 %v3406_v13  ;;  %v1600_v12 = vld [vmem:[#allocation7 + $0x920] sm:$0xff]  ;;  %v3172_v13 = vpack.c.bf16 %v1601_v6, %v1597_v5  ;;  %v3190_v5 = vpack.c.bf16 %v1632_v61, %v1628_v16  ;;  %v3446_v6 = vpack.c.bf16 %v1634_v0, %v1630_v24  ;;  %v1666_v51 = vld [vmem:[#allocation7 + $0xb30] sm:$0xff]  ;;  %v1679_v24 = vld [vmem:[#allocation7 + $0xb98] sm:$0xff] }
 0x200   : > { %3153 = vmatprep.subr.bf16.mxu0 %v3152_v17  ;;  %3409 = vmatprep.subr.bf16.mxu1 %v3408_v18  ;;  %v1602_v17 = vld [vmem:[#allocation7 + $0x930] sm:$0xff]  ;;  %v1605_v18 = vld [vmem:[#allocation7 + $0x948] sm:$0xff]  ;;  %v3174_v22 = vpack.c.bf16 %v1600_v12, %v1596_v11  ;;  %v1683_v0 = vld [vmem:[#allocation7 + $0xbb8] sm:$0xff] }
 0x201   : > { %v3430_v23 = vpack.c.bf16 %v1602_v17, %v1598_v15  ;;  %v1638_v11 = vld [vmem:[#allocation7 + $0xa50] sm:$0xff]  ;;  %v1647_v15 = vld [vmem:[#allocation7 + $0xa98] sm:$0xff] }
 0x202   : > { %v1642_v12 = vld [vmem:[#allocation7 + $0xa70] sm:$0xff]  ;;  %v1651_v17 = vld [vmem:[#allocation7 + $0xab8] sm:$0xff] }
 0x203   : > { %3155 = vmatpush1.bf16.msra.mxu0 %v3154_v26  ;;  %3411 = vmatpush1.bf16.msra.mxu1 %v3410_v28  ;;  %v1608_v26 = vld [vmem:[#allocation7 + $0x960] sm:$0xff]  ;;  %v3176_v28 = vpack.c.bf16 %v1609_v19, %v1605_v18  ;;  %v3194_v18 = vpack.c.bf16 %v1640_v8, %v1636_v7  ;;  %v3450_v19 = vpack.c.bf16 %v1642_v12, %v1638_v11  ;;  %v1670_v16 = vld [vmem:[#allocation7 + $0xb50] sm:$0xff]  ;;  %v1687_v11 = vld [vmem:[#allocation7 + $0xbd8] sm:$0xff] }
 0x204   : > { %3157 = vmatprep.subr.bf16.mxu0 %v3156_v31  ;;  %3413 = vmatprep.subr.bf16.mxu1 %v3412_v32  ;;  %v1610_v31 = vld [vmem:[#allocation7 + $0x970] sm:$0xff]  ;;  %v1613_v32 = vld [vmem:[#allocation7 + $0x988] sm:$0xff]  ;;  %v3178_v36 = vpack.c.bf16 %v1608_v26, %v1604_v25  ;;  %v1691_v12 = vld [vmem:[#allocation7 + $0xbf8] sm:$0xff] }
 0x205   : > { %v3434_v37 = vpack.c.bf16 %v1610_v31, %v1606_v30  ;;  %v1646_v25 = vld [vmem:[#allocation7 + $0xa90] sm:$0xff]  ;;  %v1655_v30 = vld [vmem:[#allocation7 + $0xad8] sm:$0xff] }
 0x206   : > { %1956 = vmatmul.mubr.f32.vlgmr.msra.gmra.mrb[4].mxu0 %v1302_v43  ;;  %2240 = vmatmul.mubr.f32.vlgmr.msra.gmra.mrb[4].mxu1 %v1302_v43  ;;  %v1618_v43 = vld [vmem:[#allocation7 + $0x9b0] sm:$0xff]  ;;  %v1659_v31 = vld [vmem:[#allocation7 + $0xaf8] sm:$0xff] }
 0x207   : > { %3159 = vmatpush1.bf16.msra.mxu0 %v3158_v39  ;;  %3415 = vmatpush1.bf16.msra.mxu1 %v3414_v40  ;;  %v1616_v39 = vld [vmem:[#allocation7 + $0x9a0] sm:$0xff]  ;;  %v3180_v40 = vpack.c.bf16 %v1617_v33, %v1613_v32  ;;  %v3438_v49 = vpack.c.bf16 %v1618_v43, %v1614_v42  ;;  %v1650_v26 = vld [vmem:[#allocation7 + $0xab0] sm:$0xff]  ;;  %v3198_v32 = vpack.c.bf16 %v1648_v21, %v1644_v20  ;;  %v1663_v42 = vld [vmem:[#allocation7 + $0xb18] sm:$0xff] }
 0x208   : > { %3161 = vmatprep.subr.bf16.mxu0 %v3160_v44  ;;  %3417 = vmatprep.subr.bf16.mxu1 %v3416_v45  ;;  %v1621_v44 = vld [vmem:[#allocation7 + $0x9c8] sm:$0xff]  ;;  %v3182_v48 = vpack.c.bf16 %v1616_v39, %v1612_v38  ;;  %v3454_v33 = vpack.c.bf16 %v1650_v26, %v1646_v25  ;;  %v1654_v38 = vld [vmem:[#allocation7 + $0xad0] sm:$0xff]  ;;  %v1667_v43 = vld [vmem:[#allocation7 + $0xb38] sm:$0xff] }
 0x209   : > { %v1625_v45 = vld [vmem:[#allocation7 + $0x9e8] sm:$0xff]  ;;  %v1658_v39 = vld [vmem:[#allocation7 + $0xaf0] sm:$0xff]  ;;  %v1695_v25 = vld [vmem:[#allocation7 + $0xc18] sm:$0xff] }
 0x20a   : > { %v1674_v61 = vld [vmem:[#allocation7 + $0xb70] sm:$0xff]  ;;  %v1699_v26 = vld [vmem:[#allocation7 + $0xc38] sm:$0xff] }
 0x20b   : > { %3163 = vmatpush1.bf16.msra.mxu0 %v3162_v52  ;;  %3419 = vmatpush1.bf16.msra.mxu1 %v3418_v53  ;;  %v3184_v52 = vpack.c.bf16 %v1625_v45, %v1621_v44  ;;  %v3440_v53 = vpack.c.bf16 %v1627_v47, %v1623_v46  ;;  %v3202_v44 = vpack.c.bf16 %v1656_v35, %v1652_v34  ;;  %v1660_v46 = vld [vmem:[#allocation7 + $0xb00] sm:$0xff]  ;;  %v1678_v7 = vld [vmem:[#allocation7 + $0xb90] sm:$0xff] }
 0x20c   : > { %3165 = vmatprep.subr.bf16.mxu0 %v3164_v27  ;;  %3421 = vmatprep.subr.bf16.mxu1 %v3420_v56  ;;  %v1629_v27 = vld [vmem:[#allocation7 + $0xa08] sm:$0xff]  ;;  %v3458_v45 = vpack.c.bf16 %v1658_v39, %v1654_v38  ;;  %v1664_v47 = vld [vmem:[#allocation7 + $0xb20] sm:$0xff]  ;;  %v1682_v8 = vld [vmem:[#allocation7 + $0xbb0] sm:$0xff] }
 0x20d   : > { %v1633_v56 = vld [vmem:[#allocation7 + $0xa28] sm:$0xff]  ;;  %v1686_v20 = vld [vmem:[#allocation7 + $0xbd0] sm:$0xff] }
 0x20e   : > { %v1690_v21 = vld [vmem:[#allocation7 + $0xbf0] sm:$0xff] }
 0x20f   : > { %3167 = vmatpush1.bf16.msra.mxu0 %v3166_v62  ;;  %3423 = vmatpush1.bf16.msra.mxu1 %v3422_v63  ;;  %v3188_v62 = vpack.c.bf16 %v1633_v56, %v1629_v27  ;;  %v3444_v63 = vpack.c.bf16 %v1635_v58, %v1631_v57  ;;  %v3206_v27 = vpack.c.bf16 %v1664_v47, %v1660_v46  ;;  %v1668_v57 = vld [vmem:[#allocation7 + $0xb40] sm:$0xff]  ;;  %v1694_v34 = vld [vmem:[#allocation7 + $0xc10] sm:$0xff] }
 0x210   : > { %3169 = vmatprep.subr.bf16.mxu0 %v3168_v1  ;;  %3425 = vmatprep.subr.bf16.mxu1 %v3424_v2  ;;  %v1637_v1 = vld [vmem:[#allocation7 + $0xa48] sm:$0xff]  ;;  %v3462_v56 = vpack.c.bf16 %v1666_v51, %v1662_v50  ;;  %v1672_v58 = vld [vmem:[#allocation7 + $0xb60] sm:$0xff]  ;;  %v1698_v35 = vld [vmem:[#allocation7 + $0xc30] sm:$0xff] }
 0x211   : > { %v1641_v2 = vld [vmem:[#allocation7 + $0xa68] sm:$0xff]  ;;  %v3478_v46 = vpack.c.bf16 %v1698_v35, %v1694_v34  ;;  %v1700_v47 = vld [vmem:[#allocation7 + $0xc40] sm:$0xff]  ;;  %v1702_v50 = vld [vmem:[#allocation7 + $0xc50] sm:$0xff] }
 0x212   : > { %v1706_v51 = vld [vmem:[#allocation7 + $0xc70] sm:$0xff]  ;;  %v1736_v34 = vld [vmem:[#allocation7 + $0xd60] sm:$0xff] }
 0x213   : > { %3171 = vmatpush1.bf16.msra.mxu0 %v3170_v9  ;;  %3427 = vmatpush1.bf16.msra.mxu1 %v3426_v10  ;;  %v3192_v9 = vpack.c.bf16 %v1641_v2, %v1637_v1  ;;  %v3448_v10 = vpack.c.bf16 %v1643_v4, %v1639_v3  ;;  %v3210_v1 = vpack.c.bf16 %v1672_v58, %v1668_v57  ;;  %v1676_v3 = vld [vmem:[#allocation7 + $0xb80] sm:$0xff] }
 0x214   : > { %3173 = vmatprep.subr.bf16.mxu0 %v3172_v13  ;;  %3429 = vmatprep.subr.bf16.mxu1 %v3428_v14  ;;  %v1645_v13 = vld [vmem:[#allocation7 + $0xa88] sm:$0xff]  ;;  %v3466_v2 = vpack.c.bf16 %v1674_v61, %v1670_v16  ;;  %v1680_v4 = vld [vmem:[#allocation7 + $0xba0] sm:$0xff] }
 0x215   : > { %v1649_v14 = vld [vmem:[#allocation7 + $0xaa8] sm:$0xff]  ;;  %v1712_v16 = vld [vmem:[#allocation7 + $0xca0] sm:$0xff] }
 0x217   : > { %3175 = vmatpush1.bf16.msra.mxu0 %v3174_v22  ;;  %3431 = vmatpush1.bf16.msra.mxu1 %v3430_v23  ;;  %v3196_v22 = vpack.c.bf16 %v1649_v14, %v1645_v13  ;;  %v3452_v23 = vpack.c.bf16 %v1651_v17, %v1647_v15  ;;  %v3214_v13 = vpack.c.bf16 %v1680_v4, %v1676_v3  ;;  %v1684_v15 = vld [vmem:[#allocation7 + $0xbc0] sm:$0xff]  ;;  %v1723_v3 = vld [vmem:[#allocation7 + $0xcf8] sm:$0xff] }
 0x218   : > { %3177 = vmatprep.subr.bf16.mxu0 %v3176_v28  ;;  %3433 = vmatprep.subr.bf16.mxu1 %v3432_v29  ;;  %v1653_v28 = vld [vmem:[#allocation7 + $0xac8] sm:$0xff]  ;;  %v3470_v14 = vpack.c.bf16 %v1682_v8, %v1678_v7  ;;  %v1688_v17 = vld [vmem:[#allocation7 + $0xbe0] sm:$0xff] }
 0x219   : > { %v1657_v29 = vld [vmem:[#allocation7 + $0xae8] sm:$0xff]  ;;  %v1720_v7 = vld [vmem:[#allocation7 + $0xce0] sm:$0xff] }
 0x21b   : > { %3179 = vmatpush1.bf16.msra.mxu0 %v3178_v36  ;;  %3435 = vmatpush1.bf16.msra.mxu1 %v3434_v37  ;;  %v3200_v36 = vpack.c.bf16 %v1657_v29, %v1653_v28  ;;  %v3456_v37 = vpack.c.bf16 %v1659_v31, %v1655_v30  ;;  %v3218_v28 = vpack.c.bf16 %v1688_v17, %v1684_v15  ;;  %v1692_v30 = vld [vmem:[#allocation7 + $0xc00] sm:$0xff]  ;;  %v1731_v15 = vld [vmem:[#allocation7 + $0xd38] sm:$0xff] }
 0x21c   : > { %3181 = vmatprep.subr.bf16.mxu0 %v3180_v40  ;;  %3437 = vmatprep.subr.bf16.mxu1 %v3436_v41  ;;  %v1661_v40 = vld [vmem:[#allocation7 + $0xb08] sm:$0xff]  ;;  %v3474_v29 = vpack.c.bf16 %v1690_v21, %v1686_v20  ;;  %v1728_v20 = vld [vmem:[#allocation7 + $0xd20] sm:$0xff] }
 0x21d   : > { %v1665_v41 = vld [vmem:[#allocation7 + $0xb28] sm:$0xff] }
 0x21f   : > { %3183 = vmatpush1.bf16.msra.mxu0 %v3182_v48  ;;  %3439 = vmatpush1.bf16.msra.mxu1 %v3438_v49  ;;  %v3204_v48 = vpack.c.bf16 %v1665_v41, %v1661_v40  ;;  %v3460_v49 = vpack.c.bf16 %v1667_v43, %v1663_v42  ;;  %v1705_v40 = vld [vmem:[#allocation7 + $0xc68] sm:$0xff]  ;;  %v1703_v41 = vld [vmem:[#allocation7 + $0xc58] sm:$0xff] }
 0x220   : > { %3185 = vmatprep.subr.bf16.mxu0 %v3184_v52  ;;  %3441 = vmatprep.subr.bf16.mxu1 %v3440_v53  ;;  %v1669_v52 = vld [vmem:[#allocation7 + $0xb48] sm:$0xff]  ;;  %v1707_v42 = vld [vmem:[#allocation7 + $0xc78] sm:$0xff] }
 0x221   : > { %v1673_v53 = vld [vmem:[#allocation7 + $0xb68] sm:$0xff] }
 0x223   : > { %3187 = vmatpush1.bf16.msra.mxu0 %v3186_v59  ;;  %3443 = vmatpush1.bf16.msra.mxu1 %v3442_v60  ;;  %v3208_v59 = vpack.c.bf16 %v1673_v53, %v1669_v52  ;;  %v3464_v60 = vpack.c.bf16 %v1675_v55, %v1671_v54  ;;  %v1709_v52 = vld [vmem:[#allocation7 + $0xc88] sm:$0xff]  ;;  %v3480_v54 = vpack.c.bf16 %v1707_v42, %v1703_v41  ;;  %v1743_v42 = vld [vmem:[#allocation7 + $0xd98] sm:$0xff] }
 0x224   : > { %3189 = vmatprep.subr.bf16.mxu0 %v3188_v62  ;;  %3445 = vmatprep.subr.bf16.mxu1 %v3444_v63  ;;  %v1677_v62 = vld [vmem:[#allocation7 + $0xb88] sm:$0xff] }
 0x225   : > { %v1681_v63 = vld [vmem:[#allocation7 + $0xba8] sm:$0xff] }
 0x226   : > { %v1713_v55 = vld [vmem:[#allocation7 + $0xca8] sm:$0xff] }
 0x227   : > { %3191 = vmatpush1.bf16.msra.mxu0 %v3190_v5  ;;  %3447 = vmatpush1.bf16.msra.mxu1 %v3446_v6  ;;  %v3212_v5 = vpack.c.bf16 %v1681_v63, %v1677_v62  ;;  %v3468_v6 = vpack.c.bf16 %v1683_v0, %v1679_v24  ;;  %v3228_v61 = vpack.c.bf16 %v1713_v55, %v1709_v52  ;;  %v1710_v63 = vld [vmem:[#allocation7 + $0xc90] sm:$0xff]  ;;  %v1717_v0 = vld [vmem:[#allocation7 + $0xcc8] sm:$0xff]  ;;  %v1755_v55 = vld [vmem:[#allocation7 + $0xdf8] sm:$0xff] }
 0x228   : > { %3193 = vmatprep.subr.bf16.mxu0 %v3192_v9  ;;  %3449 = vmatprep.subr.bf16.mxu1 %v3448_v10  ;;  %v1685_v9 = vld [vmem:[#allocation7 + $0xbc8] sm:$0xff]  ;;  %v1714_v24 = vld [vmem:[#allocation7 + $0xcb0] sm:$0xff] }
 0x229   : > { %v1689_v10 = vld [vmem:[#allocation7 + $0xbe8] sm:$0xff] }
 0x22a   : > { %v1745_v41 = vld [vmem:[#allocation7 + $0xda8] sm:$0xff] }
 0x22b   : > { %3195 = vmatpush1.bf16.msra.mxu0 %v3194_v18  ;;  %3451 = vmatpush1.bf16.msra.mxu1 %v3450_v19  ;;  %v3216_v18 = vpack.c.bf16 %v1689_v10, %v1685_v9  ;;  %v3472_v19 = vpack.c.bf16 %v1691_v12, %v1687_v11  ;;  %v1718_v10 = vld [vmem:[#allocation7 + $0xcd0] sm:$0xff]  ;;  %v1725_v12 = vld [vmem:[#allocation7 + $0xd08] sm:$0xff] }
 0x22c   : > { %3197 = vmatprep.subr.bf16.mxu0 %v3196_v22  ;;  %3453 = vmatprep.subr.bf16.mxu1 %v3452_v23  ;;  %v1693_v22 = vld [vmem:[#allocation7 + $0xc08] sm:$0xff]  ;;  %v1722_v11 = vld [vmem:[#allocation7 + $0xcf0] sm:$0xff] }
 0x22d   : > { %v1697_v23 = vld [vmem:[#allocation7 + $0xc28] sm:$0xff] }
 0x22e   : > { %v3220_v31 = vpack.c.bf16 %v1697_v23, %v1693_v22  ;;  %v1726_v23 = vld [vmem:[#allocation7 + $0xd10] sm:$0xff]  ;;  %v1749_v52 = vld [vmem:[#allocation7 + $0xdc8] sm:$0xff] }
 0x22f   : > { %3199 = vmatpush1.bf16.msra.mxu0 %v3198_v32  ;;  %3455 = vmatpush1.bf16.msra.mxu1 %v3454_v33  ;;  %v3476_v32 = vpack.c.bf16 %v1699_v26, %v1695_v25  ;;  %v1696_v33 = vld [vmem:[#allocation7 + $0xc20] sm:$0xff]  ;;  %v1730_v25 = vld [vmem:[#allocation7 + $0xd30] sm:$0xff]  ;;  %v1733_v26 = vld [vmem:[#allocation7 + $0xd48] sm:$0xff] }
 0x230   : > { %3201 = vmatprep.subr.bf16.mxu0 %v3200_v36  ;;  %3457 = vmatprep.subr.bf16.mxu1 %v3456_v37  ;;  %v1701_v37 = vld [vmem:[#allocation7 + $0xc48] sm:$0xff] }
 0x231   : > { %v3224_v53 = vpack.c.bf16 %v1705_v40, %v1701_v37  ;;  %v1734_v37 = vld [vmem:[#allocation7 + $0xd50] sm:$0xff]  ;;  %v1741_v40 = vld [vmem:[#allocation7 + $0xd88] sm:$0xff] }
 0x233   : > { %3203 = vmatpush1.bf16.msra.mxu0 %v3202_v44  ;;  %3459 = vmatpush1.bf16.msra.mxu1 %v3458_v45  ;;  %v3222_v45 = vpack.c.bf16 %v1696_v33, %v1692_v30  ;;  %v1739_v30 = vld [vmem:[#allocation7 + $0xd78] sm:$0xff]  ;;  %v1732_v33 = vld [vmem:[#allocation7 + $0xd40] sm:$0xff] }
 0x234   : > { %3205 = vmatprep.subr.bf16.mxu0 %v3204_v48  ;;  %3461 = vmatprep.subr.bf16.mxu1 %v3460_v49  ;;  %v1704_v48 = vld [vmem:[#allocation7 + $0xc60] sm:$0xff] }
 0x235   : > { %v3226_v58 = vpack.c.bf16 %v1704_v48, %v1700_v47  ;;  %v1744_v47 = vld [vmem:[#allocation7 + $0xda0] sm:$0xff]  ;;  %v3244_v48 = vpack.c.bf16 %v1745_v41, %v1741_v40  ;;  %v1787_v40 = vld [vmem:[#allocation7 + $0xef8] sm:$0xff] }
 0x237   : > { %3207 = vmatpush1.bf16.msra.mxu0 %v3206_v27  ;;  %3463 = vmatpush1.bf16.msra.mxu1 %v3462_v56  ;;  %v1711_v27 = vld [vmem:[#allocation7 + $0xc98] sm:$0xff] }
 0x238   : > { %3209 = vmatprep.subr.bf16.mxu0 %v3208_v59  ;;  %3465 = vmatprep.subr.bf16.mxu1 %v3464_v60  ;;  %v1715_v56 = vld [vmem:[#allocation7 + $0xcb8] sm:$0xff]  ;;  %v3482_v59 = vpack.c.bf16 %v1706_v51, %v1702_v50  ;;  %v1708_v60 = vld [vmem:[#allocation7 + $0xc80] sm:$0xff]  ;;  %v1742_v50 = vld [vmem:[#allocation7 + $0xd90] sm:$0xff] }
 0x239   : > { %v3484_v62 = vpack.c.bf16 %v1715_v56, %v1711_v27  ;;  %v3230_v4 = vpack.c.bf16 %v1712_v16, %v1708_v60  ;;  %v1746_v51 = vld [vmem:[#allocation7 + $0xdb0] sm:$0xff] }
 0x23a   : > { %v3502_v56 = vpack.c.bf16 %v1746_v51, %v1742_v50  ;;  %v1750_v16 = vld [vmem:[#allocation7 + $0xdd0] sm:$0xff]  ;;  %v1793_v50 = vld [vmem:[#allocation7 + $0xf28] sm:$0xff]  ;;  %v1791_v51 = vld [vmem:[#allocation7 + $0xf18] sm:$0xff] }
 0x23b   : > { %3211 = vmatpush1.bf16.msra.mxu0 %v3210_v1  ;;  %3467 = vmatpush1.bf16.msra.mxu1 %v3466_v2  ;;  %v1721_v1 = vld [vmem:[#allocation7 + $0xce8] sm:$0xff]  ;;  %v1719_v2 = vld [vmem:[#allocation7 + $0xcd8] sm:$0xff] }
 0x23c   : > { %3213 = vmatprep.subr.bf16.mxu0 %v3212_v5  ;;  %3469 = vmatprep.subr.bf16.mxu1 %v3468_v6  ;;  %v3486_v5 = vpack.c.bf16 %v1714_v24, %v1710_v63  ;;  %v1716_v6 = vld [vmem:[#allocation7 + $0xcc0] sm:$0xff]  ;;  %v3232_v8 = vpack.c.bf16 %v1721_v1, %v1717_v0  ;;  %v3488_v9 = vpack.c.bf16 %v1723_v3, %v1719_v2  ;;  %v1761_v63 = vld [vmem:[#allocation7 + $0xe28] sm:$0xff]  ;;  %v1759_v24 = vld [vmem:[#allocation7 + $0xe18] sm:$0xff] }
 0x23d   : > { %v3234_v17 = vpack.c.bf16 %v1720_v7, %v1716_v6  ;;  %v1763_v0 = vld [vmem:[#allocation7 + $0xe38] sm:$0xff]  ;;  %v1756_v3 = vld [vmem:[#allocation7 + $0xe00] sm:$0xff]  ;;  %v1758_v7 = vld [vmem:[#allocation7 + $0xe10] sm:$0xff] }
 0x23e   : > { %v3508_v6 = vpack.c.bf16 %v1763_v0, %v1759_v24  ;;  %v1796_v0 = vld [vmem:[#allocation7 + $0xf40] sm:$0xff] }
 0x23f   : > { %3215 = vmatpush1.bf16.msra.mxu0 %v3214_v13  ;;  %3471 = vmatpush1.bf16.msra.mxu1 %v3470_v14  ;;  %v1729_v13 = vld [vmem:[#allocation7 + $0xd28] sm:$0xff]  ;;  %v1727_v14 = vld [vmem:[#allocation7 + $0xd18] sm:$0xff] }
 0x240   : > { %3217 = vmatprep.subr.bf16.mxu0 %v3216_v18  ;;  %3473 = vmatprep.subr.bf16.mxu1 %v3472_v19  ;;  %v3490_v18 = vpack.c.bf16 %v1722_v11, %v1718_v10  ;;  %v1724_v19 = vld [vmem:[#allocation7 + $0xd00] sm:$0xff]  ;;  %v3236_v21 = vpack.c.bf16 %v1729_v13, %v1725_v12  ;;  %v3492_v22 = vpack.c.bf16 %v1731_v15, %v1727_v14  ;;  %v1769_v10 = vld [vmem:[#allocation7 + $0xe68] sm:$0xff]  ;;  %v1767_v11 = vld [vmem:[#allocation7 + $0xe58] sm:$0xff] }
 0x241   : > { %v1153_v36 = vpop.f32.mrb[2].mxu0  ;;  %v1771_v12 = vld [vmem:[#allocation7 + $0xe78] sm:$0xff]  ;;  %v1764_v15 = vld [vmem:[#allocation7 + $0xe40] sm:$0xff] }
 0x242   : > { %v4025_v38 = vpop.f32.mrb[2].mxu1  ;;  %v1155_v39 = vpop.f32.mrb[3].mxu0  ;;  %v1304_v49 = vmax.f32 %v1153_v36, 0.0 }
 0x243   : > { %v1305_v43 = vmax.f32 %v1155_v39, 0.0  ;;  %v1297_v44 = vpop.f32.mrb[3].mxu1  ;;  %3219 = vmatpush1.bf16.msra.mxu0 %v3218_v28  ;;  %3475 = vmatpush1.bf16.msra.mxu1 %v3474_v29  ;;  %v1737_v28 = vld [vmem:[#allocation7 + $0xd68] sm:$0xff]  ;;  %v1735_v29 = vld [vmem:[#allocation7 + $0xd58] sm:$0xff]  ;;  %v1738_v39 = vld [vmem:[#allocation7 + $0xd70] sm:$0xff] }
 0x244   : > { %3221 = vmatprep.subr.bf16.mxu0 %v3220_v31  ;;  %3477 = vmatprep.subr.bf16.mxu1 %v3476_v32  ;;  %v1307_v57 = vmax.f32 %v1297_v44, 0.0  ;;  %v3238_v31 = vpack.c.bf16 %v1728_v20, %v1724_v19  ;;  %v3494_v32 = vpack.c.bf16 %v1730_v25, %v1726_v23  ;;  %v3240_v35 = vpack.c.bf16 %v1737_v28, %v1733_v26  ;;  %v1766_v20 = vld [vmem:[#allocation7 + $0xe50] sm:$0xff]  ;;  %v1777_v23 = vld [vmem:[#allocation7 + $0xea8] sm:$0xff]  ;;  %v1775_v25 = vld [vmem:[#allocation7 + $0xe98] sm:$0xff] }
 0x245   : > { %2026 = vmatprep.mubr.f32.mxu0 %v1305_v43  ;;  %2310 = vmatprep.mubr.f32.mxu1 %v1305_v43  ;;  %v3496_v36 = vpack.c.bf16 %v1739_v30, %v1735_v29  ;;  %v1747_v43 = vld [vmem:[#allocation7 + $0xdb8] sm:$0xff]  ;;  %v3242_v44 = vpack.c.bf16 %v1736_v34, %v1732_v33  ;;  %v3512_v19 = vpack.c.bf16 %v1771_v12, %v1767_v11  ;;  %v1772_v30 = vld [vmem:[#allocation7 + $0xe80] sm:$0xff]  ;;  %v1774_v34 = vld [vmem:[#allocation7 + $0xe90] sm:$0xff] }
 0x246   : > { %2027 = vmatmul.mubr.f32.vlgmr.msra.gmra.mrb[4].mxu0 %v1304_v49  ;;  %2311 = vmatmul.mubr.f32.vlgmr.msra.gmra.mrb[4].mxu1 %v1304_v49  ;;  %v3500_v49 = vpack.c.bf16 %v1747_v43, %v1743_v42  ;;  %v1779_v26 = vld [vmem:[#allocation7 + $0xeb8] sm:$0xff]  ;;  %v1780_v43 = vld [vmem:[#allocation7 + $0xec0] sm:$0xff] }
 0x247   : > { %3223 = vmatpush1.bf16.msra.mxu0 %v3222_v45  ;;  %3479 = vmatpush1.bf16.msra.mxu1 %v3478_v46  ;;  %v3498_v45 = vpack.c.bf16 %v1738_v39, %v1734_v37  ;;  %v1740_v46 = vld [vmem:[#allocation7 + $0xd80] sm:$0xff]  ;;  %v3516_v33 = vpack.c.bf16 %v1779_v26, %v1775_v25  ;;  %v1785_v37 = vld [vmem:[#allocation7 + $0xee8] sm:$0xff]  ;;  %v1783_v39 = vld [vmem:[#allocation7 + $0xed8] sm:$0xff] }
 0x248   : > { %2097 = vmatprep.mubr.f32.mxu0 %v1307_v57  ;;  %2381 = vmatprep.mubr.f32.mxu1 %v1307_v57  ;;  %v3246_v27 = vpack.c.bf16 %v1744_v47, %v1740_v46  ;;  %v1748_v57 = vld [vmem:[#allocation7 + $0xdc0] sm:$0xff]  ;;  %v3520_v46 = vpack.c.bf16 %v1787_v40, %v1783_v39  ;;  %v1782_v47 = vld [vmem:[#allocation7 + $0xed0] sm:$0xff] }
 0x249   : > { %3225 = vmatprep.subr.bf16.mxu0 %v3224_v53  ;;  %3481 = vmatprep.subr.bf16.mxu1 %v3480_v54  ;;  %v1753_v53 = vld [vmem:[#allocation7 + $0xde8] sm:$0xff]  ;;  %v1751_v54 = vld [vmem:[#allocation7 + $0xdd8] sm:$0xff]  ;;  %v1804_v12 = vld [vmem:[#allocation7 + $0xf80] sm:$0xff] }
 0x24a   : > { %v3504_v60 = vpack.c.bf16 %v1755_v55, %v1751_v54  ;;  %v1788_v55 = vld [vmem:[#allocation7 + $0xf00] sm:$0xff] }
 0x24b   : > { %3227 = vmatpush1.bf16.msra.mxu0 %v3226_v58  ;;  %3483 = vmatpush1.bf16.msra.mxu1 %v3482_v59  ;;  %v1752_v58 = vld [vmem:[#allocation7 + $0xde0] sm:$0xff]  ;;  %v3248_v59 = vpack.c.bf16 %v1753_v53, %v1749_v52  ;;  %v1795_v52 = vld [vmem:[#allocation7 + $0xf38] sm:$0xff] }
 0x24c   : > { %3229 = vmatprep.subr.bf16.mxu0 %v3228_v61  ;;  %3485 = vmatprep.subr.bf16.mxu1 %v3484_v62  ;;  %v1754_v61 = vld [vmem:[#allocation7 + $0xdf0] sm:$0xff]  ;;  %v1757_v62 = vld [vmem:[#allocation7 + $0xe08] sm:$0xff]  ;;  %v3250_v1 = vpack.c.bf16 %v1752_v58, %v1748_v57  ;;  %v3524_v57 = vpack.c.bf16 %v1795_v52, %v1791_v51  ;;  %v1812_v26 = vld [vmem:[#allocation7 + $0xfc0] sm:$0xff] }
 0x24d   : > { %v3506_v2 = vpack.c.bf16 %v1754_v61, %v1750_v16  ;;  %v1790_v58 = vld [vmem:[#allocation7 + $0xf10] sm:$0xff]  ;;  %v1801_v16 = vld [vmem:[#allocation7 + $0xf68] sm:$0xff]  ;;  %v1799_v61 = vld [vmem:[#allocation7 + $0xf58] sm:$0xff] }
 0x24f   : > { %3231 = vmatpush1.bf16.msra.mxu0 %v3230_v4  ;;  %3487 = vmatpush1.bf16.msra.mxu1 %v3486_v5  ;;  %v1760_v4 = vld [vmem:[#allocation7 + $0xe20] sm:$0xff]  ;;  %v3252_v5 = vpack.c.bf16 %v1761_v63, %v1757_v62  ;;  %v1803_v62 = vld [vmem:[#allocation7 + $0xf78] sm:$0xff] }
 0x250   : > { %3233 = vmatprep.subr.bf16.mxu0 %v3232_v8  ;;  %3489 = vmatprep.subr.bf16.mxu1 %v3488_v9  ;;  %v1762_v8 = vld [vmem:[#allocation7 + $0xe30] sm:$0xff]  ;;  %v1765_v9 = vld [vmem:[#allocation7 + $0xe48] sm:$0xff]  ;;  %v3254_v13 = vpack.c.bf16 %v1760_v4, %v1756_v3  ;;  %v3528_v3 = vpack.c.bf16 %v1803_v62, %v1799_v61 }
 0x251   : > { %v3510_v14 = vpack.c.bf16 %v1762_v8, %v1758_v7  ;;  %v1798_v4 = vld [vmem:[#allocation7 + $0xf50] sm:$0xff]  ;;  %v1809_v7 = vld [vmem:[#allocation7 + $0xfa8] sm:$0xff]  ;;  %v1807_v8 = vld [vmem:[#allocation7 + $0xf98] sm:$0xff] }
 0x253   : > { %3235 = vmatpush1.bf16.msra.mxu0 %v3234_v17  ;;  %3491 = vmatpush1.bf16.msra.mxu1 %v3490_v18  ;;  %v1768_v17 = vld [vmem:[#allocation7 + $0xe60] sm:$0xff]  ;;  %v3256_v18 = vpack.c.bf16 %v1769_v10, %v1765_v9  ;;  %v1811_v9 = vld [vmem:[#allocation7 + $0xfb8] sm:$0xff] }
 0x254   : > { %3237 = vmatprep.subr.bf16.mxu0 %v3236_v21  ;;  %3493 = vmatprep.subr.bf16.mxu1 %v3492_v22  ;;  %v1770_v21 = vld [vmem:[#allocation7 + $0xe70] sm:$0xff]  ;;  %v1773_v22 = vld [vmem:[#allocation7 + $0xe88] sm:$0xff]  ;;  %v3258_v28 = vpack.c.bf16 %v1768_v17, %v1764_v15  ;;  %v3532_v15 = vpack.c.bf16 %v1811_v9, %v1807_v8 }
 0x255   : > { %v3514_v29 = vpack.c.bf16 %v1770_v21, %v1766_v20  ;;  %v1806_v17 = vld [vmem:[#allocation7 + $0xf90] sm:$0xff]  ;;  %v1817_v20 = vld [vmem:[#allocation7 + $0xfe8] sm:$0xff]  ;;  %v1815_v21 = vld [vmem:[#allocation7 + $0xfd8] sm:$0xff] }
 0x257   : > { %3239 = vmatpush1.bf16.msra.mxu0 %v3238_v31  ;;  %3495 = vmatpush1.bf16.msra.mxu1 %v3494_v32  ;;  %v1776_v31 = vld [vmem:[#allocation7 + $0xea0] sm:$0xff]  ;;  %v3260_v32 = vpack.c.bf16 %v1777_v23, %v1773_v22  ;;  %v1819_v22 = vld [vmem:[#allocation7 + $0xff8] sm:$0xff] }
 0x258   : > { %3241 = vmatprep.subr.bf16.mxu0 %v3240_v35  ;;  %3497 = vmatprep.subr.bf16.mxu1 %v3496_v36  ;;  %v1778_v35 = vld [vmem:[#allocation7 + $0xeb0] sm:$0xff]  ;;  %v1781_v36 = vld [vmem:[#allocation7 + $0xec8] sm:$0xff]  ;;  %v3262_v41 = vpack.c.bf16 %v1776_v31, %v1772_v30  ;;  %v1816_v30 = vld [vmem:[#allocation7 + $0xfe0] sm:$0xff] }
 0x259   : > { %v3518_v42 = vpack.c.bf16 %v1778_v35, %v1774_v34  ;;  %v1814_v31 = vld [vmem:[#allocation7 + $0xfd0] sm:$0xff]  ;;  %v1306_v35 = vmax.f32 %v4025_v38, 0.0 }
 0x25b   : > { %3243 = vmatpush1.bf16.msra.mxu0 %v3242_v44  ;;  %3499 = vmatpush1.bf16.msra.mxu1 %v3498_v45  ;;  %v1784_v44 = vld [vmem:[#allocation7 + $0xee0] sm:$0xff]  ;;  %v3264_v45 = vpack.c.bf16 %v1785_v37, %v1781_v36 }
 0x25c   : > { %3245 = vmatprep.subr.bf16.mxu0 %v3244_v48  ;;  %3501 = vmatprep.subr.bf16.mxu1 %v3500_v49  ;;  %v1786_v48 = vld [vmem:[#allocation7 + $0xef0] sm:$0xff]  ;;  %v1789_v49 = vld [vmem:[#allocation7 + $0xf08] sm:$0xff]  ;;  %v3266_v53 = vpack.c.bf16 %v1784_v44, %v1780_v43 }
 0x25d   : > { %v3522_v54 = vpack.c.bf16 %v1786_v48, %v1782_v47 }
 0x25f   : > { %3247 = vmatpush1.bf16.msra.mxu0 %v3246_v27  ;;  %3503 = vmatpush1.bf16.msra.mxu1 %v3502_v56  ;;  %v1792_v27 = vld [vmem:[#allocation7 + $0xf20] sm:$0xff]  ;;  %v3268_v56 = vpack.c.bf16 %v1793_v50, %v1789_v49 }
 0x260   : > { %3249 = vmatprep.subr.bf16.mxu0 %v3248_v59  ;;  %3505 = vmatprep.subr.bf16.mxu1 %v3504_v60  ;;  %v1794_v59 = vld [vmem:[#allocation7 + $0xf30] sm:$0xff]  ;;  %v1797_v60 = vld [vmem:[#allocation7 + $0xf48] sm:$0xff]  ;;  %v3270_v63 = vpack.c.bf16 %v1792_v27, %v1788_v55 }
 0x261   : > { %v3526_v24 = vpack.c.bf16 %v1794_v59, %v1790_v58 }
 0x263   : > { %3251 = vmatpush1.bf16.msra.mxu0 %v3250_v1  ;;  %3507 = vmatpush1.bf16.msra.mxu1 %v3506_v2  ;;  %v1800_v1 = vld [vmem:[#allocation7 + $0xf60] sm:$0xff]  ;;  %v3272_v2 = vpack.c.bf16 %v1801_v16, %v1797_v60 }
 0x264   : > { %3253 = vmatprep.subr.bf16.mxu0 %v3252_v5  ;;  %3509 = vmatprep.subr.bf16.mxu1 %v3508_v6  ;;  %v1802_v5 = vld [vmem:[#allocation7 + $0xf70] sm:$0xff]  ;;  %v1805_v6 = vld [vmem:[#allocation7 + $0xf88] sm:$0xff]  ;;  %v3274_v10 = vpack.c.bf16 %v1800_v1, %v1796_v0 }
 0x265   : > { %v3530_v11 = vpack.c.bf16 %v1802_v5, %v1798_v4 }
 0x267   : > { %3255 = vmatpush1.bf16.msra.mxu0 %v3254_v13  ;;  %3511 = vmatpush1.bf16.msra.mxu1 %v3510_v14  ;;  %v1808_v13 = vld [vmem:[#allocation7 + $0xfa0] sm:$0xff]  ;;  %v3276_v14 = vpack.c.bf16 %v1809_v7, %v1805_v6 }
 0x268   : > { %3257 = vmatprep.subr.bf16.mxu0 %v3256_v18  ;;  %3513 = vmatprep.subr.bf16.mxu1 %v3512_v19  ;;  %v1810_v18 = vld [vmem:[#allocation7 + $0xfb0] sm:$0xff]  ;;  %v1813_v19 = vld [vmem:[#allocation7 + $0xfc8] sm:$0xff]  ;;  %v3278_v23 = vpack.c.bf16 %v1808_v13, %v1804_v12 }
 0x269   : > { %v3534_v25 = vpack.c.bf16 %v1810_v18, %v1806_v17 }
 0x26b   : > { %3259 = vmatpush1.bf16.msra.mxu0 %v3258_v28  ;;  %3515 = vmatpush1.bf16.msra.mxu1 %v3514_v29  ;;  %v3280_v28 = vpack.c.bf16 %v1817_v20, %v1813_v19  ;;  %v3536_v29 = vpack.c.bf16 %v1819_v22, %v1815_v21 }
 0x26c   : > { %3261 = vmatprep.subr.bf16.mxu0 %v3260_v32  ;;  %3517 = vmatprep.subr.bf16.mxu1 %v3516_v33  ;;  %v1818_v32 = vld [vmem:[#allocation7 + $0xff0] sm:$0xff]  ;;  %v3282_v33 = vpack.c.bf16 %v1816_v30, %v1812_v26 }
 0x26d   : > { %v3538_v34 = vpack.c.bf16 %v1818_v32, %v1814_v31 }
 0x26f   : > { %3263 = vmatpush1.bf16.msra.mxu0 %v3262_v41  ;;  %3519 = vmatpush1.bf16.msra.mxu1 %v3518_v42 }
 0x270   : > { %3265 = vmatprep.subr.bf16.mxu0 %v3264_v45  ;;  %3521 = vmatprep.subr.bf16.mxu1 %v3520_v46 }
 0x273   : > { %3267 = vmatpush1.bf16.msra.mxu0 %v3266_v53  ;;  %3523 = vmatpush1.bf16.msra.mxu1 %v3522_v54 }
 0x274   : > { %3269 = vmatprep.subr.bf16.mxu0 %v3268_v56  ;;  %3525 = vmatprep.subr.bf16.mxu1 %v3524_v57 }
 0x277   : > { %3271 = vmatpush1.bf16.msra.mxu0 %v3270_v63  ;;  %3527 = vmatpush1.bf16.msra.mxu1 %v3526_v24 }
 0x278   : > { %3273 = vmatprep.subr.bf16.mxu0 %v3272_v2  ;;  %3529 = vmatprep.subr.bf16.mxu1 %v3528_v3 }
 0x27b   : > { %3275 = vmatpush1.bf16.msra.mxu0 %v3274_v10  ;;  %3531 = vmatpush1.bf16.msra.mxu1 %v3530_v11 }
 0x27c   : > { %3277 = vmatprep.subr.bf16.mxu0 %v3276_v14  ;;  %3533 = vmatprep.subr.bf16.mxu1 %v3532_v15 }
 0x27f   : > { %3279 = vmatpush1.bf16.msra.mxu0 %v3278_v23  ;;  %3535 = vmatpush1.bf16.msra.mxu1 %v3534_v25 }
 0x280   : > { %3281 = vmatprep.subr.bf16.mxu0 %v3280_v28  ;;  %3537 = vmatprep.subr.bf16.mxu1 %v3536_v29 }
 0x283   : > { %3283 = vmatpush1.bf16.msra.mxu0 %v3282_v33  ;;  %3539 = vmatpush1.bf16.msra.mxu1 %v3538_v34 }
 0x286   : > { %2098 = vmatmul.mubr.f32.vlgmr.msra.gmra.mrb[4].mxu0 %v1306_v35  ;;  %2382 = vmatmul.mubr.f32.vlgmr.msra.gmra.mrb[4].mxu1 %v1306_v35 }
 0x359   : > { %v2099_v36 = vpop.f32.mrb[4].mxu0  ;;  %v2383_v37 = vpop.f32.mrb[4].mxu1 }
 0x35a   : > { %2388 = vst [vmem:[%s215_s18] sm:$0xff] %v2099_v36  ;;  %2390 = vst [vmem:[%s215_s18 + $0x10] sm:$0xff] %v2383_v37  ;;  %v2101_v38 = vpop.f32.mrb[5].mxu0  ;;  %v2385_v39 = vpop.f32.mrb[5].mxu1 }
 0x35b   : > { %2389 = vst [vmem:[%s215_s18 + $0x8] sm:$0xff] %v2101_v38  ;;  %2391 = vst [vmem:[%s215_s18 + $0x18] sm:$0xff] %v2385_v39 }
 0x35c   : > { %3732 = shalt.err (!%p3729_p2)
}
 0x35d   : > { %s3733_s23 = scalar_lea.hbm %s4036_s22, 512  ;;  %s3737_s17 = scalar_lea.hbm %s4081_s3, 1024 }
 0x35e   : > { %p3734_p13 = scmp.ne.s32.totalorder %s4036_s22, %s3733_s23  ;;  %p3738_p4 = scmp.lt.u32.totalorder %s4036_s22, %s4081_s3 }
 0x35f   : > { %p3739_p7 = scmp.lt.u32.totalorder %s3737_s17, %s3733_s23  ;;  %p3741_p11 = scmp.lt.u32.totalorder %s3733_s23, %s4036_s22 }
 0x360   : > { %p3735_p6 = pnand %p3734_p13, %p4095_p0 }
 0x361   : > { %p3740_p8 = por %p3739_p7, %p3738_p4 }
 0x362   : > { %p3736_p10 = pneg %p3735_p6 }
 0x363   : > { %p3742_p1 = por %p3741_p11, %p3740_p8 }
 0x365   : > { %p3743_p3 = pnand %p3742_p1, %p3736_p10 }
 0x367   : > { %3746 = shalt.err (!%p3743_p3)
}
 0x368   : > { %3570 = dma.vmem_to_hbm [thread:$0]  (%p4095_p0), %s4031_s20, 512, %s4036_s22, %s2393_s4  }
 0x369 PF: > { %s2419_s29 = sand.u32 1, %s3777_s12   ;;  %p4096_p5 = scmp.ne.s32.totalorder %s4086_s19, 0 }
 0x36a   : > { %p4097_p9 = scmp.ge.s32.totalorder %s3789_s15, 2  ;;  %s2420_s30 = scalar_lea.sflag [#allocation4], %s2419_s29 }
 0x36c   : > { %p3584_p12 = pnand %p4097_p9, %p4096_p5 }
 0x36e   : > { %3772 = dma.done.wait (!%p3584_p12), %s2420_s30, 512  }
 0x36f   : > { %3774 = vsyncadd (!%p3584_p12), %s2420_s30, 4294966784  ;;  %p17_p2 = scmp.ge.s32.totalorder %s3929_s6, 4   ;;  %s4098_s12 = smov %s3781_s13 }
 0x370   : > { %s4099_s13 = smov %s3785_s14  ;;  %s4100_s14 = smov %s3938_s9 }
 0x371   : > { %s4101_s15 = smov %s3929_s6  ;;  %19 = sbr.rel (!%p17_p2) target bundleno = 6 (0x6), region = 85 }
 0x378   :  { %2425 = vsyncpa [#allocation3], 1 }
 0x379   :  { %2427 = vsyncpa [#allocation3 + $0x1], 1 }
 0x37a   :  { %2428 = vsyncpa [#allocation6], 1 }
 0x37b   :  { %2429 = vsyncpa [#allocation4], 1 }
 0x37c   :  { %2431 = vsyncpa [#allocation4 + $0x1], 1 }

</bundles_post_ra>
